<compile_context>
chip_gen: v5e
topology: v5e:2x2
jax: 0.10.0
libtpu: 0.0.40
codegen_flags: <defaults>
</compile_context>

<pallas_src>
import functools

import jax
import jax.numpy as jnp
from jax.experimental import pallas as pl
from jax.experimental.pallas import tpu as pltpu


# ----------------------------------------------------------------------------
# In-kernel elementwise helpers (VPU / EUP)
# ----------------------------------------------------------------------------

def _elu(x):
    return jnp.where(x > 0, x, jnp.exp(jnp.minimum(x, 0.0)) - 1.0)


def _sigmoid(x):
    # numerically stable: never exponentiates a positive argument
    e = jnp.exp(-jnp.abs(x))
    return jnp.where(x >= 0, 1.0 / (1.0 + e), e / (1.0 + e))


# ----------------------------------------------------------------------------
# Pallas kernels
# ----------------------------------------------------------------------------

def _linear_elu_kernel(z_ref, w_ref, b_ref, o_ref):
    # z: (B, Zdim), w: (Zdim, N), b: (1, N)  ->  o = ELU(z @ w + b)
    y = jnp.dot(z_ref[...], w_ref[...], preferred_element_type=jnp.float32)
    o_ref[...] = _elu(y + b_ref[...])


def _conv_group_kernel(*refs, cfgs, H, W):
    """Chain of fused 3x3 'same' convs at one resolution, one batch element.

    Layout: the activation is stored row-flattened with a zero-pad halo,
        xf[c, r*Wp + col] = X[c, r-1, col-1],  Wp = W+2, r in [0,H+2), col in [0,Wp)
    plus 2 trailing zeros.  Tap (dy,dx) is then just the lane slice
    xf[:, dy*Wp+dx : dy*Wp+dx + H*Wp], so the conv is 9 accumulated
    (Cout,Cin) @ (Cin,H*Wp) matmuls with NO materialized im2col.  The result
    acc[:, y*Wp+x] holds output pixel (y,x) for x < W; the two columns per row
    with x in {W, W+1} are don't-care and are zeroed (mask) when the
    activation is re-padded into the VMEM scratch for the next conv.
    """
    Wp = W + 2
    HWp = H * Wp
    multi = len(cfgs) > 1

    x_ref, mask_ref = refs[0], refs[1]
    if multi:
        out_ref, scratch_ref = refs[-2], refs[-1]
        conv_refs = refs[2:-2]
    else:
        out_ref, scratch_ref = refs[-1], None
        conv_refs = refs[2:-1]

    # Parse per-conv parameter refs according to the static config.
    pos = 0
    parsed = []
    for cfg in cfgs:
        w_ref = conv_refs[pos]; pos += 1
        b_ref = s_ref = t_ref = None
        if cfg["bias"]:
            b_ref = conv_refs[pos]; pos += 1
        if cfg["bn"]:
            s_ref = conv_refs[pos]; pos += 1
            t_ref = conv_refs[pos]; pos += 1
        parsed.append((w_ref, b_ref, s_ref, t_ref))

    prev_acc = None
    for idx, (cfg, (w_ref, b_ref, s_ref, t_ref)) in enumerate(zip(cfgs, parsed)):
        cin, cout = cfg["cin"], cfg["cout"]

        # -- 9 tap-accumulated contractions (bf16 operands, f32 accumulate) --
        acc = None
        for dy in range(3):
            for dx in range(3):
                off = dy * Wp + dx
                if idx == 0:
                    xs = x_ref[0, :, off:off + HWp]          # (cin, HWp) bf16
                else:
                    xs = scratch_ref[:, off:off + HWp]
                wt = w_ref[dy * 3 + dx]                      # (cout, cin) bf16
                if cin == 1:
                    # broadcast VPU FMA; a K=1 MXU matmul would be pure drain
                    contrib = wt.astype(jnp.float32) * xs.astype(jnp.float32)
                else:
                    contrib = jnp.dot(wt, xs,
                                      preferred_element_type=jnp.float32)
                acc = contrib if acc is None else acc + contrib

        # -- fused epilogue: only the ops this stage actually has --
        if cfg["bias"]:
            acc = acc + b_ref[...]                           # (cout,1) bcast
        if cfg["act"] == "elu":
            acc = _elu(acc)
        elif cfg["act"] == "sigmoid":
            acc = _sigmoid(acc)
        if cfg["bn"]:
            acc = acc * s_ref[...] + t_ref[...]
        if cfg["residual"]:
            acc = acc + prev_acc                             # same layout, plain add
        prev_acc = acc

        # -- re-pad into the flat halo layout for the next conv (VMEM only) --
        if idx + 1 < len(cfgs):
            yb = (acc * mask_ref[...]).astype(jnp.bfloat16)  # zero pad columns
            zpad = jnp.zeros((cout, Wp + 1), jnp.bfloat16)
            scratch_ref[...] = jnp.concatenate([zpad, yb, zpad], axis=-1)

    out_ref[0] = prev_acc.astype(out_ref.dtype)


# ----------------------------------------------------------------------------
# Wrappers
# ----------------------------------------------------------------------------

def linear_elu(z, w, b):
    B = z.shape[0]
    N = w.shape[1]
    return pl.pallas_call(
        _linear_elu_kernel,
        out_shape=jax.ShapeDtypeStruct((B, N), jnp.float32),
    )(z, w, b.reshape(1, N))


def _w_to_taps(w_hwio):
    """(3,3,Cin,Cout) HWIO -> (9, Cout, Cin) bf16, tap order t = dy*3+dx."""
    kh, kw, cin, cout = w_hwio.shape
    assert (kh, kw) == (3, 3)
    return (jnp.transpose(w_hwio, (0, 1, 3, 2))
            .reshape(9, cout, cin).astype(jnp.bfloat16))


def conv_group(x_flat, convs, *, H, W, out_dtype):
    """One fused pallas_call running a chain of 3x3 convs at one resolution.

    x_flat : (B, Cin0, L) bf16, padded flat layout, L = (H+2)*(W+2) + 2
    convs  : list of dicts: w (3,3,Cin,Cout) [, bias, act, bn=(s,t), residual]
    returns (B, Cout_last, H*(W+2)); valid pixel (y,x) at [..., y*(W+2)+x], x<W.
    """
    B, cin0, L = x_flat.shape
    Wp = W + 2
    HWp = H * Wp
    assert L == (H + 2) * Wp + 2

    # 0/1 mask over the flattened output: zero on the 2 don't-care columns/row.
    mask = (jnp.arange(HWp, dtype=jnp.int32) % Wp < W)
    mask = mask.astype(jnp.float32).reshape(1, HWp)

    args = [x_flat, mask]
    in_specs = [
        pl.BlockSpec((1, cin0, L), lambda b: (b, 0, 0)),
        pl.BlockSpec((1, HWp), lambda b: (0, 0)),
    ]

    def _const(arr):
        nd = arr.ndim
        args.append(arr)
        in_specs.append(pl.BlockSpec(arr.shape, lambda b: (0,) * nd))

    cfgs = []
    prev_cout = cin0
    for c in convs:
        w_taps = _w_to_taps(c["w"])
        _, cout, cin = w_taps.shape
        assert cin == prev_cout
        cfg = dict(cin=cin, cout=cout,
                   bias=c.get("bias") is not None,
                   act=c.get("act", "none"),
                   bn=c.get("bn") is not None,
                   residual=bool(c.get("residual", False)))
        cfgs.append(cfg)
        _const(w_taps)
        if cfg["bias"]:
            _const(jnp.asarray(c["bias"], jnp.float32).reshape(cout, 1))
        if cfg["bn"]:
            s, t = c["bn"]
            _const(jnp.asarray(s, jnp.float32).reshape(cout, 1))
            _const(jnp.asarray(t, jnp.float32).reshape(cout, 1))
        prev_cout = cout

    cout_last = cfgs[-1]["cout"]
    scratch_shapes = []
    if len(cfgs) > 1:
        inter_couts = {cfg["cout"] for cfg in cfgs[:-1]}
        assert len(inter_couts) == 1
        c_inter = inter_couts.pop()
        assert all(cfg["cin"] == c_inter for cfg in cfgs[1:])
        scratch_shapes = [pltpu.VMEM((c_inter, L), jnp.bfloat16)]

    kernel = functools.partial(_conv_group_kernel, cfgs=tuple(cfgs), H=H, W=W)

    return pl.pallas_call(
        kernel,
        out_shape=jax.ShapeDtypeStruct((B, cout_last, HWp), out_dtype),
        grid=(B,),
        in_specs=in_specs,
        out_specs=pl.BlockSpec((1, cout_last, HWp), lambda b: (b, 0, 0)),
        scratch_shapes=scratch_shapes,
        compiler_params=pltpu.CompilerParams(
            dimension_semantics=("parallel",),
            vmem_limit_bytes=48 * 1024 * 1024),
    )(*args)


# ----------------------------------------------------------------------------
# Host-side glue (XLA data movement between resolution groups)
# ----------------------------------------------------------------------------

def _upsample2x(x):
    """nn.Upsample(scale_factor=2, mode='nearest') on NCHW."""
    return jnp.repeat(jnp.repeat(x, 2, axis=2), 2, axis=3)


def _pad_flatten(x):
    """(B,C,H,W) -> (B,C,(H+2)*(W+2)+2) bf16 zero-padded row-flattened layout."""
    B, C, H, W = x.shape
    xp = jnp.pad(x, ((0, 0), (0, 0), (1, 1), (1, 1)))
    xf = xp.reshape(B, C, (H + 2) * (W + 2))
    xf = jnp.pad(xf, ((0, 0), (0, 0), (0, 2)))
    return xf.astype(jnp.bfloat16)


def _extract_valid(y_flat, H, W):
    """(B,C,H*(W+2)) -> (B,C,H,W): drop the 2 don't-care columns per row."""
    B, C, _ = y_flat.shape
    return y_flat.reshape(B, C, H, W + 2)[:, :, :, :W]


def _fuse_upres(p):
    """Fold the assumed 1x1 skip conv into the centre tap of the 3x3 conv."""
    w = p["w3"].at[1, 1].add(p["w1"][0, 0])
    b = p["b3"] + p["b1"]
    return w, b


# ----------------------------------------------------------------------------
# Decoder forward
# ----------------------------------------------------------------------------

def decoder_forward(z, P, outsize):
    assert outsize % 8 == 0
    s0 = outsize // 8
    B = z.shape[0]

    # Linear + first ELU (fused epilogue)
    h = linear_elu(z, P["lin_w"], P["lin_b"])            # (B, s0*s0) f32
    x = h.reshape(B, 1, s0, s0)

    bn_scale = P["bn_gamma"] * jax.lax.rsqrt(P["bn_var"] + 1e-5)
    bn_shift = P["bn_beta"] - P["bn_mean"] * bn_scale
    w_up1, b_up1 = _fuse_upres(P["up1"])
    w_up2, b_up2 = _fuse_upres(P["up2"])
    w_up3, b_up3 = _fuse_upres(P["up3"])

    # group A (res 2*s0): UpResBloc(1,32)+ELU+BN -> ConvBlock(32)
    r1 = 2 * s0
    xa = _pad_flatten(_upsample2x(x))
    ya = conv_group(
        xa,
        [dict(w=w_up1, bias=b_up1, act="elu", bn=(bn_scale, bn_shift)),
         dict(w=P["cb1_w"], residual=True)],
        H=r1, W=r1, out_dtype=jnp.bfloat16)

    # group B (res 4*s0): UpResBloc(32,32)+ELU -> ConvBlock(32) x2
    r2 = 4 * s0
    xb = _pad_flatten(_upsample2x(_extract_valid(ya, r1, r1)))
    yb = conv_group(
        xb,
        [dict(w=w_up2, bias=b_up2, act="elu"),
         dict(w=P["cb2_w"], residual=True),
         dict(w=P["cb3_w"], residual=True)],
        H=r2, W=r2, out_dtype=jnp.bfloat16)

    # group C (res outsize): UpResBloc(32,1)+Sigmoid
    xc = _pad_flatten(_upsample2x(_extract_valid(yb, r2, r2)))
    yc = conv_group(
        xc,
        [dict(w=w_up3, bias=b_up3, act="sigmoid")],
        H=outsize, W=outsize, out_dtype=jnp.float32)

    return _extract_valid(yc, outsize, outsize)          # (B,1,outsize,outsize)


# ----------------------------------------------------------------------------
# Pure-JAX (XLA, f32) reference with the same assumed module structure
# ----------------------------------------------------------------------------

def decoder_reference(z, P, outsize):
    s0 = outsize // 8
    B = z.shape[0]

    def conv(x, w, b=None):
        y = jax.lax.conv_general_dilated(
            x, w, window_strides=(1, 1), padding="SAME",
            dimension_numbers=("NCHW", "HWIO", "NCHW"))
        if b is not None:
            y = y + b.reshape(1, -1, 1, 1)
        return y

    def upres(x, p):
        u = _upsample2x(x)
        return conv(u, p["w3"], p["b3"]) + conv(u, p["w1"], p["b1"])

    x = jax.nn.elu(z @ P["lin_w"] + P["lin_b"]).reshape(B, 1, s0, s0)
    x = jax.nn.elu(upres(x, P["up1"]))
    scale = P["bn_gamma"] * jax.lax.rsqrt(P["bn_var"] + 1e-5)
    shift = P["bn_beta"] - P["bn_mean"] * scale
    x = x * scale.reshape(1, -1, 1, 1) + shift.reshape(1, -1, 1, 1)
    x = x + conv(x, P["cb1_w"])
    x = jax.nn.elu(upres(x, P["up2"]))
    x = x + conv(x, P["cb2_w"])
    x = x + conv(x, P["cb3_w"])
    return jax.nn.sigmoid(upres(x, P["up3"]))


# ----------------------------------------------------------------------------
# Deterministic parameter construction
# ----------------------------------------------------------------------------

def make_params(key, z_dim, outsize):
    s0 = outsize // 8
    ks = jax.random.split(key, 16)
    nrm = lambda k, shp, s=0.1: (s * jax.random.normal(k, shp)).astype(jnp.float32)

    def up_params(k, cin, cout):
        k1, k2, k3, k4 = jax.random.split(k, 4)
        return {"w3": nrm(k1, (3, 3, cin, cout)), "b3": nrm(k2, (cout,)),
                "w1": nrm(k3, (1, 1, cin, cout)), "b1": nrm(k4, (cout,))}

    return {
        "lin_w": nrm(ks[0], (z_dim, s0 * s0)),
        "lin_b": nrm(ks[1], (s0 * s0,)),
        "up1": up_params(ks[2], 1, 32),
        "bn_gamma": (1.0 + 0.1 * jax.random.normal(ks[3], (32,))).astype(jnp.float32),
        "bn_beta": nrm(ks[4], (32,)),
        "bn_mean": jnp.zeros((32,), jnp.float32),
        "bn_var": jnp.ones((32,), jnp.float32),
        "cb1_w": nrm(ks[5], (3, 3, 32, 32)),
        "up2": up_params(ks[6], 32, 32),
        "cb2_w": nrm(ks[7], (3, 3, 32, 32)),
        "cb3_w": nrm(ks[8], (3, 3, 32, 32)),
        "up3": up_params(ks[9], 32, 1),
    }


# ----------------------------------------------------------------------------
# Main
# ----------------------------------------------------------------------------

if __name__ == "__main__":
    z_dim = 10
    outsize = 16          # must be divisible by 8; small for the demo
    batch = 2

    key = jax.random.PRNGKey(0)
    k_param, k_z = jax.random.split(key)
    params = make_params(k_param, z_dim, outsize)
    z = jax.random.normal(k_z, (batch, z_dim), dtype=jnp.float32)

    fwd = jax.jit(functools.partial(decoder_forward, outsize=outsize))
    out = jax.block_until_ready(fwd(z, params))

    assert out.shape == (batch, 1, outsize, outsize), out.shape
    assert bool(jnp.all(jnp.isfinite(out)))
    assert bool(jnp.all((out >= 0.0) & (out <= 1.0)))  # sigmoid range

    # cross-check against a pure-JAX f32 reference (bf16 tolerance)
    ref = jax.block_until_ready(
        jax.jit(functools.partial(decoder_reference, outsize=outsize))(z, params))
    max_err = float(jnp.max(jnp.abs(out - ref.astype(out.dtype))))
    assert max_err < 5e-2, f"mismatch vs reference: {max_err}"

    print("KERNEL_OK")
</pallas_src>

<mosaic_0001>
module attributes {stable_mosaic.version = 11 : i64} {
  func.func @_linear_elu_kernel(%arg0: memref<2x10xf32, #tpu.memory_space<vmem>>, %arg1: memref<10x4xf32, #tpu.memory_space<vmem>>, %arg2: memref<1x4xf32, #tpu.memory_space<vmem>>, %arg3: memref<2x4xf32, #tpu.memory_space<vmem>>) attributes {dimension_semantics = [], scalar_prefetch = 0 : i64, scratch_operands = 0 : i64, tpu.core_type = #tpu.core_type<tc>} {
    %c0 = arith.constant 0 : index
    %c0_0 = arith.constant 0 : index
    %0 = vector.load %arg0[%c0, %c0_0] : memref<2x10xf32, #tpu.memory_space<vmem>>, vector<2x10xf32>
    %c0_1 = arith.constant 0 : index
    %c0_2 = arith.constant 0 : index
    %1 = vector.load %arg1[%c0_1, %c0_2] : memref<10x4xf32, #tpu.memory_space<vmem>>, vector<10x4xf32>
    %cst = arith.constant dense<0.000000e+00> : vector<2x4xf32>
    %2 = tpu.matmul %0, %1, %cst {dimension_numbers = #tpu.dot_dimension_numbers<[1], [0], [0], [1], [0, 0, 1, 1], [], []>} : vector<2x10xf32>, vector<10x4xf32>, vector<2x4xf32> -> vector<2x4xf32>
    %c0_3 = arith.constant 0 : index
    %c0_4 = arith.constant 0 : index
    %3 = vector.load %arg2[%c0_3, %c0_4] : memref<1x4xf32, #tpu.memory_space<vmem>>, vector<1x4xf32>
    %4 = vector.broadcast %3 : vector<1x4xf32> to vector<2x4xf32>
    %5 = arith.addf %2, %4 : vector<2x4xf32>
    %cst_5 = arith.constant 0.000000e+00 : f32
    %6 = vector.broadcast %cst_5 : f32 to vector<2x4xf32>
    %7 = arith.cmpf ogt, %5, %6 : vector<2x4xf32>
    %cst_6 = arith.constant 0.000000e+00 : f32
    %8 = vector.broadcast %cst_6 : f32 to vector<2x4xf32>
    %9 = arith.minimumf %5, %8 : vector<2x4xf32>
    %10 = math.exp %9 : vector<2x4xf32>
    %cst_7 = arith.constant 1.000000e+00 : f32
    %11 = vector.broadcast %cst_7 : f32 to vector<2x4xf32>
    %12 = arith.subf %10, %11 : vector<2x4xf32>
    %13 = arith.select %7, %5, %12 : vector<2x4xi1>, vector<2x4xf32>
    %c0_8 = arith.constant 0 : index
    %c0_9 = arith.constant 0 : index
    %14 = vector.load %arg3[%c0_8, %c0_9] : memref<2x4xf32, #tpu.memory_space<vmem>>, vector<2x4xf32>
    tpu.vector_store %arg3[%c0_8, %c0_9], %13 {strides = array<i32>} : memref<2x4xf32, #tpu.memory_space<vmem>>, vector<2x4xf32>,
    return
  }
}

module attributes {stable_mosaic.version = 11 : i64} {
  func.func @_conv_group_kernel(%arg0: i32, %arg1: memref<1x1x38xbf16, #tpu.memory_space<vmem>>, %arg2: memref<1x24xf32, #tpu.memory_space<vmem>>, %arg3: memref<9x32x1xbf16, #tpu.memory_space<vmem>>, %arg4: memref<32x1xf32, #tpu.memory_space<vmem>>, %arg5: memref<32x1xf32, #tpu.memory_space<vmem>>, %arg6: memref<32x1xf32, #tpu.memory_space<vmem>>, %arg7: memref<9x32x32xbf16, #tpu.memory_space<vmem>>, %arg8: memref<1x32x24xbf16, #tpu.memory_space<vmem>>, %arg9: memref<32x38xbf16, #tpu.memory_space<vmem>>) attributes {dimension_semantics = [#tpu.dimension_semantics<parallel>], iteration_bounds = array<i64: 2>, scalar_prefetch = 0 : i64, scratch_operands = 1 : i64, tpu.core_type = #tpu.core_type<tc>, window_params = [{transform_indices = @transform_0, window_bounds = array<i64: 1, 1, 38>}, {pipeline_mode = #tpu.pipeline_mode<synchronous>, transform_indices = @transform_1, window_bounds = array<i64: 1, 24>}, {pipeline_mode = #tpu.pipeline_mode<synchronous>, transform_indices = @transform_2, window_bounds = array<i64: 9, 32, 1>}, {pipeline_mode = #tpu.pipeline_mode<synchronous>, transform_indices = @transform_3, window_bounds = array<i64: 32, 1>}, {pipeline_mode = #tpu.pipeline_mode<synchronous>, transform_indices = @transform_4, window_bounds = array<i64: 32, 1>}, {pipeline_mode = #tpu.pipeline_mode<synchronous>, transform_indices = @transform_5, window_bounds = array<i64: 32, 1>}, {pipeline_mode = #tpu.pipeline_mode<synchronous>, transform_indices = @transform_6, window_bounds = array<i64: 9, 32, 32>}, {transform_indices = @transform_7, window_bounds = array<i64: 1, 32, 24>}]} {
    %c0 = arith.constant 0 : index
    %c0_0 = arith.constant 0 : index
    %c0_1 = arith.constant 0 : index
    %0 = vector.load %arg1[%c0, %c0_0, %c0_1] : memref<1x1x38xbf16, #tpu.memory_space<vmem>>, vector<1x1x24xbf16>
    %1 = vector.shape_cast %0 : vector<1x1x24xbf16> to vector<1x24xbf16>
    %c0_2 = arith.constant 0 : index
    %c0_3 = arith.constant 0 : index
    %c0_4 = arith.constant 0 : index
    %2 = vector.load %arg3[%c0_2, %c0_3, %c0_4] : memref<9x32x1xbf16, #tpu.memory_space<vmem>>, vector<1x32x1xbf16>
    %3 = vector.shape_cast %2 : vector<1x32x1xbf16> to vector<32x1xbf16>
    %4 = arith.extf %3 : vector<32x1xbf16> to vector<32x1xf32>
    %5 = arith.extf %1 : vector<1x24xbf16> to vector<1x24xf32>
    %6 = vector.broadcast %4 : vector<32x1xf32> to vector<32x24xf32>
    %7 = vector.broadcast %5 : vector<1x24xf32> to vector<32x24xf32>
    %8 = arith.mulf %6, %7 : vector<32x24xf32>
    %c0_5 = arith.constant 0 : index
    %c0_6 = arith.constant 0 : index
    %c1 = arith.constant 1 : index
    %9 = vector.load %arg1[%c0_5, %c0_6, %c1] : memref<1x1x38xbf16, #tpu.memory_space<vmem>>, vector<1x1x24xbf16>
    %10 = vector.shape_cast %9 : vector<1x1x24xbf16> to vector<1x24xbf16>
    %c1_7 = arith.constant 1 : index
    %c0_8 = arith.constant 0 : index
    %c0_9 = arith.constant 0 : index
    %11 = vector.load %arg3[%c1_7, %c0_8, %c0_9] : memref<9x32x1xbf16, #tpu.memory_space<vmem>>, vector<1x32x1xbf16>
    %12 = vector.shape_cast %11 : vector<1x32x1xbf16> to vector<32x1xbf16>
    %13 = arith.extf %12 : vector<32x1xbf16> to vector<32x1xf32>
    %14 = arith.extf %10 : vector<1x24xbf16> to vector<1x24xf32>
    %15 = vector.broadcast %13 : vector<32x1xf32> to vector<32x24xf32>
    %16 = vector.broadcast %14 : vector<1x24xf32> to vector<32x24xf32>
    %17 = arith.mulf %15, %16 : vector<32x24xf32>
    %18 = arith.addf %8, %17 : vector<32x24xf32>
    %c0_10 = arith.constant 0 : index
    %c0_11 = arith.constant 0 : index
    %c2 = arith.constant 2 : index
    %19 = vector.load %arg1[%c0_10, %c0_11, %c2] : memref<1x1x38xbf16, #tpu.memory_space<vmem>>, vector<1x1x24xbf16>
    %20 = vector.shape_cast %19 : vector<1x1x24xbf16> to vector<1x24xbf16>
    %c2_12 = arith.constant 2 : index
    %c0_13 = arith.constant 0 : index
    %c0_14 = arith.constant 0 : index
    %21 = vector.load %arg3[%c2_12, %c0_13, %c0_14] : memref<9x32x1xbf16, #tpu.memory_space<vmem>>, vector<1x32x1xbf16>
    %22 = vector.shape_cast %21 : vector<1x32x1xbf16> to vector<32x1xbf16>
    %23 = arith.extf %22 : vector<32x1xbf16> to vector<32x1xf32>
    %24 = arith.extf %20 : vector<1x24xbf16> to vector<1x24xf32>
    %25 = vector.broadcast %23 : vector<32x1xf32> to vector<32x24xf32>
    %26 = vector.broadcast %24 : vector<1x24xf32> to vector<32x24xf32>
    %27 = arith.mulf %25, %26 : vector<32x24xf32>
    %28 = arith.addf %18, %27 : vector<32x24xf32>
    %c0_15 = arith.constant 0 : index
    %c0_16 = arith.constant 0 : index
    %c6 = arith.constant 6 : index
    %29 = vector.load %arg1[%c0_15, %c0_16, %c6] : memref<1x1x38xbf16, #tpu.memory_space<vmem>>, vector<1x1x24xbf16>
    %30 = vector.shape_cast %29 : vector<1x1x24xbf16> to vector<1x24xbf16>
    %c3 = arith.constant 3 : index
    %c0_17 = arith.constant 0 : index
    %c0_18 = arith.constant 0 : index
    %31 = vector.load %arg3[%c3, %c0_17, %c0_18] : memref<9x32x1xbf16, #tpu.memory_space<vmem>>, vector<1x32x1xbf16>
    %32 = vector.shape_cast %31 : vector<1x32x1xbf16> to vector<32x1xbf16>
    %33 = arith.extf %32 : vector<32x1xbf16> to vector<32x1xf32>
    %34 = arith.extf %30 : vector<1x24xbf16> to vector<1x24xf32>
    %35 = vector.broadcast %33 : vector<32x1xf32> to vector<32x24xf32>
    %36 = vector.broadcast %34 : vector<1x24xf32> to vector<32x24xf32>
    %37 = arith.mulf %35, %36 : vector<32x24xf32>
    %38 = arith.addf %28, %37 : vector<32x24xf32>
    %c0_19 = arith.constant 0 : index
    %c0_20 = arith.constant 0 : index
    %c7 = arith.constant 7 : index
    %39 = vector.load %arg1[%c0_19, %c0_20, %c7] : memref<1x1x38xbf16, #tpu.memory_space<vmem>>, vector<1x1x24xbf16>
    %40 = vector.shape_cast %39 : vector<1x1x24xbf16> to vector<1x24xbf16>
    %c4 = arith.constant 4 : index
    %c0_21 = arith.constant 0 : index
    %c0_22 = arith.constant 0 : index
    %41 = vector.load %arg3[%c4, %c0_21, %c0_22] : memref<9x32x1xbf16, #tpu.memory_space<vmem>>, vector<1x32x1xbf16>
    %42 = vector.shape_cast %41 : vector<1x32x1xbf16> to vector<32x1xbf16>
    %43 = arith.extf %42 : vector<32x1xbf16> to vector<32x1xf32>
    %44 = arith.extf %40 : vector<1x24xbf16> to vector<1x24xf32>
    %45 = vector.broadcast %43 : vector<32x1xf32> to vector<32x24xf32>
    %46 = vector.broadcast %44 : vector<1x24xf32> to vector<32x24xf32>
    %47 = arith.mulf %45, %46 : vector<32x24xf32>
    %48 = arith.addf %38, %47 : vector<32x24xf32>
    %c0_23 = arith.constant 0 : index
    %c0_24 = arith.constant 0 : index
    %c8 = arith.constant 8 : index
    %49 = vector.load %arg1[%c0_23, %c0_24, %c8] : memref<1x1x38xbf16, #tpu.memory_space<vmem>>, vector<1x1x24xbf16>
    %50 = vector.shape_cast %49 : vector<1x1x24xbf16> to vector<1x24xbf16>
    %c5 = arith.constant 5 : index
    %c0_25 = arith.constant 0 : index
    %c0_26 = arith.constant 0 : index
    %51 = vector.load %arg3[%c5, %c0_25, %c0_26] : memref<9x32x1xbf16, #tpu.memory_space<vmem>>, vector<1x32x1xbf16>
    %52 = vector.shape_cast %51 : vector<1x32x1xbf16> to vector<32x1xbf16>
    %53 = arith.extf %52 : vector<32x1xbf16> to vector<32x1xf32>
    %54 = arith.extf %50 : vector<1x24xbf16> to vector<1x24xf32>
    %55 = vector.broadcast %53 : vector<32x1xf32> to vector<32x24xf32>
    %56 = vector.broadcast %54 : vector<1x24xf32> to vector<32x24xf32>
    %57 = arith.mulf %55, %56 : vector<32x24xf32>
    %58 = arith.addf %48, %57 : vector<32x24xf32>
    %c0_27 = arith.constant 0 : index
    %c0_28 = arith.constant 0 : index
    %c12 = arith.constant 12 : index
    %59 = vector.load %arg1[%c0_27, %c0_28, %c12] : memref<1x1x38xbf16, #tpu.memory_space<vmem>>, vector<1x1x24xbf16>
    %60 = vector.shape_cast %59 : vector<1x1x24xbf16> to vector<1x24xbf16>
    %c6_29 = arith.constant 6 : index
    %c0_30 = arith.constant 0 : index
    %c0_31 = arith.constant 0 : index
    %61 = vector.load %arg3[%c6_29, %c0_30, %c0_31] : memref<9x32x1xbf16, #tpu.memory_space<vmem>>, vector<1x32x1xbf16>
    %62 = vector.shape_cast %61 : vector<1x32x1xbf16> to vector<32x1xbf16>
    %63 = arith.extf %62 : vector<32x1xbf16> to vector<32x1xf32>
    %64 = arith.extf %60 : vector<1x24xbf16> to vector<1x24xf32>
    %65 = vector.broadcast %63 : vector<32x1xf32> to vector<32x24xf32>
    %66 = vector.broadcast %64 : vector<1x24xf32> to vector<32x24xf32>
    %67 = arith.mulf %65, %66 : vector<32x24xf32>
    %68 = arith.addf %58, %67 : vector<32x24xf32>
    %c0_32 = arith.constant 0 : index
    %c0_33 = arith.constant 0 : index
    %c13 = arith.constant 13 : index
    %69 = vector.load %arg1[%c0_32, %c0_33, %c13] : memref<1x1x38xbf16, #tpu.memory_space<vmem>>, vector<1x1x24xbf16>
    %70 = vector.shape_cast %69 : vector<1x1x24xbf16> to vector<1x24xbf16>
    %c7_34 = arith.constant 7 : index
    %c0_35 = arith.constant 0 : index
    %c0_36 = arith.constant 0 : index
    %71 = vector.load %arg3[%c7_34, %c0_35, %c0_36] : memref<9x32x1xbf16, #tpu.memory_space<vmem>>, vector<1x32x1xbf16>
    %72 = vector.shape_cast %71 : vector<1x32x1xbf16> to vector<32x1xbf16>
    %73 = arith.extf %72 : vector<32x1xbf16> to vector<32x1xf32>
    %74 = arith.extf %70 : vector<1x24xbf16> to vector<1x24xf32>
    %75 = vector.broadcast %73 : vector<32x1xf32> to vector<32x24xf32>
    %76 = vector.broadcast %74 : vector<1x24xf32> to vector<32x24xf32>
    %77 = arith.mulf %75, %76 : vector<32x24xf32>
    %78 = arith.addf %68, %77 : vector<32x24xf32>
    %c0_37 = arith.constant 0 : index
    %c0_38 = arith.constant 0 : index
    %c14 = arith.constant 14 : index
    %79 = vector.load %arg1[%c0_37, %c0_38, %c14] : memref<1x1x38xbf16, #tpu.memory_space<vmem>>, vector<1x1x24xbf16>
    %80 = vector.shape_cast %79 : vector<1x1x24xbf16> to vector<1x24xbf16>
    %c8_39 = arith.constant 8 : index
    %c0_40 = arith.constant 0 : index
    %c0_41 = arith.constant 0 : index
    %81 = vector.load %arg3[%c8_39, %c0_40, %c0_41] : memref<9x32x1xbf16, #tpu.memory_space<vmem>>, vector<1x32x1xbf16>
    %82 = vector.shape_cast %81 : vector<1x32x1xbf16> to vector<32x1xbf16>
    %83 = arith.extf %82 : vector<32x1xbf16> to vector<32x1xf32>
    %84 = arith.extf %80 : vector<1x24xbf16> to vector<1x24xf32>
    %85 = vector.broadcast %83 : vector<32x1xf32> to vector<32x24xf32>
    %86 = vector.broadcast %84 : vector<1x24xf32> to vector<32x24xf32>
    %87 = arith.mulf %85, %86 : vector<32x24xf32>
    %88 = arith.addf %78, %87 : vector<32x24xf32>
    %c0_42 = arith.constant 0 : index
    %c0_43 = arith.constant 0 : index
    %89 = vector.load %arg4[%c0_42, %c0_43] : memref<32x1xf32, #tpu.memory_space<vmem>>, vector<32x1xf32>
    %90 = vector.broadcast %89 : vector<32x1xf32> to vector<32x24xf32>
    %91 = arith.addf %88, %90 : vector<32x24xf32>
    %cst = arith.constant 0.000000e+00 : f32
    %92 = vector.broadcast %cst : f32 to vector<32x24xf32>
    %93 = arith.cmpf ogt, %91, %92 : vector<32x24xf32>
    %cst_44 = arith.constant 0.000000e+00 : f32
    %94 = vector.broadcast %cst_44 : f32 to vector<32x24xf32>
    %95 = arith.minimumf %91, %94 : vector<32x24xf32>
    %96 = math.exp %95 : vector<32x24xf32>
    %cst_45 = arith.constant 1.000000e+00 : f32
    %97 = vector.broadcast %cst_45 : f32 to vector<32x24xf32>
    %98 = arith.subf %96, %97 : vector<32x24xf32>
    %99 = arith.select %93, %91, %98 : vector<32x24xi1>, vector<32x24xf32>
    %c0_46 = arith.constant 0 : index
    %c0_47 = arith.constant 0 : index
    %100 = vector.load %arg5[%c0_46, %c0_47] : memref<32x1xf32, #tpu.memory_space<vmem>>, vector<32x1xf32>
    %101 = vector.broadcast %100 : vector<32x1xf32> to vector<32x24xf32>
    %102 = arith.mulf %99, %101 : vector<32x24xf32>
    %c0_48 = arith.constant 0 : index
    %c0_49 = arith.constant 0 : index
    %103 = vector.load %arg6[%c0_48, %c0_49] : memref<32x1xf32, #tpu.memory_space<vmem>>, vector<32x1xf32>
    %104 = vector.broadcast %103 : vector<32x1xf32> to vector<32x24xf32>
    %105 = arith.addf %102, %104 : vector<32x24xf32>
    %c0_50 = arith.constant 0 : index
    %c0_51 = arith.constant 0 : index
    %106 = vector.load %arg2[%c0_50, %c0_51] : memref<1x24xf32, #tpu.memory_space<vmem>>, vector<1x24xf32>
    %107 = vector.broadcast %106 : vector<1x24xf32> to vector<32x24xf32>
    %108 = arith.mulf %105, %107 : vector<32x24xf32>
    %109 = arith.truncf %108 : vector<32x24xf32> to vector<32x24xbf16>
    %cst_52 = arith.constant 0.000000e+00 : bf16
    %110 = vector.broadcast %cst_52 : bf16 to vector<32x7xbf16>
    %111 = tpu.concatenate %110, %109, %110 in 1 : vector<32x7xbf16>, vector<32x24xbf16>, vector<32x7xbf16> -> vector<32x38xbf16>
    %c0_53 = arith.constant 0 : index
    %c0_54 = arith.constant 0 : index
    %112 = vector.load %arg9[%c0_53, %c0_54] : memref<32x38xbf16, #tpu.memory_space<vmem>>, vector<32x38xbf16>
    tpu.vector_store %arg9[%c0_53, %c0_54], %111 {strides = array<i32>} : memref<32x38xbf16, #tpu.memory_space<vmem>>, vector<32x38xbf16>,
    %c0_55 = arith.constant 0 : index
    %c0_56 = arith.constant 0 : index
    %113 = vector.load %arg9[%c0_55, %c0_56] : memref<32x38xbf16, #tpu.memory_space<vmem>>, vector<32x24xbf16>
    %c0_57 = arith.constant 0 : index
    %c0_58 = arith.constant 0 : index
    %c0_59 = arith.constant 0 : index
    %114 = vector.load %arg7[%c0_57, %c0_58, %c0_59] : memref<9x32x32xbf16, #tpu.memory_space<vmem>>, vector<1x32x32xbf16>
    %115 = vector.shape_cast %114 : vector<1x32x32xbf16> to vector<32x32xbf16>
    %cst_60 = arith.constant dense<0.000000e+00> : vector<32x24xf32>
    %116 = tpu.matmul %115, %113, %cst_60 {dimension_numbers = #tpu.dot_dimension_numbers<[1], [0], [0], [1], [0, 0, 1, 1], [], []>} : vector<32x32xbf16>, vector<32x24xbf16>, vector<32x24xf32> -> vector<32x24xf32>
    %c0_61 = arith.constant 0 : index
    %c1_62 = arith.constant 1 : index
    %117 = vector.load %arg9[%c0_61, %c1_62] : memref<32x38xbf16, #tpu.memory_space<vmem>>, vector<32x24xbf16>
    %c1_63 = arith.constant 1 : index
    %c0_64 = arith.constant 0 : index
    %c0_65 = arith.constant 0 : index
    %118 = vector.load %arg7[%c1_63, %c0_64, %c0_65] : memref<9x32x32xbf16, #tpu.memory_space<vmem>>, vector<1x32x32xbf16>
    %119 = vector.shape_cast %118 : vector<1x32x32xbf16> to vector<32x32xbf16>
    %cst_66 = arith.constant dense<0.000000e+00> : vector<32x24xf32>
    %120 = tpu.matmul %119, %117, %cst_66 {dimension_numbers = #tpu.dot_dimension_numbers<[1], [0], [0], [1], [0, 0, 1, 1], [], []>} : vector<32x32xbf16>, vector<32x24xbf16>, vector<32x24xf32> -> vector<32x24xf32>
    %121 = arith.addf %116, %120 : vector<32x24xf32>
    %c0_67 = arith.constant 0 : index
    %c2_68 = arith.constant 2 : index
    %122 = vector.load %arg9[%c0_67, %c2_68] : memref<32x38xbf16, #tpu.memory_space<vmem>>, vector<32x24xbf16>
    %c2_69 = arith.constant 2 : index
    %c0_70 = arith.constant 0 : index
    %c0_71 = arith.constant 0 : index
    %123 = vector.load %arg7[%c2_69, %c0_70, %c0_71] : memref<9x32x32xbf16, #tpu.memory_space<vmem>>, vector<1x32x32xbf16>
    %124 = vector.shape_cast %123 : vector<1x32x32xbf16> to vector<32x32xbf16>
    %cst_72 = arith.constant dense<0.000000e+00> : vector<32x24xf32>
    %125 = tpu.matmul %124, %122, %cst_72 {dimension_numbers = #tpu.dot_dimension_numbers<[1], [0], [0], [1], [0, 0, 1, 1], [], []>} : vector<32x32xbf16>, vector<32x24xbf16>, vector<32x24xf32> -> vector<32x24xf32>
    %126 = arith.addf %121, %125 : vector<32x24xf32>
    %c0_73 = arith.constant 0 : index
    %c6_74 = arith.constant 6 : index
    %127 = vector.load %arg9[%c0_73, %c6_74] : memref<32x38xbf16, #tpu.memory_space<vmem>>, vector<32x24xbf16>
    %c3_75 = arith.constant 3 : index
    %c0_76 = arith.constant 0 : index
    %c0_77 = arith.constant 0 : index
    %128 = vector.load %arg7[%c3_75, %c0_76, %c0_77] : memref<9x32x32xbf16, #tpu.memory_space<vmem>>, vector<1x32x32xbf16>
    %129 = vector.shape_cast %128 : vector<1x32x32xbf16> to vector<32x32xbf16>
    %cst_78 = arith.constant dense<0.000000e+00> : vector<32x24xf32>
    %130 = tpu.matmul %129, %127, %cst_78 {dimension_numbers = #tpu.dot_dimension_numbers<[1], [0], [0], [1], [0, 0, 1, 1], [], []>} : vector<32x32xbf16>, vector<32x24xbf16>, vector<32x24xf32> -> vector<32x24xf32>
    %131 = arith.addf %126, %130 : vector<32x24xf32>
    %c0_79 = arith.constant 0 : index
    %c7_80 = arith.constant 7 : index
    %132 = vector.load %arg9[%c0_79, %c7_80] : memref<32x38xbf16, #tpu.memory_space<vmem>>, vector<32x24xbf16>
    %c4_81 = arith.constant 4 : index
    %c0_82 = arith.constant 0 : index
    %c0_83 = arith.constant 0 : index
    %133 = vector.load %arg7[%c4_81, %c0_82, %c0_83] : memref<9x32x32xbf16, #tpu.memory_space<vmem>>, vector<1x32x32xbf16>
    %134 = vector.shape_cast %133 : vector<1x32x32xbf16> to vector<32x32xbf16>
    %cst_84 = arith.constant dense<0.000000e+00> : vector<32x24xf32>
    %135 = tpu.matmul %134, %132, %cst_84 {dimension_numbers = #tpu.dot_dimension_numbers<[1], [0], [0], [1], [0, 0, 1, 1], [], []>} : vector<32x32xbf16>, vector<32x24xbf16>, vector<32x24xf32> -> vector<32x24xf32>
    %136 = arith.addf %131, %135 : vector<32x24xf32>
    %c0_85 = arith.constant 0 : index
    %c8_86 = arith.constant 8 : index
    %137 = vector.load %arg9[%c0_85, %c8_86] : memref<32x38xbf16, #tpu.memory_space<vmem>>, vector<32x24xbf16>
    %c5_87 = arith.constant 5 : index
    %c0_88 = arith.constant 0 : index
    %c0_89 = arith.constant 0 : index
    %138 = vector.load %arg7[%c5_87, %c0_88, %c0_89] : memref<9x32x32xbf16, #tpu.memory_space<vmem>>, vector<1x32x32xbf16>
    %139 = vector.shape_cast %138 : vector<1x32x32xbf16> to vector<32x32xbf16>
    %cst_90 = arith.constant dense<0.000000e+00> : vector<32x24xf32>
    %140 = tpu.matmul %139, %137, %cst_90 {dimension_numbers = #tpu.dot_dimension_numbers<[1], [0], [0], [1], [0, 0, 1, 1], [], []>} : vector<32x32xbf16>, vector<32x24xbf16>, vector<32x24xf32> -> vector<32x24xf32>
    %141 = arith.addf %136, %140 : vector<32x24xf32>
    %c0_91 = arith.constant 0 : index
    %c12_92 = arith.constant 12 : index
    %142 = vector.load %arg9[%c0_91, %c12_92] : memref<32x38xbf16, #tpu.memory_space<vmem>>, vector<32x24xbf16>
    %c6_93 = arith.constant 6 : index
    %c0_94 = arith.constant 0 : index
    %c0_95 = arith.constant 0 : index
    %143 = vector.load %arg7[%c6_93, %c0_94, %c0_95] : memref<9x32x32xbf16, #tpu.memory_space<vmem>>, vector<1x32x32xbf16>
    %144 = vector.shape_cast %143 : vector<1x32x32xbf16> to vector<32x32xbf16>
    %cst_96 = arith.constant dense<0.000000e+00> : vector<32x24xf32>
    %145 = tpu.matmul %144, %142, %cst_96 {dimension_numbers = #tpu.dot_dimension_numbers<[1], [0], [0], [1], [0, 0, 1, 1], [], []>} : vector<32x32xbf16>, vector<32x24xbf16>, vector<32x24xf32> -> vector<32x24xf32>
    %146 = arith.addf %141, %145 : vector<32x24xf32>
    %c0_97 = arith.constant 0 : index
    %c13_98 = arith.constant 13 : index
    %147 = vector.load %arg9[%c0_97, %c13_98] : memref<32x38xbf16, #tpu.memory_space<vmem>>, vector<32x24xbf16>
    %c7_99 = arith.constant 7 : index
    %c0_100 = arith.constant 0 : index
    %c0_101 = arith.constant 0 : index
    %148 = vector.load %arg7[%c7_99, %c0_100, %c0_101] : memref<9x32x32xbf16, #tpu.memory_space<vmem>>, vector<1x32x32xbf16>
    %149 = vector.shape_cast %148 : vector<1x32x32xbf16> to vector<32x32xbf16>
    %cst_102 = arith.constant dense<0.000000e+00> : vector<32x24xf32>
    %150 = tpu.matmul %149, %147, %cst_102 {dimension_numbers = #tpu.dot_dimension_numbers<[1], [0], [0], [1], [0, 0, 1, 1], [], []>} : vector<32x32xbf16>, vector<32x24xbf16>, vector<32x24xf32> -> vector<32x24xf32>
    %151 = arith.addf %146, %150 : vector<32x24xf32>
    %c0_103 = arith.constant 0 : index
    %c14_104 = arith.constant 14 : index
    %152 = vector.load %arg9[%c0_103, %c14_104] : memref<32x38xbf16, #tpu.memory_space<vmem>>, vector<32x24xbf16>
    %c8_105 = arith.constant 8 : index
    %c0_106 = arith.constant 0 : index
    %c0_107 = arith.constant 0 : index
    %153 = vector.load %arg7[%c8_105, %c0_106, %c0_107] : memref<9x32x32xbf16, #tpu.memory_space<vmem>>, vector<1x32x32xbf16>
    %154 = vector.shape_cast %153 : vector<1x32x32xbf16> to vector<32x32xbf16>
    %cst_108 = arith.constant dense<0.000000e+00> : vector<32x24xf32>
    %155 = tpu.matmul %154, %152, %cst_108 {dimension_numbers = #tpu.dot_dimension_numbers<[1], [0], [0], [1], [0, 0, 1, 1], [], []>} : vector<32x32xbf16>, vector<32x24xbf16>, vector<32x24xf32> -> vector<32x24xf32>
    %156 = arith.addf %151, %155 : vector<32x24xf32>
    %157 = arith.addf %156, %105 : vector<32x24xf32>
    %158 = arith.truncf %157 : vector<32x24xf32> to vector<32x24xbf16>
    %c0_109 = arith.constant 0 : index
    %c0_110 = arith.constant 0 : index
    %c0_111 = arith.constant 0 : index
    %159 = vector.load %arg8[%c0_109, %c0_110, %c0_111] : memref<1x32x24xbf16, #tpu.memory_space<vmem>>, vector<1x32x24xbf16>
    %160 = vector.shape_cast %159 : vector<1x32x24xbf16> to vector<32x24xbf16>
    %161 = vector.shape_cast %158 : vector<32x24xbf16> to vector<1x32x24xbf16>
    tpu.vector_store %arg8[%c0_109, %c0_110, %c0_111], %161 {strides = array<i32>} : memref<1x32x24xbf16, #tpu.memory_space<vmem>>, vector<1x32x24xbf16>,
    return
  }
  func.func @transform_0(%arg0: i32) -> (i32, i32, i32) {
    %c0_i32 = arith.constant 0 : i32
    %c0_i32_0 = arith.constant 0 : i32
    %c0_i32_1 = arith.constant 0 : i32
    return %arg0, %c0_i32, %c0_i32_0 : i32, i32, i32
  }
  func.func @transform_1(%arg0: i32) -> (i32, i32) {
    %c0_i32 = arith.constant 0 : i32
    %c0_i32_0 = arith.constant 0 : i32
    %c0_i32_1 = arith.constant 0 : i32
    return %c0_i32, %c0_i32_0 : i32, i32
  }
  func.func @transform_2(%arg0: i32) -> (i32, i32, i32) {
    %c0_i32 = arith.constant 0 : i32
    %c0_i32_0 = arith.constant 0 : i32
    %c0_i32_1 = arith.constant 0 : i32
    %c0_i32_2 = arith.constant 0 : i32
    return %c0_i32, %c0_i32_0, %c0_i32_1 : i32, i32, i32
  }
  func.func @transform_3(%arg0: i32) -> (i32, i32) {
    %c0_i32 = arith.constant 0 : i32
    %c0_i32_0 = arith.constant 0 : i32
    %c0_i32_1 = arith.constant 0 : i32
    return %c0_i32, %c0_i32_0 : i32, i32
  }
  func.func @transform_4(%arg0: i32) -> (i32, i32) {
    %c0_i32 = arith.constant 0 : i32
    %c0_i32_0 = arith.constant 0 : i32
    %c0_i32_1 = arith.constant 0 : i32
    return %c0_i32, %c0_i32_0 : i32, i32
  }
  func.func @transform_5(%arg0: i32) -> (i32, i32) {
    %c0_i32 = arith.constant 0 : i32
    %c0_i32_0 = arith.constant 0 : i32
    %c0_i32_1 = arith.constant 0 : i32
    return %c0_i32, %c0_i32_0 : i32, i32
  }
  func.func @transform_6(%arg0: i32) -> (i32, i32, i32) {
    %c0_i32 = arith.constant 0 : i32
    %c0_i32_0 = arith.constant 0 : i32
    %c0_i32_1 = arith.constant 0 : i32
    %c0_i32_2 = arith.constant 0 : i32
    return %c0_i32, %c0_i32_0, %c0_i32_1 : i32, i32, i32
  }
  func.func @transform_7(%arg0: i32) -> (i32, i32, i32) {
    %c0_i32 = arith.constant 0 : i32
    %c0_i32_0 = arith.constant 0 : i32
    %c0_i32_1 = arith.constant 0 : i32
    return %arg0, %c0_i32, %c0_i32_0 : i32, i32, i32
  }
}

module attributes {stable_mosaic.version = 11 : i64} {
  func.func @_conv_group_kernel(%arg0: i32, %arg1: memref<1x32x102xbf16, #tpu.memory_space<vmem>>, %arg2: memref<1x80xf32, #tpu.memory_space<vmem>>, %arg3: memref<9x32x32xbf16, #tpu.memory_space<vmem>>, %arg4: memref<32x1xf32, #tpu.memory_space<vmem>>, %arg5: memref<9x32x32xbf16, #tpu.memory_space<vmem>>, %arg6: memref<9x32x32xbf16, #tpu.memory_space<vmem>>, %arg7: memref<1x32x80xbf16, #tpu.memory_space<vmem>>, %arg8: memref<32x102xbf16, #tpu.memory_space<vmem>>) attributes {dimension_semantics = [#tpu.dimension_semantics<parallel>], iteration_bounds = array<i64: 2>, scalar_prefetch = 0 : i64, scratch_operands = 1 : i64, tpu.core_type = #tpu.core_type<tc>, window_params = [{transform_indices = @transform_0, window_bounds = array<i64: 1, 32, 102>}, {pipeline_mode = #tpu.pipeline_mode<synchronous>, transform_indices = @transform_1, window_bounds = array<i64: 1, 80>}, {pipeline_mode = #tpu.pipeline_mode<synchronous>, transform_indices = @transform_2, window_bounds = array<i64: 9, 32, 32>}, {pipeline_mode = #tpu.pipeline_mode<synchronous>, transform_indices = @transform_3, window_bounds = array<i64: 32, 1>}, {pipeline_mode = #tpu.pipeline_mode<synchronous>, transform_indices = @transform_4, window_bounds = array<i64: 9, 32, 32>}, {pipeline_mode = #tpu.pipeline_mode<synchronous>, transform_indices = @transform_5, window_bounds = array<i64: 9, 32, 32>}, {transform_indices = @transform_6, window_bounds = array<i64: 1, 32, 80>}]} {
    %c0 = arith.constant 0 : index
    %c0_0 = arith.constant 0 : index
    %c0_1 = arith.constant 0 : index
    %0 = vector.load %arg1[%c0, %c0_0, %c0_1] : memref<1x32x102xbf16, #tpu.memory_space<vmem>>, vector<1x32x80xbf16>
    %1 = vector.shape_cast %0 : vector<1x32x80xbf16> to vector<32x80xbf16>
    %c0_2 = arith.constant 0 : index
    %c0_3 = arith.constant 0 : index
    %c0_4 = arith.constant 0 : index
    %2 = vector.load %arg3[%c0_2, %c0_3, %c0_4] : memref<9x32x32xbf16, #tpu.memory_space<vmem>>, vector<1x32x32xbf16>
    %3 = vector.shape_cast %2 : vector<1x32x32xbf16> to vector<32x32xbf16>
    %cst = arith.constant dense<0.000000e+00> : vector<32x80xf32>
    %4 = tpu.matmul %3, %1, %cst {dimension_numbers = #tpu.dot_dimension_numbers<[1], [0], [0], [1], [0, 0, 1, 1], [], []>} : vector<32x32xbf16>, vector<32x80xbf16>, vector<32x80xf32> -> vector<32x80xf32>
    %c0_5 = arith.constant 0 : index
    %c0_6 = arith.constant 0 : index
    %c1 = arith.constant 1 : index
    %5 = vector.load %arg1[%c0_5, %c0_6, %c1] : memref<1x32x102xbf16, #tpu.memory_space<vmem>>, vector<1x32x80xbf16>
    %6 = vector.shape_cast %5 : vector<1x32x80xbf16> to vector<32x80xbf16>
    %c1_7 = arith.constant 1 : index
    %c0_8 = arith.constant 0 : index
    %c0_9 = arith.constant 0 : index
    %7 = vector.load %arg3[%c1_7, %c0_8, %c0_9] : memref<9x32x32xbf16, #tpu.memory_space<vmem>>, vector<1x32x32xbf16>
    %8 = vector.shape_cast %7 : vector<1x32x32xbf16> to vector<32x32xbf16>
    %cst_10 = arith.constant dense<0.000000e+00> : vector<32x80xf32>
    %9 = tpu.matmul %8, %6, %cst_10 {dimension_numbers = #tpu.dot_dimension_numbers<[1], [0], [0], [1], [0, 0, 1, 1], [], []>} : vector<32x32xbf16>, vector<32x80xbf16>, vector<32x80xf32> -> vector<32x80xf32>
    %10 = arith.addf %4, %9 : vector<32x80xf32>
    %c0_11 = arith.constant 0 : index
    %c0_12 = arith.constant 0 : index
    %c2 = arith.constant 2 : index
    %11 = vector.load %arg1[%c0_11, %c0_12, %c2] : memref<1x32x102xbf16, #tpu.memory_space<vmem>>, vector<1x32x80xbf16>
    %12 = vector.shape_cast %11 : vector<1x32x80xbf16> to vector<32x80xbf16>
    %c2_13 = arith.constant 2 : index
    %c0_14 = arith.constant 0 : index
    %c0_15 = arith.constant 0 : index
    %13 = vector.load %arg3[%c2_13, %c0_14, %c0_15] : memref<9x32x32xbf16, #tpu.memory_space<vmem>>, vector<1x32x32xbf16>
    %14 = vector.shape_cast %13 : vector<1x32x32xbf16> to vector<32x32xbf16>
    %cst_16 = arith.constant dense<0.000000e+00> : vector<32x80xf32>
    %15 = tpu.matmul %14, %12, %cst_16 {dimension_numbers = #tpu.dot_dimension_numbers<[1], [0], [0], [1], [0, 0, 1, 1], [], []>} : vector<32x32xbf16>, vector<32x80xbf16>, vector<32x80xf32> -> vector<32x80xf32>
    %16 = arith.addf %10, %15 : vector<32x80xf32>
    %c0_17 = arith.constant 0 : index
    %c0_18 = arith.constant 0 : index
    %c10 = arith.constant 10 : index
    %17 = vector.load %arg1[%c0_17, %c0_18, %c10] : memref<1x32x102xbf16, #tpu.memory_space<vmem>>, vector<1x32x80xbf16>
    %18 = vector.shape_cast %17 : vector<1x32x80xbf16> to vector<32x80xbf16>
    %c3 = arith.constant 3 : index
    %c0_19 = arith.constant 0 : index
    %c0_20 = arith.constant 0 : index
    %19 = vector.load %arg3[%c3, %c0_19, %c0_20] : memref<9x32x32xbf16, #tpu.memory_space<vmem>>, vector<1x32x32xbf16>
    %20 = vector.shape_cast %19 : vector<1x32x32xbf16> to vector<32x32xbf16>
    %cst_21 = arith.constant dense<0.000000e+00> : vector<32x80xf32>
    %21 = tpu.matmul %20, %18, %cst_21 {dimension_numbers = #tpu.dot_dimension_numbers<[1], [0], [0], [1], [0, 0, 1, 1], [], []>} : vector<32x32xbf16>, vector<32x80xbf16>, vector<32x80xf32> -> vector<32x80xf32>
    %22 = arith.addf %16, %21 : vector<32x80xf32>
    %c0_22 = arith.constant 0 : index
    %c0_23 = arith.constant 0 : index
    %c11 = arith.constant 11 : index
    %23 = vector.load %arg1[%c0_22, %c0_23, %c11] : memref<1x32x102xbf16, #tpu.memory_space<vmem>>, vector<1x32x80xbf16>
    %24 = vector.shape_cast %23 : vector<1x32x80xbf16> to vector<32x80xbf16>
    %c4 = arith.constant 4 : index
    %c0_24 = arith.constant 0 : index
    %c0_25 = arith.constant 0 : index
    %25 = vector.load %arg3[%c4, %c0_24, %c0_25] : memref<9x32x32xbf16, #tpu.memory_space<vmem>>, vector<1x32x32xbf16>
    %26 = vector.shape_cast %25 : vector<1x32x32xbf16> to vector<32x32xbf16>
    %cst_26 = arith.constant dense<0.000000e+00> : vector<32x80xf32>
    %27 = tpu.matmul %26, %24, %cst_26 {dimension_numbers = #tpu.dot_dimension_numbers<[1], [0], [0], [1], [0, 0, 1, 1], [], []>} : vector<32x32xbf16>, vector<32x80xbf16>, vector<32x80xf32> -> vector<32x80xf32>
    %28 = arith.addf %22, %27 : vector<32x80xf32>
    %c0_27 = arith.constant 0 : index
    %c0_28 = arith.constant 0 : index
    %c12 = arith.constant 12 : index
    %29 = vector.load %arg1[%c0_27, %c0_28, %c12] : memref<1x32x102xbf16, #tpu.memory_space<vmem>>, vector<1x32x80xbf16>
    %30 = vector.shape_cast %29 : vector<1x32x80xbf16> to vector<32x80xbf16>
    %c5 = arith.constant 5 : index
    %c0_29 = arith.constant 0 : index
    %c0_30 = arith.constant 0 : index
    %31 = vector.load %arg3[%c5, %c0_29, %c0_30] : memref<9x32x32xbf16, #tpu.memory_space<vmem>>, vector<1x32x32xbf16>
    %32 = vector.shape_cast %31 : vector<1x32x32xbf16> to vector<32x32xbf16>
    %cst_31 = arith.constant dense<0.000000e+00> : vector<32x80xf32>
    %33 = tpu.matmul %32, %30, %cst_31 {dimension_numbers = #tpu.dot_dimension_numbers<[1], [0], [0], [1], [0, 0, 1, 1], [], []>} : vector<32x32xbf16>, vector<32x80xbf16>, vector<32x80xf32> -> vector<32x80xf32>
    %34 = arith.addf %28, %33 : vector<32x80xf32>
    %c0_32 = arith.constant 0 : index
    %c0_33 = arith.constant 0 : index
    %c20 = arith.constant 20 : index
    %35 = vector.load %arg1[%c0_32, %c0_33, %c20] : memref<1x32x102xbf16, #tpu.memory_space<vmem>>, vector<1x32x80xbf16>
    %36 = vector.shape_cast %35 : vector<1x32x80xbf16> to vector<32x80xbf16>
    %c6 = arith.constant 6 : index
    %c0_34 = arith.constant 0 : index
    %c0_35 = arith.constant 0 : index
    %37 = vector.load %arg3[%c6, %c0_34, %c0_35] : memref<9x32x32xbf16, #tpu.memory_space<vmem>>, vector<1x32x32xbf16>
    %38 = vector.shape_cast %37 : vector<1x32x32xbf16> to vector<32x32xbf16>
    %cst_36 = arith.constant dense<0.000000e+00> : vector<32x80xf32>
    %39 = tpu.matmul %38, %36, %cst_36 {dimension_numbers = #tpu.dot_dimension_numbers<[1], [0], [0], [1], [0, 0, 1, 1], [], []>} : vector<32x32xbf16>, vector<32x80xbf16>, vector<32x80xf32> -> vector<32x80xf32>
    %40 = arith.addf %34, %39 : vector<32x80xf32>
    %c0_37 = arith.constant 0 : index
    %c0_38 = arith.constant 0 : index
    %c21 = arith.constant 21 : index
    %41 = vector.load %arg1[%c0_37, %c0_38, %c21] : memref<1x32x102xbf16, #tpu.memory_space<vmem>>, vector<1x32x80xbf16>
    %42 = vector.shape_cast %41 : vector<1x32x80xbf16> to vector<32x80xbf16>
    %c7 = arith.constant 7 : index
    %c0_39 = arith.constant 0 : index
    %c0_40 = arith.constant 0 : index
    %43 = vector.load %arg3[%c7, %c0_39, %c0_40] : memref<9x32x32xbf16, #tpu.memory_space<vmem>>, vector<1x32x32xbf16>
    %44 = vector.shape_cast %43 : vector<1x32x32xbf16> to vector<32x32xbf16>
    %cst_41 = arith.constant dense<0.000000e+00> : vector<32x80xf32>
    %45 = tpu.matmul %44, %42, %cst_41 {dimension_numbers = #tpu.dot_dimension_numbers<[1], [0], [0], [1], [0, 0, 1, 1], [], []>} : vector<32x32xbf16>, vector<32x80xbf16>, vector<32x80xf32> -> vector<32x80xf32>
    %46 = arith.addf %40, %45 : vector<32x80xf32>
    %c0_42 = arith.constant 0 : index
    %c0_43 = arith.constant 0 : index
    %c22 = arith.constant 22 : index
    %47 = vector.load %arg1[%c0_42, %c0_43, %c22] : memref<1x32x102xbf16, #tpu.memory_space<vmem>>, vector<1x32x80xbf16>
    %48 = vector.shape_cast %47 : vector<1x32x80xbf16> to vector<32x80xbf16>
    %c8 = arith.constant 8 : index
    %c0_44 = arith.constant 0 : index
    %c0_45 = arith.constant 0 : index
    %49 = vector.load %arg3[%c8, %c0_44, %c0_45] : memref<9x32x32xbf16, #tpu.memory_space<vmem>>, vector<1x32x32xbf16>
    %50 = vector.shape_cast %49 : vector<1x32x32xbf16> to vector<32x32xbf16>
    %cst_46 = arith.constant dense<0.000000e+00> : vector<32x80xf32>
    %51 = tpu.matmul %50, %48, %cst_46 {dimension_numbers = #tpu.dot_dimension_numbers<[1], [0], [0], [1], [0, 0, 1, 1], [], []>} : vector<32x32xbf16>, vector<32x80xbf16>, vector<32x80xf32> -> vector<32x80xf32>
    %52 = arith.addf %46, %51 : vector<32x80xf32>
    %c0_47 = arith.constant 0 : index
    %c0_48 = arith.constant 0 : index
    %53 = vector.load %arg4[%c0_47, %c0_48] : memref<32x1xf32, #tpu.memory_space<vmem>>, vector<32x1xf32>
    %54 = vector.broadcast %53 : vector<32x1xf32> to vector<32x80xf32>
    %55 = arith.addf %52, %54 : vector<32x80xf32>
    %cst_49 = arith.constant 0.000000e+00 : f32
    %56 = vector.broadcast %cst_49 : f32 to vector<32x80xf32>
    %57 = arith.cmpf ogt, %55, %56 : vector<32x80xf32>
    %cst_50 = arith.constant 0.000000e+00 : f32
    %58 = vector.broadcast %cst_50 : f32 to vector<32x80xf32>
    %59 = arith.minimumf %55, %58 : vector<32x80xf32>
    %60 = math.exp %59 : vector<32x80xf32>
    %cst_51 = arith.constant 1.000000e+00 : f32
    %61 = vector.broadcast %cst_51 : f32 to vector<32x80xf32>
    %62 = arith.subf %60, %61 : vector<32x80xf32>
    %63 = arith.select %57, %55, %62 : vector<32x80xi1>, vector<32x80xf32>
    %c0_52 = arith.constant 0 : index
    %c0_53 = arith.constant 0 : index
    %64 = vector.load %arg2[%c0_52, %c0_53] : memref<1x80xf32, #tpu.memory_space<vmem>>, vector<1x80xf32>
    %65 = vector.broadcast %64 : vector<1x80xf32> to vector<32x80xf32>
    %66 = arith.mulf %63, %65 : vector<32x80xf32>
    %67 = arith.truncf %66 : vector<32x80xf32> to vector<32x80xbf16>
    %cst_54 = arith.constant 0.000000e+00 : bf16
    %68 = vector.broadcast %cst_54 : bf16 to vector<32x11xbf16>
    %69 = tpu.concatenate %68, %67, %68 in 1 : vector<32x11xbf16>, vector<32x80xbf16>, vector<32x11xbf16> -> vector<32x102xbf16>
    %c0_55 = arith.constant 0 : index
    %c0_56 = arith.constant 0 : index
    %70 = vector.load %arg8[%c0_55, %c0_56] : memref<32x102xbf16, #tpu.memory_space<vmem>>, vector<32x102xbf16>
    tpu.vector_store %arg8[%c0_55, %c0_56], %69 {strides = array<i32>} : memref<32x102xbf16, #tpu.memory_space<vmem>>, vector<32x102xbf16>,
    %c0_57 = arith.constant 0 : index
    %c0_58 = arith.constant 0 : index
    %71 = vector.load %arg8[%c0_57, %c0_58] : memref<32x102xbf16, #tpu.memory_space<vmem>>, vector<32x80xbf16>
    %c0_59 = arith.constant 0 : index
    %c0_60 = arith.constant 0 : index
    %c0_61 = arith.constant 0 : index
    %72 = vector.load %arg5[%c0_59, %c0_60, %c0_61] : memref<9x32x32xbf16, #tpu.memory_space<vmem>>, vector<1x32x32xbf16>
    %73 = vector.shape_cast %72 : vector<1x32x32xbf16> to vector<32x32xbf16>
    %cst_62 = arith.constant dense<0.000000e+00> : vector<32x80xf32>
    %74 = tpu.matmul %73, %71, %cst_62 {dimension_numbers = #tpu.dot_dimension_numbers<[1], [0], [0], [1], [0, 0, 1, 1], [], []>} : vector<32x32xbf16>, vector<32x80xbf16>, vector<32x80xf32> -> vector<32x80xf32>
    %c0_63 = arith.constant 0 : index
    %c1_64 = arith.constant 1 : index
    %75 = vector.load %arg8[%c0_63, %c1_64] : memref<32x102xbf16, #tpu.memory_space<vmem>>, vector<32x80xbf16>
    %c1_65 = arith.constant 1 : index
    %c0_66 = arith.constant 0 : index
    %c0_67 = arith.constant 0 : index
    %76 = vector.load %arg5[%c1_65, %c0_66, %c0_67] : memref<9x32x32xbf16, #tpu.memory_space<vmem>>, vector<1x32x32xbf16>
    %77 = vector.shape_cast %76 : vector<1x32x32xbf16> to vector<32x32xbf16>
    %cst_68 = arith.constant dense<0.000000e+00> : vector<32x80xf32>
    %78 = tpu.matmul %77, %75, %cst_68 {dimension_numbers = #tpu.dot_dimension_numbers<[1], [0], [0], [1], [0, 0, 1, 1], [], []>} : vector<32x32xbf16>, vector<32x80xbf16>, vector<32x80xf32> -> vector<32x80xf32>
    %79 = arith.addf %74, %78 : vector<32x80xf32>
    %c0_69 = arith.constant 0 : index
    %c2_70 = arith.constant 2 : index
    %80 = vector.load %arg8[%c0_69, %c2_70] : memref<32x102xbf16, #tpu.memory_space<vmem>>, vector<32x80xbf16>
    %c2_71 = arith.constant 2 : index
    %c0_72 = arith.constant 0 : index
    %c0_73 = arith.constant 0 : index
    %81 = vector.load %arg5[%c2_71, %c0_72, %c0_73] : memref<9x32x32xbf16, #tpu.memory_space<vmem>>, vector<1x32x32xbf16>
    %82 = vector.shape_cast %81 : vector<1x32x32xbf16> to vector<32x32xbf16>
    %cst_74 = arith.constant dense<0.000000e+00> : vector<32x80xf32>
    %83 = tpu.matmul %82, %80, %cst_74 {dimension_numbers = #tpu.dot_dimension_numbers<[1], [0], [0], [1], [0, 0, 1, 1], [], []>} : vector<32x32xbf16>, vector<32x80xbf16>, vector<32x80xf32> -> vector<32x80xf32>
    %84 = arith.addf %79, %83 : vector<32x80xf32>
    %c0_75 = arith.constant 0 : index
    %c10_76 = arith.constant 10 : index
    %85 = vector.load %arg8[%c0_75, %c10_76] : memref<32x102xbf16, #tpu.memory_space<vmem>>, vector<32x80xbf16>
    %c3_77 = arith.constant 3 : index
    %c0_78 = arith.constant 0 : index
    %c0_79 = arith.constant 0 : index
    %86 = vector.load %arg5[%c3_77, %c0_78, %c0_79] : memref<9x32x32xbf16, #tpu.memory_space<vmem>>, vector<1x32x32xbf16>
    %87 = vector.shape_cast %86 : vector<1x32x32xbf16> to vector<32x32xbf16>
    %cst_80 = arith.constant dense<0.000000e+00> : vector<32x80xf32>
    %88 = tpu.matmul %87, %85, %cst_80 {dimension_numbers = #tpu.dot_dimension_numbers<[1], [0], [0], [1], [0, 0, 1, 1], [], []>} : vector<32x32xbf16>, vector<32x80xbf16>, vector<32x80xf32> -> vector<32x80xf32>
    %89 = arith.addf %84, %88 : vector<32x80xf32>
    %c0_81 = arith.constant 0 : index
    %c11_82 = arith.constant 11 : index
    %90 = vector.load %arg8[%c0_81, %c11_82] : memref<32x102xbf16, #tpu.memory_space<vmem>>, vector<32x80xbf16>
    %c4_83 = arith.constant 4 : index
    %c0_84 = arith.constant 0 : index
    %c0_85 = arith.constant 0 : index
    %91 = vector.load %arg5[%c4_83, %c0_84, %c0_85] : memref<9x32x32xbf16, #tpu.memory_space<vmem>>, vector<1x32x32xbf16>
    %92 = vector.shape_cast %91 : vector<1x32x32xbf16> to vector<32x32xbf16>
    %cst_86 = arith.constant dense<0.000000e+00> : vector<32x80xf32>
    %93 = tpu.matmul %92, %90, %cst_86 {dimension_numbers = #tpu.dot_dimension_numbers<[1], [0], [0], [1], [0, 0, 1, 1], [], []>} : vector<32x32xbf16>, vector<32x80xbf16>, vector<32x80xf32> -> vector<32x80xf32>
    %94 = arith.addf %89, %93 : vector<32x80xf32>
    %c0_87 = arith.constant 0 : index
    %c12_88 = arith.constant 12 : index
    %95 = vector.load %arg8[%c0_87, %c12_88] : memref<32x102xbf16, #tpu.memory_space<vmem>>, vector<32x80xbf16>
    %c5_89 = arith.constant 5 : index
    %c0_90 = arith.constant 0 : index
    %c0_91 = arith.constant 0 : index
    %96 = vector.load %arg5[%c5_89, %c0_90, %c0_91] : memref<9x32x32xbf16, #tpu.memory_space<vmem>>, vector<1x32x32xbf16>
    %97 = vector.shape_cast %96 : vector<1x32x32xbf16> to vector<32x32xbf16>
    %cst_92 = arith.constant dense<0.000000e+00> : vector<32x80xf32>
    %98 = tpu.matmul %97, %95, %cst_92 {dimension_numbers = #tpu.dot_dimension_numbers<[1], [0], [0], [1], [0, 0, 1, 1], [], []>} : vector<32x32xbf16>, vector<32x80xbf16>, vector<32x80xf32> -> vector<32x80xf32>
    %99 = arith.addf %94, %98 : vector<32x80xf32>
    %c0_93 = arith.constant 0 : index
    %c20_94 = arith.constant 20 : index
    %100 = vector.load %arg8[%c0_93, %c20_94] : memref<32x102xbf16, #tpu.memory_space<vmem>>, vector<32x80xbf16>
    %c6_95 = arith.constant 6 : index
    %c0_96 = arith.constant 0 : index
    %c0_97 = arith.constant 0 : index
    %101 = vector.load %arg5[%c6_95, %c0_96, %c0_97] : memref<9x32x32xbf16, #tpu.memory_space<vmem>>, vector<1x32x32xbf16>
    %102 = vector.shape_cast %101 : vector<1x32x32xbf16> to vector<32x32xbf16>
    %cst_98 = arith.constant dense<0.000000e+00> : vector<32x80xf32>
    %103 = tpu.matmul %102, %100, %cst_98 {dimension_numbers = #tpu.dot_dimension_numbers<[1], [0], [0], [1], [0, 0, 1, 1], [], []>} : vector<32x32xbf16>, vector<32x80xbf16>, vector<32x80xf32> -> vector<32x80xf32>
    %104 = arith.addf %99, %103 : vector<32x80xf32>
    %c0_99 = arith.constant 0 : index
    %c21_100 = arith.constant 21 : index
    %105 = vector.load %arg8[%c0_99, %c21_100] : memref<32x102xbf16, #tpu.memory_space<vmem>>, vector<32x80xbf16>
    %c7_101 = arith.constant 7 : index
    %c0_102 = arith.constant 0 : index
    %c0_103 = arith.constant 0 : index
    %106 = vector.load %arg5[%c7_101, %c0_102, %c0_103] : memref<9x32x32xbf16, #tpu.memory_space<vmem>>, vector<1x32x32xbf16>
    %107 = vector.shape_cast %106 : vector<1x32x32xbf16> to vector<32x32xbf16>
    %cst_104 = arith.constant dense<0.000000e+00> : vector<32x80xf32>
    %108 = tpu.matmul %107, %105, %cst_104 {dimension_numbers = #tpu.dot_dimension_numbers<[1], [0], [0], [1], [0, 0, 1, 1], [], []>} : vector<32x32xbf16>, vector<32x80xbf16>, vector<32x80xf32> -> vector<32x80xf32>
    %109 = arith.addf %104, %108 : vector<32x80xf32>
    %c0_105 = arith.constant 0 : index
    %c22_106 = arith.constant 22 : index
    %110 = vector.load %arg8[%c0_105, %c22_106] : memref<32x102xbf16, #tpu.memory_space<vmem>>, vector<32x80xbf16>
    %c8_107 = arith.constant 8 : index
    %c0_108 = arith.constant 0 : index
    %c0_109 = arith.constant 0 : index
    %111 = vector.load %arg5[%c8_107, %c0_108, %c0_109] : memref<9x32x32xbf16, #tpu.memory_space<vmem>>, vector<1x32x32xbf16>
    %112 = vector.shape_cast %111 : vector<1x32x32xbf16> to vector<32x32xbf16>
    %cst_110 = arith.constant dense<0.000000e+00> : vector<32x80xf32>
    %113 = tpu.matmul %112, %110, %cst_110 {dimension_numbers = #tpu.dot_dimension_numbers<[1], [0], [0], [1], [0, 0, 1, 1], [], []>} : vector<32x32xbf16>, vector<32x80xbf16>, vector<32x80xf32> -> vector<32x80xf32>
    %114 = arith.addf %109, %113 : vector<32x80xf32>
    %115 = arith.addf %114, %63 : vector<32x80xf32>
    %c0_111 = arith.constant 0 : index
    %c0_112 = arith.constant 0 : index
    %116 = vector.load %arg2[%c0_111, %c0_112] : memref<1x80xf32, #tpu.memory_space<vmem>>, vector<1x80xf32>
    %117 = vector.broadcast %116 : vector<1x80xf32> to vector<32x80xf32>
    %118 = arith.mulf %115, %117 : vector<32x80xf32>
    %119 = arith.truncf %118 : vector<32x80xf32> to vector<32x80xbf16>
    %cst_113 = arith.constant 0.000000e+00 : bf16
    %120 = vector.broadcast %cst_113 : bf16 to vector<32x11xbf16>
    %121 = tpu.concatenate %120, %119, %120 in 1 : vector<32x11xbf16>, vector<32x80xbf16>, vector<32x11xbf16> -> vector<32x102xbf16>
    %c0_114 = arith.constant 0 : index
    %c0_115 = arith.constant 0 : index
    %122 = vector.load %arg8[%c0_114, %c0_115] : memref<32x102xbf16, #tpu.memory_space<vmem>>, vector<32x102xbf16>
    tpu.vector_store %arg8[%c0_114, %c0_115], %121 {strides = array<i32>} : memref<32x102xbf16, #tpu.memory_space<vmem>>, vector<32x102xbf16>,
    %c0_116 = arith.constant 0 : index
    %c0_117 = arith.constant 0 : index
    %123 = vector.load %arg8[%c0_116, %c0_117] : memref<32x102xbf16, #tpu.memory_space<vmem>>, vector<32x80xbf16>
    %c0_118 = arith.constant 0 : index
    %c0_119 = arith.constant 0 : index
    %c0_120 = arith.constant 0 : index
    %124 = vector.load %arg6[%c0_118, %c0_119, %c0_120] : memref<9x32x32xbf16, #tpu.memory_space<vmem>>, vector<1x32x32xbf16>
    %125 = vector.shape_cast %124 : vector<1x32x32xbf16> to vector<32x32xbf16>
    %cst_121 = arith.constant dense<0.000000e+00> : vector<32x80xf32>
    %126 = tpu.matmul %125, %123, %cst_121 {dimension_numbers = #tpu.dot_dimension_numbers<[1], [0], [0], [1], [0, 0, 1, 1], [], []>} : vector<32x32xbf16>, vector<32x80xbf16>, vector<32x80xf32> -> vector<32x80xf32>
    %c0_122 = arith.constant 0 : index
    %c1_123 = arith.constant 1 : index
    %127 = vector.load %arg8[%c0_122, %c1_123] : memref<32x102xbf16, #tpu.memory_space<vmem>>, vector<32x80xbf16>
    %c1_124 = arith.constant 1 : index
    %c0_125 = arith.constant 0 : index
    %c0_126 = arith.constant 0 : index
    %128 = vector.load %arg6[%c1_124, %c0_125, %c0_126] : memref<9x32x32xbf16, #tpu.memory_space<vmem>>, vector<1x32x32xbf16>
    %129 = vector.shape_cast %128 : vector<1x32x32xbf16> to vector<32x32xbf16>
    %cst_127 = arith.constant dense<0.000000e+00> : vector<32x80xf32>
    %130 = tpu.matmul %129, %127, %cst_127 {dimension_numbers = #tpu.dot_dimension_numbers<[1], [0], [0], [1], [0, 0, 1, 1], [], []>} : vector<32x32xbf16>, vector<32x80xbf16>, vector<32x80xf32> -> vector<32x80xf32>
    %131 = arith.addf %126, %130 : vector<32x80xf32>
    %c0_128 = arith.constant 0 : index
    %c2_129 = arith.constant 2 : index
    %132 = vector.load %arg8[%c0_128, %c2_129] : memref<32x102xbf16, #tpu.memory_space<vmem>>, vector<32x80xbf16>
    %c2_130 = arith.constant 2 : index
    %c0_131 = arith.constant 0 : index
    %c0_132 = arith.constant 0 : index
    %133 = vector.load %arg6[%c2_130, %c0_131, %c0_132] : memref<9x32x32xbf16, #tpu.memory_space<vmem>>, vector<1x32x32xbf16>
    %134 = vector.shape_cast %133 : vector<1x32x32xbf16> to vector<32x32xbf16>
    %cst_133 = arith.constant dense<0.000000e+00> : vector<32x80xf32>
    %135 = tpu.matmul %134, %132, %cst_133 {dimension_numbers = #tpu.dot_dimension_numbers<[1], [0], [0], [1], [0, 0, 1, 1], [], []>} : vector<32x32xbf16>, vector<32x80xbf16>, vector<32x80xf32> -> vector<32x80xf32>
    %136 = arith.addf %131, %135 : vector<32x80xf32>
    %c0_134 = arith.constant 0 : index
    %c10_135 = arith.constant 10 : index
    %137 = vector.load %arg8[%c0_134, %c10_135] : memref<32x102xbf16, #tpu.memory_space<vmem>>, vector<32x80xbf16>
    %c3_136 = arith.constant 3 : index
    %c0_137 = arith.constant 0 : index
    %c0_138 = arith.constant 0 : index
    %138 = vector.load %arg6[%c3_136, %c0_137, %c0_138] : memref<9x32x32xbf16, #tpu.memory_space<vmem>>, vector<1x32x32xbf16>
    %139 = vector.shape_cast %138 : vector<1x32x32xbf16> to vector<32x32xbf16>
    %cst_139 = arith.constant dense<0.000000e+00> : vector<32x80xf32>
    %140 = tpu.matmul %139, %137, %cst_139 {dimension_numbers = #tpu.dot_dimension_numbers<[1], [0], [0], [1], [0, 0, 1, 1], [], []>} : vector<32x32xbf16>, vector<32x80xbf16>, vector<32x80xf32> -> vector<32x80xf32>
    %141 = arith.addf %136, %140 : vector<32x80xf32>
    %c0_140 = arith.constant 0 : index
    %c11_141 = arith.constant 11 : index
    %142 = vector.load %arg8[%c0_140, %c11_141] : memref<32x102xbf16, #tpu.memory_space<vmem>>, vector<32x80xbf16>
    %c4_142 = arith.constant 4 : index
    %c0_143 = arith.constant 0 : index
    %c0_144 = arith.constant 0 : index
    %143 = vector.load %arg6[%c4_142, %c0_143, %c0_144] : memref<9x32x32xbf16, #tpu.memory_space<vmem>>, vector<1x32x32xbf16>
    %144 = vector.shape_cast %143 : vector<1x32x32xbf16> to vector<32x32xbf16>
    %cst_145 = arith.constant dense<0.000000e+00> : vector<32x80xf32>
    %145 = tpu.matmul %144, %142, %cst_145 {dimension_numbers = #tpu.dot_dimension_numbers<[1], [0], [0], [1], [0, 0, 1, 1], [], []>} : vector<32x32xbf16>, vector<32x80xbf16>, vector<32x80xf32> -> vector<32x80xf32>
    %146 = arith.addf %141, %145 : vector<32x80xf32>
    %c0_146 = arith.constant 0 : index
    %c12_147 = arith.constant 12 : index
    %147 = vector.load %arg8[%c0_146, %c12_147] : memref<32x102xbf16, #tpu.memory_space<vmem>>, vector<32x80xbf16>
    %c5_148 = arith.constant 5 : index
    %c0_149 = arith.constant 0 : index
    %c0_150 = arith.constant 0 : index
    %148 = vector.load %arg6[%c5_148, %c0_149, %c0_150] : memref<9x32x32xbf16, #tpu.memory_space<vmem>>, vector<1x32x32xbf16>
    %149 = vector.shape_cast %148 : vector<1x32x32xbf16> to vector<32x32xbf16>
    %cst_151 = arith.constant dense<0.000000e+00> : vector<32x80xf32>
    %150 = tpu.matmul %149, %147, %cst_151 {dimension_numbers = #tpu.dot_dimension_numbers<[1], [0], [0], [1], [0, 0, 1, 1], [], []>} : vector<32x32xbf16>, vector<32x80xbf16>, vector<32x80xf32> -> vector<32x80xf32>
    %151 = arith.addf %146, %150 : vector<32x80xf32>
    %c0_152 = arith.constant 0 : index
    %c20_153 = arith.constant 20 : index
    %152 = vector.load %arg8[%c0_152, %c20_153] : memref<32x102xbf16, #tpu.memory_space<vmem>>, vector<32x80xbf16>
    %c6_154 = arith.constant 6 : index
    %c0_155 = arith.constant 0 : index
    %c0_156 = arith.constant 0 : index
    %153 = vector.load %arg6[%c6_154, %c0_155, %c0_156] : memref<9x32x32xbf16, #tpu.memory_space<vmem>>, vector<1x32x32xbf16>
    %154 = vector.shape_cast %153 : vector<1x32x32xbf16> to vector<32x32xbf16>
    %cst_157 = arith.constant dense<0.000000e+00> : vector<32x80xf32>
    %155 = tpu.matmul %154, %152, %cst_157 {dimension_numbers = #tpu.dot_dimension_numbers<[1], [0], [0], [1], [0, 0, 1, 1], [], []>} : vector<32x32xbf16>, vector<32x80xbf16>, vector<32x80xf32> -> vector<32x80xf32>
    %156 = arith.addf %151, %155 : vector<32x80xf32>
    %c0_158 = arith.constant 0 : index
    %c21_159 = arith.constant 21 : index
    %157 = vector.load %arg8[%c0_158, %c21_159] : memref<32x102xbf16, #tpu.memory_space<vmem>>, vector<32x80xbf16>
    %c7_160 = arith.constant 7 : index
    %c0_161 = arith.constant 0 : index
    %c0_162 = arith.constant 0 : index
    %158 = vector.load %arg6[%c7_160, %c0_161, %c0_162] : memref<9x32x32xbf16, #tpu.memory_space<vmem>>, vector<1x32x32xbf16>
    %159 = vector.shape_cast %158 : vector<1x32x32xbf16> to vector<32x32xbf16>
    %cst_163 = arith.constant dense<0.000000e+00> : vector<32x80xf32>
    %160 = tpu.matmul %159, %157, %cst_163 {dimension_numbers = #tpu.dot_dimension_numbers<[1], [0], [0], [1], [0, 0, 1, 1], [], []>} : vector<32x32xbf16>, vector<32x80xbf16>, vector<32x80xf32> -> vector<32x80xf32>
    %161 = arith.addf %156, %160 : vector<32x80xf32>
    %c0_164 = arith.constant 0 : index
    %c22_165 = arith.constant 22 : index
    %162 = vector.load %arg8[%c0_164, %c22_165] : memref<32x102xbf16, #tpu.memory_space<vmem>>, vector<32x80xbf16>
    %c8_166 = arith.constant 8 : index
    %c0_167 = arith.constant 0 : index
    %c0_168 = arith.constant 0 : index
    %163 = vector.load %arg6[%c8_166, %c0_167, %c0_168] : memref<9x32x32xbf16, #tpu.memory_space<vmem>>, vector<1x32x32xbf16>
    %164 = vector.shape_cast %163 : vector<1x32x32xbf16> to vector<32x32xbf16>
    %cst_169 = arith.constant dense<0.000000e+00> : vector<32x80xf32>
    %165 = tpu.matmul %164, %162, %cst_169 {dimension_numbers = #tpu.dot_dimension_numbers<[1], [0], [0], [1], [0, 0, 1, 1], [], []>} : vector<32x32xbf16>, vector<32x80xbf16>, vector<32x80xf32> -> vector<32x80xf32>
    %166 = arith.addf %161, %165 : vector<32x80xf32>
    %167 = arith.addf %166, %115 : vector<32x80xf32>
    %168 = arith.truncf %167 : vector<32x80xf32> to vector<32x80xbf16>
    %c0_170 = arith.constant 0 : index
    %c0_171 = arith.constant 0 : index
    %c0_172 = arith.constant 0 : index
    %169 = vector.load %arg7[%c0_170, %c0_171, %c0_172] : memref<1x32x80xbf16, #tpu.memory_space<vmem>>, vector<1x32x80xbf16>
    %170 = vector.shape_cast %169 : vector<1x32x80xbf16> to vector<32x80xbf16>
    %171 = vector.shape_cast %168 : vector<32x80xbf16> to vector<1x32x80xbf16>
    tpu.vector_store %arg7[%c0_170, %c0_171, %c0_172], %171 {strides = array<i32>} : memref<1x32x80xbf16, #tpu.memory_space<vmem>>, vector<1x32x80xbf16>,
    return
  }
  func.func @transform_0(%arg0: i32) -> (i32, i32, i32) {
    %c0_i32 = arith.constant 0 : i32
    %c0_i32_0 = arith.constant 0 : i32
    %c0_i32_1 = arith.constant 0 : i32
    return %arg0, %c0_i32, %c0_i32_0 : i32, i32, i32
  }
  func.func @transform_1(%arg0: i32) -> (i32, i32) {
    %c0_i32 = arith.constant 0 : i32
    %c0_i32_0 = arith.constant 0 : i32
    %c0_i32_1 = arith.constant 0 : i32
    return %c0_i32, %c0_i32_0 : i32, i32
  }
  func.func @transform_2(%arg0: i32) -> (i32, i32, i32) {
    %c0_i32 = arith.constant 0 : i32
    %c0_i32_0 = arith.constant 0 : i32
    %c0_i32_1 = arith.constant 0 : i32
    %c0_i32_2 = arith.constant 0 : i32
    return %c0_i32, %c0_i32_0, %c0_i32_1 : i32, i32, i32
  }
  func.func @transform_3(%arg0: i32) -> (i32, i32) {
    %c0_i32 = arith.constant 0 : i32
    %c0_i32_0 = arith.constant 0 : i32
    %c0_i32_1 = arith.constant 0 : i32
    return %c0_i32, %c0_i32_0 : i32, i32
  }
  func.func @transform_4(%arg0: i32) -> (i32, i32, i32) {
    %c0_i32 = arith.constant 0 : i32
    %c0_i32_0 = arith.constant 0 : i32
    %c0_i32_1 = arith.constant 0 : i32
    %c0_i32_2 = arith.constant 0 : i32
    return %c0_i32, %c0_i32_0, %c0_i32_1 : i32, i32, i32
  }
  func.func @transform_5(%arg0: i32) -> (i32, i32, i32) {
    %c0_i32 = arith.constant 0 : i32
    %c0_i32_0 = arith.constant 0 : i32
    %c0_i32_1 = arith.constant 0 : i32
    %c0_i32_2 = arith.constant 0 : i32
    return %c0_i32, %c0_i32_0, %c0_i32_1 : i32, i32, i32
  }
  func.func @transform_6(%arg0: i32) -> (i32, i32, i32) {
    %c0_i32 = arith.constant 0 : i32
    %c0_i32_0 = arith.constant 0 : i32
    %c0_i32_1 = arith.constant 0 : i32
    return %arg0, %c0_i32, %c0_i32_0 : i32, i32, i32
  }
}

module attributes {stable_mosaic.version = 11 : i64} {
  func.func @_conv_group_kernel(%arg0: i32, %arg1: memref<1x32x326xbf16, #tpu.memory_space<vmem>>, %arg2: memref<1x288xf32, #tpu.memory_space<vmem>>, %arg3: memref<9x1x32xbf16, #tpu.memory_space<vmem>>, %arg4: memref<1x1xf32, #tpu.memory_space<vmem>>, %arg5: memref<1x1x288xf32, #tpu.memory_space<vmem>>) attributes {dimension_semantics = [#tpu.dimension_semantics<parallel>], iteration_bounds = array<i64: 2>, scalar_prefetch = 0 : i64, scratch_operands = 0 : i64, tpu.core_type = #tpu.core_type<tc>, window_params = [{transform_indices = @transform_0, window_bounds = array<i64: 1, 32, 326>}, {pipeline_mode = #tpu.pipeline_mode<synchronous>, transform_indices = @transform_1, window_bounds = array<i64: 1, 288>}, {pipeline_mode = #tpu.pipeline_mode<synchronous>, transform_indices = @transform_2, window_bounds = array<i64: 9, 1, 32>}, {pipeline_mode = #tpu.pipeline_mode<synchronous>, transform_indices = @transform_3, window_bounds = array<i64: 1, 1>}, {transform_indices = @transform_4, window_bounds = array<i64: 1, 1, 288>}]} {
    %c0 = arith.constant 0 : index
    %c0_0 = arith.constant 0 : index
    %c0_1 = arith.constant 0 : index
    %0 = vector.load %arg1[%c0, %c0_0, %c0_1] : memref<1x32x326xbf16, #tpu.memory_space<vmem>>, vector<1x32x288xbf16>
    %1 = vector.shape_cast %0 : vector<1x32x288xbf16> to vector<32x288xbf16>
    %c0_2 = arith.constant 0 : index
    %c0_3 = arith.constant 0 : index
    %c0_4 = arith.constant 0 : index
    %2 = vector.load %arg3[%c0_2, %c0_3, %c0_4] : memref<9x1x32xbf16, #tpu.memory_space<vmem>>, vector<1x1x32xbf16>
    %3 = vector.shape_cast %2 : vector<1x1x32xbf16> to vector<1x32xbf16>
    %cst = arith.constant dense<0.000000e+00> : vector<1x288xf32>
    %4 = tpu.matmul %3, %1, %cst {dimension_numbers = #tpu.dot_dimension_numbers<[1], [0], [0], [1], [0, 0, 1, 1], [], []>} : vector<1x32xbf16>, vector<32x288xbf16>, vector<1x288xf32> -> vector<1x288xf32>
    %c0_5 = arith.constant 0 : index
    %c0_6 = arith.constant 0 : index
    %c1 = arith.constant 1 : index
    %5 = vector.load %arg1[%c0_5, %c0_6, %c1] : memref<1x32x326xbf16, #tpu.memory_space<vmem>>, vector<1x32x288xbf16>
    %6 = vector.shape_cast %5 : vector<1x32x288xbf16> to vector<32x288xbf16>
    %c1_7 = arith.constant 1 : index
    %c0_8 = arith.constant 0 : index
    %c0_9 = arith.constant 0 : index
    %7 = vector.load %arg3[%c1_7, %c0_8, %c0_9] : memref<9x1x32xbf16, #tpu.memory_space<vmem>>, vector<1x1x32xbf16>
    %8 = vector.shape_cast %7 : vector<1x1x32xbf16> to vector<1x32xbf16>
    %cst_10 = arith.constant dense<0.000000e+00> : vector<1x288xf32>
    %9 = tpu.matmul %8, %6, %cst_10 {dimension_numbers = #tpu.dot_dimension_numbers<[1], [0], [0], [1], [0, 0, 1, 1], [], []>} : vector<1x32xbf16>, vector<32x288xbf16>, vector<1x288xf32> -> vector<1x288xf32>
    %10 = arith.addf %4, %9 : vector<1x288xf32>
    %c0_11 = arith.constant 0 : index
    %c0_12 = arith.constant 0 : index
    %c2 = arith.constant 2 : index
    %11 = vector.load %arg1[%c0_11, %c0_12, %c2] : memref<1x32x326xbf16, #tpu.memory_space<vmem>>, vector<1x32x288xbf16>
    %12 = vector.shape_cast %11 : vector<1x32x288xbf16> to vector<32x288xbf16>
    %c2_13 = arith.constant 2 : index
    %c0_14 = arith.constant 0 : index
    %c0_15 = arith.constant 0 : index
    %13 = vector.load %arg3[%c2_13, %c0_14, %c0_15] : memref<9x1x32xbf16, #tpu.memory_space<vmem>>, vector<1x1x32xbf16>
    %14 = vector.shape_cast %13 : vector<1x1x32xbf16> to vector<1x32xbf16>
    %cst_16 = arith.constant dense<0.000000e+00> : vector<1x288xf32>
    %15 = tpu.matmul %14, %12, %cst_16 {dimension_numbers = #tpu.dot_dimension_numbers<[1], [0], [0], [1], [0, 0, 1, 1], [], []>} : vector<1x32xbf16>, vector<32x288xbf16>, vector<1x288xf32> -> vector<1x288xf32>
    %16 = arith.addf %10, %15 : vector<1x288xf32>
    %c0_17 = arith.constant 0 : index
    %c0_18 = arith.constant 0 : index
    %c18 = arith.constant 18 : index
    %17 = vector.load %arg1[%c0_17, %c0_18, %c18] : memref<1x32x326xbf16, #tpu.memory_space<vmem>>, vector<1x32x288xbf16>
    %18 = vector.shape_cast %17 : vector<1x32x288xbf16> to vector<32x288xbf16>
    %c3 = arith.constant 3 : index
    %c0_19 = arith.constant 0 : index
    %c0_20 = arith.constant 0 : index
    %19 = vector.load %arg3[%c3, %c0_19, %c0_20] : memref<9x1x32xbf16, #tpu.memory_space<vmem>>, vector<1x1x32xbf16>
    %20 = vector.shape_cast %19 : vector<1x1x32xbf16> to vector<1x32xbf16>
    %cst_21 = arith.constant dense<0.000000e+00> : vector<1x288xf32>
    %21 = tpu.matmul %20, %18, %cst_21 {dimension_numbers = #tpu.dot_dimension_numbers<[1], [0], [0], [1], [0, 0, 1, 1], [], []>} : vector<1x32xbf16>, vector<32x288xbf16>, vector<1x288xf32> -> vector<1x288xf32>
    %22 = arith.addf %16, %21 : vector<1x288xf32>
    %c0_22 = arith.constant 0 : index
    %c0_23 = arith.constant 0 : index
    %c19 = arith.constant 19 : index
    %23 = vector.load %arg1[%c0_22, %c0_23, %c19] : memref<1x32x326xbf16, #tpu.memory_space<vmem>>, vector<1x32x288xbf16>
    %24 = vector.shape_cast %23 : vector<1x32x288xbf16> to vector<32x288xbf16>
    %c4 = arith.constant 4 : index
    %c0_24 = arith.constant 0 : index
    %c0_25 = arith.constant 0 : index
    %25 = vector.load %arg3[%c4, %c0_24, %c0_25] : memref<9x1x32xbf16, #tpu.memory_space<vmem>>, vector<1x1x32xbf16>
    %26 = vector.shape_cast %25 : vector<1x1x32xbf16> to vector<1x32xbf16>
    %cst_26 = arith.constant dense<0.000000e+00> : vector<1x288xf32>
    %27 = tpu.matmul %26, %24, %cst_26 {dimension_numbers = #tpu.dot_dimension_numbers<[1], [0], [0], [1], [0, 0, 1, 1], [], []>} : vector<1x32xbf16>, vector<32x288xbf16>, vector<1x288xf32> -> vector<1x288xf32>
    %28 = arith.addf %22, %27 : vector<1x288xf32>
    %c0_27 = arith.constant 0 : index
    %c0_28 = arith.constant 0 : index
    %c20 = arith.constant 20 : index
    %29 = vector.load %arg1[%c0_27, %c0_28, %c20] : memref<1x32x326xbf16, #tpu.memory_space<vmem>>, vector<1x32x288xbf16>
    %30 = vector.shape_cast %29 : vector<1x32x288xbf16> to vector<32x288xbf16>
    %c5 = arith.constant 5 : index
    %c0_29 = arith.constant 0 : index
    %c0_30 = arith.constant 0 : index
    %31 = vector.load %arg3[%c5, %c0_29, %c0_30] : memref<9x1x32xbf16, #tpu.memory_space<vmem>>, vector<1x1x32xbf16>
    %32 = vector.shape_cast %31 : vector<1x1x32xbf16> to vector<1x32xbf16>
    %cst_31 = arith.constant dense<0.000000e+00> : vector<1x288xf32>
    %33 = tpu.matmul %32, %30, %cst_31 {dimension_numbers = #tpu.dot_dimension_numbers<[1], [0], [0], [1], [0, 0, 1, 1], [], []>} : vector<1x32xbf16>, vector<32x288xbf16>, vector<1x288xf32> -> vector<1x288xf32>
    %34 = arith.addf %28, %33 : vector<1x288xf32>
    %c0_32 = arith.constant 0 : index
    %c0_33 = arith.constant 0 : index
    %c36 = arith.constant 36 : index
    %35 = vector.load %arg1[%c0_32, %c0_33, %c36] : memref<1x32x326xbf16, #tpu.memory_space<vmem>>, vector<1x32x288xbf16>
    %36 = vector.shape_cast %35 : vector<1x32x288xbf16> to vector<32x288xbf16>
    %c6 = arith.constant 6 : index
    %c0_34 = arith.constant 0 : index
    %c0_35 = arith.constant 0 : index
    %37 = vector.load %arg3[%c6, %c0_34, %c0_35] : memref<9x1x32xbf16, #tpu.memory_space<vmem>>, vector<1x1x32xbf16>
    %38 = vector.shape_cast %37 : vector<1x1x32xbf16> to vector<1x32xbf16>
    %cst_36 = arith.constant dense<0.000000e+00> : vector<1x288xf32>
    %39 = tpu.matmul %38, %36, %cst_36 {dimension_numbers = #tpu.dot_dimension_numbers<[1], [0], [0], [1], [0, 0, 1, 1], [], []>} : vector<1x32xbf16>, vector<32x288xbf16>, vector<1x288xf32> -> vector<1x288xf32>
    %40 = arith.addf %34, %39 : vector<1x288xf32>
    %c0_37 = arith.constant 0 : index
    %c0_38 = arith.constant 0 : index
    %c37 = arith.constant 37 : index
    %41 = vector.load %arg1[%c0_37, %c0_38, %c37] : memref<1x32x326xbf16, #tpu.memory_space<vmem>>, vector<1x32x288xbf16>
    %42 = vector.shape_cast %41 : vector<1x32x288xbf16> to vector<32x288xbf16>
    %c7 = arith.constant 7 : index
    %c0_39 = arith.constant 0 : index
    %c0_40 = arith.constant 0 : index
    %43 = vector.load %arg3[%c7, %c0_39, %c0_40] : memref<9x1x32xbf16, #tpu.memory_space<vmem>>, vector<1x1x32xbf16>
    %44 = vector.shape_cast %43 : vector<1x1x32xbf16> to vector<1x32xbf16>
    %cst_41 = arith.constant dense<0.000000e+00> : vector<1x288xf32>
    %45 = tpu.matmul %44, %42, %cst_41 {dimension_numbers = #tpu.dot_dimension_numbers<[1], [0], [0], [1], [0, 0, 1, 1], [], []>} : vector<1x32xbf16>, vector<32x288xbf16>, vector<1x288xf32> -> vector<1x288xf32>
    %46 = arith.addf %40, %45 : vector<1x288xf32>
    %c0_42 = arith.constant 0 : index
    %c0_43 = arith.constant 0 : index
    %c38 = arith.constant 38 : index
    %47 = vector.load %arg1[%c0_42, %c0_43, %c38] : memref<1x32x326xbf16, #tpu.memory_space<vmem>>, vector<1x32x288xbf16>
    %48 = vector.shape_cast %47 : vector<1x32x288xbf16> to vector<32x288xbf16>
    %c8 = arith.constant 8 : index
    %c0_44 = arith.constant 0 : index
    %c0_45 = arith.constant 0 : index
    %49 = vector.load %arg3[%c8, %c0_44, %c0_45] : memref<9x1x32xbf16, #tpu.memory_space<vmem>>, vector<1x1x32xbf16>
    %50 = vector.shape_cast %49 : vector<1x1x32xbf16> to vector<1x32xbf16>
    %cst_46 = arith.constant dense<0.000000e+00> : vector<1x288xf32>
    %51 = tpu.matmul %50, %48, %cst_46 {dimension_numbers = #tpu.dot_dimension_numbers<[1], [0], [0], [1], [0, 0, 1, 1], [], []>} : vector<1x32xbf16>, vector<32x288xbf16>, vector<1x288xf32> -> vector<1x288xf32>
    %52 = arith.addf %46, %51 : vector<1x288xf32>
    %c0_47 = arith.constant 0 : index
    %c0_48 = arith.constant 0 : index
    %53 = vector.load %arg4[%c0_47, %c0_48] : memref<1x1xf32, #tpu.memory_space<vmem>>, vector<1x1xf32>
    %54 = vector.broadcast %53 : vector<1x1xf32> to vector<1x288xf32>
    %55 = arith.addf %52, %54 : vector<1x288xf32>
    %56 = math.absf %55 : vector<1x288xf32>
    %cst_49 = arith.constant 0.000000e+00 : f32
    %57 = vector.broadcast %cst_49 : f32 to vector<1x288xf32>
    %58 = arith.subf %57, %56 : vector<1x288xf32>
    %59 = math.exp %58 : vector<1x288xf32>
    %cst_50 = arith.constant 0.000000e+00 : f32
    %60 = vector.broadcast %cst_50 : f32 to vector<1x288xf32>
    %61 = arith.cmpf oge, %55, %60 : vector<1x288xf32>
    %cst_51 = arith.constant 1.000000e+00 : f32
    %62 = vector.broadcast %cst_51 : f32 to vector<1x288xf32>
    %63 = arith.addf %62, %59 : vector<1x288xf32>
    %cst_52 = arith.constant 1.000000e+00 : f32
    %64 = vector.broadcast %cst_52 : f32 to vector<1x288xf32>
    %65 = arith.divf %64, %63 : vector<1x288xf32>
    %cst_53 = arith.constant 1.000000e+00 : f32
    %66 = vector.broadcast %cst_53 : f32 to vector<1x288xf32>
    %67 = arith.addf %66, %59 : vector<1x288xf32>
    %68 = arith.divf %59, %67 : vector<1x288xf32>
    %69 = arith.select %61, %65, %68 : vector<1x288xi1>, vector<1x288xf32>
    %c0_54 = arith.constant 0 : index
    %c0_55 = arith.constant 0 : index
    %c0_56 = arith.constant 0 : index
    %70 = vector.load %arg5[%c0_54, %c0_55, %c0_56] : memref<1x1x288xf32, #tpu.memory_space<vmem>>, vector<1x1x288xf32>
    %71 = vector.shape_cast %70 : vector<1x1x288xf32> to vector<1x288xf32>
    %72 = vector.shape_cast %69 : vector<1x288xf32> to vector<1x1x288xf32>
    tpu.vector_store %arg5[%c0_54, %c0_55, %c0_56], %72 {strides = array<i32>} : memref<1x1x288xf32, #tpu.memory_space<vmem>>, vector<1x1x288xf32>,
    return
  }
  func.func @transform_0(%arg0: i32) -> (i32, i32, i32) {
    %c0_i32 = arith.constant 0 : i32
    %c0_i32_0 = arith.constant 0 : i32
    %c0_i32_1 = arith.constant 0 : i32
    return %arg0, %c0_i32, %c0_i32_0 : i32, i32, i32
  }
  func.func @transform_1(%arg0: i32) -> (i32, i32) {
    %c0_i32 = arith.constant 0 : i32
    %c0_i32_0 = arith.constant 0 : i32
    %c0_i32_1 = arith.constant 0 : i32
    return %c0_i32, %c0_i32_0 : i32, i32
  }
  func.func @transform_2(%arg0: i32) -> (i32, i32, i32) {
    %c0_i32 = arith.constant 0 : i32
    %c0_i32_0 = arith.constant 0 : i32
    %c0_i32_1 = arith.constant 0 : i32
    %c0_i32_2 = arith.constant 0 : i32
    return %c0_i32, %c0_i32_0, %c0_i32_1 : i32, i32, i32
  }
  func.func @transform_3(%arg0: i32) -> (i32, i32) {
    %c0_i32 = arith.constant 0 : i32
    %c0_i32_0 = arith.constant 0 : i32
    %c0_i32_1 = arith.constant 0 : i32
    return %c0_i32, %c0_i32_0 : i32, i32
  }
  func.func @transform_4(%arg0: i32) -> (i32, i32, i32) {
    %c0_i32 = arith.constant 0 : i32
    %c0_i32_0 = arith.constant 0 : i32
    %c0_i32_1 = arith.constant 0 : i32
    return %arg0, %c0_i32, %c0_i32_0 : i32, i32, i32
  }
}

</mosaic_0001>

<bundles_post_ra>
// kernel: decoder_forward.4
= control target key start
LH: loop header
LB: loop body
LE: loop exit
PB: predicated region body
PF: predicated region fallthrough
CT: control target
= control target key end

     0   :  { %vm25_vm0 = vcmask 1041408   ;;  %vm21_vm1 = vcmask 80896   ;;  %vm55_vm2 = vcmask 25600   ;;  %s102_s1 = inlined_call_operand.vmem [shape: f32[10,4], index: 1, kind: input, shape index: {}]   ;;  %s103_s0 = inlined_call_operand.vmem [shape: f32[2,10], index: 0, kind: input, shape index: {}]   ;;  %s104_s2 = inlined_call_operand.vmem [shape: f32[1,4], index: 2, kind: input, shape index: {}]   ;;  %s105_s3 = inlined_call_operand.vmem [shape: f32[2,4], index: 3, kind: output, shape index: {}]  }
   0x1   :  { %v16_v0 = vld [vmem:[%s102_s1 + $0x8] sm:$0x3]  ;;  %v15_v1 = vld [vmem:[%s102_s1] sm:$0xff] }
   0x2   :  { %61 = vmatpush.msk.msra.mxu0 %vm25_vm0, %v16_v0  ;;  %v14_v2 = vld [vmem:[%s103_s0] sm:$0x3] }
   0x3   :  { %v64_v3 = vld [vmem:[%s104_s2] ss:$0 sm:$0xff] }
   0x4   :  { %44 = vmatpush.msra.mxu0 %v15_v1 }
   0x5   :  { %62 = vmatmul.msk.f32.vlgmr.msra.gmra.mxu0 %vm21_vm1, %v14_v2 }
  0x82   :  { %v46_v4 = vpop.f32.mrf.mxu0 }
  0x83   :  { %v47_v5 = vadd.f32 %v64_v3, %v46_v4 }
  0x85   :  { %v50_v6 = vmin.f32 %v47_v5, 0.0  ;;  %vm49_vm3 = vcmp.gt.f32.partialorder %v47_v5, 0.0 }
  0x87   :  { %v51_v7 = vmul.f32 1.442695, %v50_v6 }
  0x89   :  { %65 = vpow2.f32 %v51_v7 }
  0x8f   :  { %v66_v8 = vpop.eup %65 }
  0x90   :  { %v63_v9 = vadd.f32 -1.0, %v66_v8 }
  0x92   :  { %v54_v10 = vsel %vm49_vm3, %v47_v5, %v63_v9 }
  0x93   :  { %56 = vst.msk [vmem:[%s105_s3] sm:$0x3] %vm55_vm2, %v54_v10 }

// kernel: decoder_forward.5
= control target key start
LH: loop header
LB: loop body
LE: loop exit
PB: predicated region body
PF: predicated region fallthrough
CT: control target
= control target key end

     0   :  { %s1877_s24 = smov 0   ;;  %s2187_s0 = inlined_call_operand.vmem [shape: bf16[2,1,38], index: 0, kind: input, shape index: {}]   ;;  %s2188_s1 = inlined_call_operand.vmem [shape: f32[1,24], index: 1, kind: input, shape index: {}]   ;;  %s2189_s2 = inlined_call_operand.vmem [shape: bf16[9,32,1], index: 2, kind: input, shape index: {}]   ;;  %s2190_s3 = inlined_call_operand.vmem [shape: f32[32,1], index: 3, kind: input, shape index: {}]   ;;  %s2191_s4 = inlined_call_operand.vmem [shape: f32[32,1], index: 4, kind: input, shape index: {}]   ;;  %s2192_s5 = inlined_call_operand.vmem [shape: f32[32,1], index: 5, kind: input, shape index: {}]   ;;  %s2193_s6 = inlined_call_operand.vmem [shape: bf16[9,32,32], index: 6, kind: input, shape index: {}]   ;;  %s2194_s7 = inlined_call_operand.vmem [shape: bf16[2,32,24], index: 7, kind: output, shape index: {}]  }
   0x1 LB: > { %s1412_s25 = sadd.s32 4294967295, %s1825_s24   ;;  %p1416_p0 = scmp.ge.s32.totalorder %s1825_s24, 1  ;;  %s1825_s24 = sphi %s1877_s24, %s17_s24  }
   0x2   : > { %p235_p1 = scmp.lt.s32.totalorder %s1825_s24, 3 }
   0x4   : > { %p236_p2 = pnand %p1416_p0, %p235_p1 }
   0x5   : > { %p265_p3 = scmp.lt.s32.totalorder (!%p236_p2), %s1412_s25, 1  ;;  %s1828_s21 = smov (!%p236_p2), 127  }
   0x6   : > { %239 = sbr.rel (%p236_p2) target bundleno = 817 (0x331), region = 48  ;;  %s1829_s22 = smov (!%p236_p2), 126  }
   0x7   : > { %s1830_s23 = smov (!%p236_p2), 122   ;;  %s1831_s26 = smov (!%p236_p2), 121  }
   0x8   : > { %s1832_s27 = smov (!%p236_p2), 120   ;;  %s1833_s28 = smov (!%p236_p2), 116  }
   0x9   : > { %s1834_s29 = smov (!%p236_p2), 115   ;;  %s1835_s9 = smov (!%p236_p2), 114  }
   0xa   : > { %s1836_s30 = smov (!%p236_p2), 7  }
   0xb   : > { %v1681_v0 = vld [vmem:[%s2189_s2 + $0x10] sm:$0xff]   ;;  %v1682_v1 = vld [vmem:[%s2189_s2 + $0x18] sm:$0xff]   ;;  %v1683_v2 = vld [vmem:[%s2189_s2 + $0x20] sm:$0xff]   ;;  %v1827_v3 = vmov 0   ;;  %s2196_s25 = smov (!%p265_p3, %s1412_s25), 1  ;;  %vm867_vm4 = vcmask 56320  }
   0xc   : > { %1728 = vset.pattern.permute.xlu1 %v1827_v3  ;;  %1717 = vset.pattern.permute.xlu0 %v1827_v3  ;;  %v1618_v4 = vunpack.c.l.bf16 %v1681_v0  ;;  %v1619_v5 = vunpack.c.h.bf16 %v1681_v0  ;;  %v1622_v6 = vunpack.c.l.bf16 %v1682_v1  ;;  %v1623_v7 = vunpack.c.h.bf16 %v1682_v1  ;;  %v1686_v10 = vld [vmem:[%s2189_s2 + $0x38] sm:$0xff]   ;;  %v1684_v11 = vld [vmem:[%s2189_s2 + $0x28] sm:$0xff]   ;;  %v1685_v26 = vld [vmem:[%s2189_s2 + $0x30] sm:$0xff]   ;;  %s267_s20 = scalar_lea.vmem %s2187_s0, %s2196_s25  ;;  %s1587_s16 = sshll.u32 %s2196_s25, 4 }
   0xd   : > { %1739 = vset.pattern.permute.xlu2 %v1827_v3  ;;  %v1626_v8 = vunpack.c.l.bf16 %v1683_v2  ;;  %v1627_v9 = vunpack.c.h.bf16 %v1683_v2  ;;  %v1688_v14 = vld [vmem:[%s2189_s2 + $0x48] sm:$0xff]   ;;  %v1638_v16 = vunpack.c.l.bf16 %v1686_v10  ;;  %v1639_v17 = vunpack.c.h.bf16 %v1686_v10  ;;  %v1690_v25 = vld [vmem:[%s2189_s2 + $0x58] sm:$0xff]   ;;  %v1687_v27 = vld [vmem:[%s2189_s2 + $0x40] sm:$0xff]   ;;  %s2171_s19 = scalar_lea.vmem %s2194_s7, %s1587_s16 }
   0xe   : > { %v1729_v12 = vpack.i.bf16 %v1619_v5, %v1618_v4  ;;  %v1718_v13 = vpack.i.bf16 %v1623_v7, %v1622_v6  ;;  %v1630_v18 = vunpack.c.l.bf16 %v1684_v11  ;;  %v1631_v19 = vunpack.c.h.bf16 %v1684_v11  ;;  %v1689_v37 = vld [vmem:[%s2189_s2 + $0x50] sm:$0xff]   ;;  %v1692_v38 = vld [vmem:[%s2189_s2 + $0x68] sm:$0xff]   ;;  %v1694_v39 = vld [vmem:[%s2189_s2 + $0x78] sm:$0xff]  }
   0xf   : > { %v1740_v15 = vpack.i.bf16 %v1627_v9, %v1626_v8  ;;  %v1646_v20 = vunpack.c.l.bf16 %v1688_v14  ;;  %v1647_v21 = vunpack.c.h.bf16 %v1688_v14  ;;  %v1734_v22 = vpack.i.bf16 %v1639_v17, %v1638_v16  ;;  %v1696_v49 = vld [vmem:[%s2189_s2 + $0x88] sm:$0xff]   ;;  %v1691_v50 = vld [vmem:[%s2189_s2 + $0x60] sm:$0xff]   ;;  %v1693_v51 = vld [vmem:[%s2189_s2 + $0x70] sm:$0xff]  }
  0x10   : > { %1730 = vperm.xlu1 %1728, %v1729_v12   ;;  %1719 = vperm.xlu0 %1717, %v1718_v13   ;;  %v1723_v23 = vpack.i.bf16 %v1631_v19, %v1630_v18  ;;  %v1654_v28 = vunpack.c.l.bf16 %v1690_v25  ;;  %v1655_v29 = vunpack.c.h.bf16 %v1690_v25  ;;  %v1634_v30 = vunpack.c.l.bf16 %v1685_v26  ;;  %v1695_v61 = vld [vmem:[%s2189_s2 + $0x80] sm:$0xff]   ;;  %v1680_v62 = vld [vmem:[%s2189_s2 + $0x8] sm:$0xff]  }
  0x11   : > { %1741 = vperm.xlu2 %1739, %v1740_v15   ;;  %v1745_v24 = vpack.i.bf16 %v1647_v21, %v1646_v20  ;;  %v1635_v31 = vunpack.c.h.bf16 %v1685_v26  ;;  %v1642_v32 = vunpack.c.l.bf16 %v1687_v27  ;;  %v1643_v33 = vunpack.c.h.bf16 %v1687_v27  ;;  %v1609_v5 = vld [vmem:[%s2189_s2] sm:$0xff]  }
  0x12   : > { %v1755_v34 = vpack.i.bf16 %v1655_v29, %v1654_v28  ;;  %v1650_v40 = vunpack.c.l.bf16 %v1689_v37  ;;  %v1651_v41 = vunpack.c.h.bf16 %v1689_v37  ;;  %v1662_v42 = vunpack.c.l.bf16 %v1692_v38  ;;  %v274_v9 = vld [vmem:[%s267_s20] sm:$0x1] }
  0x13   : > { %v1750_v35 = vpack.i.bf16 %v1635_v31, %v1634_v30  ;;  %v1760_v36 = vpack.i.bf16 %v1643_v33, %v1642_v32  ;;  %v1663_v43 = vunpack.c.h.bf16 %v1692_v38  ;;  %v1670_v44 = vunpack.c.l.bf16 %v1694_v39 }
  0x14   : > { %v1671_v45 = vunpack.c.h.bf16 %v1694_v39  ;;  %v1770_v46 = vpack.i.bf16 %v1651_v41, %v1650_v40  ;;  %v1678_v52 = vunpack.c.l.bf16 %v1696_v49  ;;  %v1679_v53 = vunpack.c.h.bf16 %v1696_v49 }
  0x15   : > { %v1765_v47 = vpack.i.bf16 %v1663_v43, %v1662_v42  ;;  %v1658_v54 = vunpack.c.l.bf16 %v1691_v50  ;;  %v1659_v55 = vunpack.c.h.bf16 %v1691_v50  ;;  %v1666_v56 = vunpack.c.l.bf16 %v1693_v51 }
  0x16   : > { %v1775_v48 = vpack.i.bf16 %v1671_v45, %v1670_v44  ;;  %v1667_v57 = vunpack.c.h.bf16 %v1693_v51  ;;  %v1785_v58 = vpack.i.bf16 %v1679_v53, %v1678_v52  ;;  %v1674_v63 = vunpack.c.l.bf16 %v1695_v61 }
  0x17   : > { %v1780_v59 = vpack.i.bf16 %v1659_v55, %v1658_v54  ;;  %v1675_v0 = vunpack.c.h.bf16 %v1695_v61  ;;  %v1614_v1 = vunpack.c.l.bf16 %v1680_v62  ;;  %v1615_v2 = vunpack.c.h.bf16 %v1680_v62 }
  0x18   : > { %1735 = vperm.xlu1 %1728, %v1734_v22   ;;  %1724 = vperm.xlu0 %1717, %v1723_v23   ;;  %v1790_v60 = vpack.i.bf16 %v1667_v57, %v1666_v56  ;;  %v1610_v6 = vunpack.c.l.bf16 %v1609_v5  ;;  %v1611_v7 = vunpack.c.h.bf16 %v1609_v5  ;;  %v283_v10 = vunpack.c.l.bf16 %v274_v9 }
  0x19   : > { %1746 = vperm.xlu2 %1739, %v1745_v24   ;;  %v1795_v3 = vpack.i.bf16 %v1675_v0, %v1674_v63  ;;  %v1800_v4 = vpack.i.bf16 %v1615_v2, %v1614_v1  ;;  %vm873_vm5 = vcmask 252928   ;;  %vm890_vm6 = vcmask 306176  }
  0x1a   : > { %v1805_v8 = vpack.i.bf16 %v1611_v7, %v1610_v6  ;;  %v1949_v11 = vperm.slane %v283_v10, 0  ;;  %vm934_vm7 = vcmask 261120   ;;  %vm1355_vm8 = vcmask 191488  }
  0x20   : > { %1756 = vperm.xlu1 %1728, %v1755_v34   ;;  %1751 = vperm.xlu0 %1717, %v1750_v35  }
  0x21   : > { %1761 = vperm.xlu2 %1739, %v1760_v36  }
  0x28   : > { %1771 = vperm.xlu1 %1728, %v1770_v46   ;;  %1766 = vperm.xlu0 %1717, %v1765_v47  }
  0x29   : > { %1776 = vperm.xlu2 %1739, %v1775_v48  }
  0x30   : > { %1786 = vperm.xlu1 %1728, %v1785_v58   ;;  %1781 = vperm.xlu0 %1717, %v1780_v59  }
  0x31   : > { %1791 = vperm.xlu2 %1739, %v1790_v60  }
  0x38   : > { %1796 = vperm.xlu0 %1717, %v1795_v3   ;;  %1801 = vperm.xlu1 %1728, %v1800_v4  }
  0x40   : > { %1806 = vperm.xlu1 %1728, %v1805_v8  }
  0x6b   : > { %v1742_v17 = vpop.permute.xlu2 %1741 }
  0x6c   : > { %v1744_v37 = vunpack.i.h.bf16 %v1742_v17  ;;  %v1743_v38 = vunpack.i.l.bf16 %v1742_v17 }
  0x6e   : > { %v391_v40 = vmul.f32 %v1743_v38, %v1949_v11  ;;  %v392_v41 = vmul.f32 %v1744_v37, %v1949_v11  ;;  %v787_v38 = vld [vmem:[%s2191_s4 + $0x10] sm:$0xff] }
  0x73   : > { %v1747_v29 = vpop.permute.xlu2 %1746 }
  0x74   : > { %v1748_v30 = vunpack.i.l.bf16 %v1747_v29  ;;  %v1749_v43 = vunpack.i.h.bf16 %v1747_v29 }
  0x76   : > { %v499_v33 = vmul.f32 %v1748_v30, %v1949_v11  ;;  %v500_v47 = vmul.f32 %v1749_v43, %v1949_v11  ;;  %v816_v43 = vld [vmem:[%s2192_s5 + $0x18] sm:$0xff] }
  0x7b   : > { %v1762_v44 = vpop.permute.xlu2 %1761 }
  0x7c   : > { %v1763_v46 = vunpack.i.l.bf16 %v1762_v44  ;;  %v1764_v58 = vunpack.i.h.bf16 %v1762_v44  ;;  %v815_v44 = vld [vmem:[%s2192_s5 + $0x10] sm:$0xff] }
  0x7e   : > { %v497_v49 = vmul.f32 %v1763_v46, %v1949_v11  ;;  %v498_v62 = vmul.f32 %v1764_v58, %v1949_v11 }
  0x82   : > { %v1731_v12 = vpop.permute.xlu1 %1730  ;;  %v1720_v13 = vpop.permute.xlu0 %1719 }
  0x83   : > { %v1732_v14 = vunpack.i.l.bf16 %v1731_v12  ;;  %v1722_v15 = vunpack.i.h.bf16 %v1720_v13  ;;  %v1721_v16 = vunpack.i.l.bf16 %v1720_v13  ;;  %v1733_v31 = vunpack.i.h.bf16 %v1731_v12  ;;  %v1777_v59 = vpop.permute.xlu2 %1776 }
  0x84   : > { %v1778_v61 = vunpack.i.l.bf16 %v1777_v59  ;;  %v1779_v10 = vunpack.i.h.bf16 %v1777_v59 }
  0x85   : > { %v338_v18 = vmul.f32 %v1732_v14, %v1949_v11  ;;  %v340_v19 = vmul.f32 %v1721_v16, %v1949_v11  ;;  %v341_v20 = vmul.f32 %v1722_v15, %v1949_v11  ;;  %v339_v34 = vmul.f32 %v1733_v31, %v1949_v11 }
  0x86   : > { %v658_v0 = vmul.f32 %v1778_v61, %v1949_v11  ;;  %v659_v14 = vmul.f32 %v1779_v10, %v1949_v11 }
  0x87   : > { %352 = vrot.lane.b32.xlu0 %v341_v20, %s1828_s21  ;;  %350 = vrot.lane.b32.xlu2 %v340_v19, %s1828_s21 }
  0x88   : > { %346 = vrot.lane.b32.xlu1 %v338_v18, %s1828_s21 }
  0x8a   : > { %v1736_v21 = vpop.permute.xlu1 %1735  ;;  %v1725_v22 = vpop.permute.xlu0 %1724 }
  0x8b   : > { %v1738_v23 = vunpack.i.h.bf16 %v1736_v21  ;;  %v1727_v24 = vunpack.i.h.bf16 %v1725_v22  ;;  %v1726_v25 = vunpack.i.l.bf16 %v1725_v22  ;;  %v1737_v32 = vunpack.i.l.bf16 %v1736_v21  ;;  %v1792_v9 = vpop.permute.xlu2 %1791  ;;  %v736_v22 = vld [vmem:[%s2190_s3 + $0x18] sm:$0xff] }
  0x8c   : > { %v1793_v13 = vunpack.i.l.bf16 %v1792_v9 }
  0x8d   : > { %v447_v26 = vmul.f32 %v1738_v23, %v1949_v11  ;;  %v393_v27 = vmul.f32 %v1726_v25, %v1949_v11  ;;  %v394_v28 = vmul.f32 %v1727_v24, %v1949_v11  ;;  %v446_v35 = vmul.f32 %v1737_v32, %v1949_v11  ;;  %v735_v24 = vld [vmem:[%s2190_s3 + $0x10] sm:$0xff] }
  0x8e   : > { %v656_v16 = vmul.f32 %v1793_v13, %v1949_v11  ;;  %v1794_v23 = vunpack.i.h.bf16 %v1792_v9 }
  0x8f   : > { %405 = vrot.lane.b32.xlu0 %v394_v28, %s1829_s22  ;;  %403 = vrot.lane.b32.xlu2 %v393_v27, %s1829_s22 }
  0x90   : > { %458 = vrot.lane.b32.xlu1 %v447_v26, %s1830_s23  ;;  %v657_v25 = vmul.f32 %v1794_v23, %v1949_v11  ;;  %v733_v26 = vld [vmem:[%s2190_s3] sm:$0xff] }
  0x92   : > { %v1752_v36 = vpop.permute.xlu0 %1751  ;;  %v1757_v50 = vpop.permute.xlu1 %1756 }
  0x93   : > { %v1754_v39 = vunpack.i.h.bf16 %v1752_v36  ;;  %v1753_v45 = vunpack.i.l.bf16 %v1752_v36  ;;  %v1759_v52 = vunpack.i.h.bf16 %v1757_v50  ;;  %v1758_v53 = vunpack.i.l.bf16 %v1757_v50  ;;  %v786_v50 = vld [vmem:[%s2191_s4 + $0x8] sm:$0xff] }
  0x95   : > { %v445_v42 = vmul.f32 %v1754_v39, %v1949_v11  ;;  %v444_v48 = vmul.f32 %v1753_v45, %v1949_v11  ;;  %v552_v55 = vmul.f32 %v1758_v53, %v1949_v11  ;;  %v553_v56 = vmul.f32 %v1759_v52, %v1949_v11  ;;  %v734_v39 = vld [vmem:[%s2190_s3 + $0x8] sm:$0xff] }
  0x96   : > { %v814_v45 = vld [vmem:[%s2192_s5 + $0x8] sm:$0xff] }
  0x97   : > { %456 = vrot.lane.b32.xlu0 %v446_v35, %s1830_s23  ;;  %348 = vrot.lane.b32.xlu2 %v339_v34, %s1828_s21  ;;  %v788_v34 = vld [vmem:[%s2191_s4 + $0x18] sm:$0xff] }
  0x98   : > { %509 = vrot.lane.b32.xlu1 %v499_v33, %s1831_s26 }
  0x9a   : > { %v1767_v51 = vpop.permute.xlu0 %1766  ;;  %v1772_v1 = vpop.permute.xlu1 %1771 }
  0x9b   : > { %v1769_v54 = vunpack.i.h.bf16 %v1767_v51  ;;  %v1768_v60 = vunpack.i.l.bf16 %v1767_v51  ;;  %v1774_v3 = vunpack.i.h.bf16 %v1772_v1  ;;  %v1773_v4 = vunpack.i.l.bf16 %v1772_v1 }
  0x9d   : > { %v606_v57 = vmul.f32 %v1769_v54, %v1949_v11  ;;  %v605_v63 = vmul.f32 %v1768_v60, %v1949_v11  ;;  %v550_v6 = vmul.f32 %v1773_v4, %v1949_v11  ;;  %v551_v7 = vmul.f32 %v1774_v3, %v1949_v11 }
  0x9f   : > { %401 = vrot.lane.b32.xlu0 %v392_v41, %s1829_s22  ;;  %399 = vrot.lane.b32.xlu2 %v391_v40, %s1829_s22  ;;  %v785_v40 = vld [vmem:[%s2191_s4] sm:$0xff] }
  0xa0   : > { %454 = vrot.lane.b32.xlu1 %v445_v42, %s1830_s23 }
  0xa2   : > { %v1782_v2 = vpop.permute.xlu0 %1781  ;;  %v1787_v17 = vpop.permute.xlu1 %1786 }
  0xa3   : > { %v1784_v5 = vunpack.i.h.bf16 %v1782_v2  ;;  %v1783_v12 = vunpack.i.l.bf16 %v1782_v2  ;;  %v1789_v18 = vunpack.i.h.bf16 %v1787_v17  ;;  %v1788_v19 = vunpack.i.l.bf16 %v1787_v17 }
  0xa5   : > { %v604_v8 = vmul.f32 %v1784_v5, %v1949_v11  ;;  %v603_v15 = vmul.f32 %v1783_v12, %v1949_v11  ;;  %v711_v20 = vmul.f32 %v1788_v19, %v1949_v11  ;;  %v712_v21 = vmul.f32 %v1789_v18, %v1949_v11 }
  0xa7   : > { %452 = vrot.lane.b32.xlu0 %v444_v48, %s1830_s23  ;;  %511 = vrot.lane.b32.xlu2 %v500_v47, %s1831_s26 }
  0xa8   : > { %505 = vrot.lane.b32.xlu1 %v497_v49, %s1831_s26  ;;  %v813_v49 = vld [vmem:[%s2192_s5] sm:$0xff] }
  0xaa   : > { %v1797_v27 = vpop.permute.xlu0 %1796  ;;  %v1802_v30 = vpop.permute.xlu1 %1801 }
  0xab   : > { %v1799_v28 = vunpack.i.h.bf16 %v1797_v27  ;;  %v1798_v29 = vunpack.i.l.bf16 %v1797_v27  ;;  %v1803_v31 = vunpack.i.l.bf16 %v1802_v30  ;;  %v1804_v48 = vunpack.i.h.bf16 %v1802_v30 }
  0xad   : > { %v709_v32 = vmul.f32 %v1798_v29, %v1949_v11  ;;  %v710_v33 = vmul.f32 %v1799_v28, %v1949_v11  ;;  %v307_v35 = vmul.f32 %v1803_v31, %v1949_v11  ;;  %v308_v51 = vmul.f32 %v1804_v48, %v1949_v11 }
  0xaf   : > { %564 = vrot.lane.b32.xlu0 %v553_v56, %s1832_s27  ;;  %562 = vrot.lane.b32.xlu2 %v552_v55, %s1832_s27 }
  0xb0   : > { %617 = vrot.lane.b32.xlu1 %v606_v57, %s1833_s28 }
  0xb2   : > { %v1807_v47 = vpop.permute.xlu1 %1806 }
  0xb3   : > { %v1808_v10 = vunpack.i.l.bf16 %v1807_v47  ;;  %v1809_v18 = vunpack.i.h.bf16 %v1807_v47 }
  0xb5   : > { %v305_v12 = vmul.f32 %v1808_v10, %v1949_v11 }
  0xb7   : > { %615 = vrot.lane.b32.xlu0 %v605_v63, %s1833_s28  ;;  %507 = vrot.lane.b32.xlu2 %v498_v62, %s1831_s26 }
  0xb8   : > { %668 = vrot.lane.b32.xlu1 %v658_v0, %s1834_s29 }
  0xbf   : > { %560 = vrot.lane.b32.xlu0 %v551_v7, %s1832_s27  ;;  %558 = vrot.lane.b32.xlu2 %v550_v6, %s1832_s27 }
  0xc0   : > { %613 = vrot.lane.b32.xlu1 %v604_v8, %s1833_s28 }
  0xc7   : > { %611 = vrot.lane.b32.xlu0 %v603_v15, %s1833_s28  ;;  %670 = vrot.lane.b32.xlu2 %v659_v14, %s1834_s29 }
  0xc8   : > { %664 = vrot.lane.b32.xlu1 %v656_v16, %s1834_s29 }
  0xcf   : > { %723 = vrot.lane.b32.xlu0 %v712_v21, %s1835_s9  ;;  %721 = vrot.lane.b32.xlu2 %v711_v20, %s1835_s9 }
  0xd0   : > { %754 = vperm.xlu1 %1728, %v736_v22  }
  0xd7   : > { %749 = vperm.xlu0 %1717, %v735_v24   ;;  %666 = vrot.lane.b32.xlu2 %v657_v25, %s1834_s29  ;;  %v306_v25 = vmul.f32 %v1809_v18, %v1949_v11 }
  0xd8   : > { %739 = vperm.xlu1 %1728, %v733_v26  }
  0xdf   : > { %719 = vrot.lane.b32.xlu0 %v710_v33, %s1835_s9  ;;  %717 = vrot.lane.b32.xlu2 %v709_v32, %s1835_s9 }
  0xe0   : > { %806 = vperm.xlu1 %1728, %v788_v34  }
  0xe1   : > { %v351_v36 = vpop.permute.xlu2 %350 }
  0xe2   : > { %v360_v37 = vadd.f32 %v351_v36, %v307_v35 }
  0xe7   : > { %801 = vperm.xlu0 %1717, %v787_v38   ;;  %744 = vperm.xlu2 %1739, %v734_v39  }
  0xe8   : > { %791 = vperm.xlu1 %1728, %v785_v40  }
  0xe9   : > { %v404_v41 = vpop.permute.xlu2 %403 }
  0xea   : > { %v413_v42 = vadd.f32 %v404_v41, %v360_v37 }
  0xef   : > { %834 = vperm.xlu0 %1717, %v816_v43   ;;  %829 = vperm.xlu2 %1739, %v815_v44  }
  0xf0   : > { %824 = vperm.xlu1 %1728, %v814_v45  }
  0xf1   : > { %v349_v46 = vpop.permute.xlu2 %348 }
  0xf2   : > { %v359_v29 = vadd.f32 %v349_v46, %v306_v25 }
  0xf7   : > { %819 = vperm.xlu0 %1717, %v813_v49   ;;  %796 = vperm.xlu2 %1739, %v786_v50  }
  0xf9   : > { %v353_v52 = vpop.permute.xlu0 %352  ;;  %v400_v53 = vpop.permute.xlu2 %399 }
  0xfa   : > { %v361_v54 = vadd.f32 %v353_v52, %v308_v51  ;;  %v347_v55 = vpop.permute.xlu1 %346 }
  0xfb   : > { %v358_v15 = vadd.f32 %v347_v55, %v305_v12 }
  0xfd   : > { %v411_v20 = vadd.f32 %v400_v53, %v358_v15 }
 0x101   : > { %v406_v56 = vpop.permute.xlu0 %405  ;;  %v512_v57 = vpop.permute.xlu2 %511 }
 0x102   : > { %v414_v58 = vadd.f32 %v406_v56, %v361_v54  ;;  %v459_v59 = vpop.permute.xlu1 %458 }
 0x104   : > { %v467_v16 = vadd.f32 %v459_v59, %v414_v58 }
 0x106   : > { %v520_v21 = vadd.f32 %v512_v57, %v467_v16 }
 0x109   : > { %v457_v60 = vpop.permute.xlu0 %456  ;;  %v563_v61 = vpop.permute.xlu2 %562 }
 0x10a   : > { %v510_v62 = vpop.permute.xlu1 %509  ;;  %v466_v19 = vadd.f32 %v457_v60, %v413_v42 }
 0x10c   : > { %v519_v26 = vadd.f32 %v510_v62, %v466_v19 }
 0x10e   : > { %v572_v33 = vadd.f32 %v563_v61, %v519_v26 }
 0x111   : > { %v402_v63 = vpop.permute.xlu0 %401  ;;  %v508_v1 = vpop.permute.xlu2 %507 }
 0x112   : > { %v455_v0 = vpop.permute.xlu1 %454  ;;  %v412_v32 = vadd.f32 %v402_v63, %v359_v29 }
 0x114   : > { %v465_v38 = vadd.f32 %v455_v0, %v412_v32 }
 0x116   : > { %v518_v11 = vadd.f32 %v508_v1, %v465_v38 }
 0x119   : > { %v453_v2 = vpop.permute.xlu0 %452  ;;  %v559_v4 = vpop.permute.xlu2 %558 }
 0x11a   : > { %v506_v3 = vpop.permute.xlu1 %505  ;;  %v464_v22 = vadd.f32 %v453_v2, %v411_v20 }
 0x11c   : > { %v517_v30 = vadd.f32 %v506_v3, %v464_v22 }
 0x11e   : > { %v570_v35 = vadd.f32 %v559_v4, %v517_v30 }
 0x121   : > { %v565_v5 = vpop.permute.xlu0 %564  ;;  %v671_v7 = vpop.permute.xlu2 %670 }
 0x122   : > { %v618_v6 = vpop.permute.xlu1 %617  ;;  %v573_v23 = vadd.f32 %v565_v5, %v520_v21 }
 0x124   : > { %v626_v31 = vadd.f32 %v618_v6, %v573_v23 }
 0x126   : > { %v679_v36 = vadd.f32 %v671_v7, %v626_v31 }
 0x129   : > { %v616_v8 = vpop.permute.xlu0 %615  ;;  %v722_v13 = vpop.permute.xlu2 %721 }
 0x12a   : > { %v669_v9 = vpop.permute.xlu1 %668  ;;  %v625_v34 = vadd.f32 %v616_v8, %v572_v33 }
 0x12c   : > { %v678_v42 = vadd.f32 %v669_v9, %v625_v34 }
 0x12e   : > { %v731_v46 = vadd.f32 %v722_v13, %v678_v42 }
 0x131   : > { %v561_v14 = vpop.permute.xlu0 %560  ;;  %v667_v28 = vpop.permute.xlu2 %666 }
 0x132   : > { %v614_v17 = vpop.permute.xlu1 %613  ;;  %v571_v48 = vadd.f32 %v561_v14, %v518_v11  ;;  %v1810_v14 = vld [vmem:[%s2188_s1] ss:$0 sm:$0xff] }
 0x134   : > { %v624_v54 = vadd.f32 %v614_v17, %v571_v48 }
 0x136   : > { %v677_v60 = vadd.f32 %v667_v28, %v624_v54 }
 0x139   : > { %v612_v24 = vpop.permute.xlu0 %611  ;;  %v718_v44 = vpop.permute.xlu2 %717 }
 0x13a   : > { %v665_v27 = vpop.permute.xlu1 %664  ;;  %v623_v39 = vadd.f32 %v612_v24, %v570_v35 }
 0x13c   : > { %v676_v45 = vadd.f32 %v665_v27, %v623_v39 }
 0x13e   : > { %v729_v52 = vadd.f32 %v718_v44, %v676_v45 }
 0x141   : > { %v724_v37 = vpop.permute.xlu0 %723  ;;  %v745_v58 = vpop.permute.xlu2 %744 }
 0x142   : > { %v732_v40 = vadd.f32 %v724_v37, %v679_v36  ;;  %v755_v41 = vpop.permute.xlu1 %754 }
 0x144   : > { %v760_v43 = vadd.f32 %v755_v41, %v732_v40 }
 0x146   : > { %v768_v47 = vmin.f32 %v760_v43, 0.0  ;;  %vm764_vm1 = vcmp.gt.f32.partialorder %v760_v43, 0.0 }
 0x148   : > { %v775_v53 = vmul.f32 1.442695, %v768_v47 }
 0x149   : > { %v750_v49 = vpop.permute.xlu0 %749  ;;  %v830_v7 = vpop.permute.xlu2 %829 }
 0x14a   : > { %v759_v50 = vadd.f32 %v750_v49, %v731_v46  ;;  %v740_v51 = vpop.permute.xlu1 %739  ;;  %1811 = vpow2.f32 %v775_v53 }
 0x14b   : > { %v757_v56 = vadd.f32 %v740_v51, %v729_v52 }
 0x14c   : > { %v767_v55 = vmin.f32 %v759_v50, 0.0  ;;  %vm763_vm0 = vcmp.gt.f32.partialorder %v759_v50, 0.0 }
 0x14d   : > { %v765_v59 = vmin.f32 %v757_v56, 0.0  ;;  %vm761_vm3 = vcmp.gt.f32.partialorder %v757_v56, 0.0 }
 0x14e   : > { %v773_v57 = vmul.f32 1.442695, %v767_v55 }
 0x14f   : > { %v769_v0 = vmul.f32 1.442695, %v765_v59 }
 0x150   : > { %1813 = vpow2.f32 %v773_v57  ;;  %v1812_v2 = vpop.eup %1811 }
 0x151   : > { %v720_v61 = vpop.permute.xlu0 %719  ;;  %1815 = vpow2.f32 %v769_v0  ;;  %v1454_v8 = vadd.f32 -1.0, %v1812_v2  ;;  %v797_v25 = vpop.permute.xlu2 %796  ;;  %v1593_v2 = vld [vmem:[%s2193_s6 + $0x18] sm:$0xff] }
 0x152   : > { %v730_v62 = vadd.f32 %v720_v61, %v677_v60  ;;  %v807_v63 = vpop.permute.xlu1 %806 }
 0x153   : > { %v784_v16 = vsel %vm764_vm1, %v760_v43, %v1454_v8  ;;  %v1590_v8 = vld [vmem:[%s2193_s6] sm:$0xff] }
 0x154   : > { %v758_v1 = vadd.f32 %v745_v58, %v730_v62  ;;  %v812_v19 = vmul.f32 %v807_v63, %v784_v16  ;;  %v1595_v16 = vld [vmem:[%s2193_s6 + $0x28] sm:$0xff] }
 0x156   : > { %v1814_v3 = vpop.eup %1813  ;;  %v766_v4 = vmin.f32 %v758_v1, 0.0  ;;  %vm762_vm2 = vcmp.gt.f32.partialorder %v758_v1, 0.0 }
 0x157   : > { %v1453_v5 = vadd.f32 -1.0, %v1814_v3  ;;  %v1816_v17 = vpop.eup %1815  ;;  %v1592_v3 = vld [vmem:[%s2193_s6 + $0x10] sm:$0xff] }
 0x158   : > { %v771_v6 = vmul.f32 1.442695, %v766_v4  ;;  %v1451_v22 = vadd.f32 -1.0, %v1816_v17 }
 0x159   : > { %v802_v9 = vpop.permute.xlu0 %801  ;;  %v783_v10 = vsel %vm763_vm0, %v759_v50, %v1453_v5 }
 0x15a   : > { %1817 = vpow2.f32 %v771_v6  ;;  %v811_v12 = vmul.f32 %v802_v9, %v783_v10  ;;  %v792_v13 = vpop.permute.xlu1 %791  ;;  %v781_v30 = vsel %vm761_vm3, %v757_v56, %v1451_v22  ;;  %v1594_v6 = vld [vmem:[%s2193_s6 + $0x20] sm:$0xff] }
 0x15b   : > { %v809_v35 = vmul.f32 %v792_v13, %v781_v30  ;;  %v1598_v9 = vld [vmem:[%s2193_s6 + $0x40] sm:$0xff]  ;;  %v1596_v13 = vld [vmem:[%s2193_s6 + $0x30] sm:$0xff] }
 0x15c   : > { %v2058_v15 = vadd.f32 %v830_v7, %v811_v12  ;;  %v1604_v30 = vld [vmem:[%s2193_s6 + $0x70] sm:$0xff] }
 0x15e   : > { %v847_v20 = vmul.f32 %v1810_v14, %v2058_v15 }
 0x160   : > { %v1818_v18 = vpop.eup %1817  ;;  %v851_v28 = vpack.c.bf16 %v847_v20, %v847_v20  ;;  %v1591_v20 = vld [vmem:[%s2193_s6 + $0x8] sm:$0xff] }
 0x161   : > { %v1452_v21 = vadd.f32 -1.0, %v1818_v18  ;;  %v835_v23 = vpop.permute.xlu0 %834 }
 0x162   : > { %v2061_v24 = vadd.f32 %v835_v23, %v812_v19  ;;  %v825_v31 = vpop.permute.xlu1 %824  ;;  %v859_v34 = vunpack.c.l.b16 %v851_v28  ;;  %v1597_v23 = vld [vmem:[%s2193_s6 + $0x38] sm:$0xff] }
 0x163   : > { %v782_v26 = vsel %vm762_vm2, %v758_v1, %v1452_v21  ;;  %v1599_v21 = vld [vmem:[%s2193_s6 + $0x48] sm:$0xff] }
 0x164   : > { %v810_v27 = vmul.f32 %v797_v25, %v782_v26  ;;  %v848_v29 = vmul.f32 %v1810_v14, %v2061_v24  ;;  %v1602_v25 = vld [vmem:[%s2193_s6 + $0x60] sm:$0xff] }
 0x166   : > { %v852_v32 = vpack.c.bf16 %v848_v29, %v848_v29  ;;  %v2064_v33 = vadd.f32 %v825_v31, %v810_v27  ;;  %v1600_v27 = vld [vmem:[%s2193_s6 + $0x50] sm:$0xff]  ;;  %v1606_v29 = vld [vmem:[%s2193_s6 + $0x80] sm:$0xff]  ;;  %v1603_v31 = vld [vmem:[%s2193_s6 + $0x68] sm:$0xff] }
 0x168   : > { %v860_v36 = vunpack.c.l.b16 %v852_v32  ;;  %v846_v37 = vmul.f32 %v1810_v14, %v2064_v33  ;;  %v1601_v32 = vld [vmem:[%s2193_s6 + $0x58] sm:$0xff] }
 0x169   : > { %v820_v38 = vpop.permute.xlu0 %819 }
 0x16a   : > { %v2067_v39 = vadd.f32 %v820_v38, %v809_v35  ;;  %v862_v40 = vpack.c.b16 %v860_v36, %v859_v34  ;;  %v850_v41 = vpack.c.bf16 %v846_v37, %v846_v37  ;;  %v1607_v34 = vld [vmem:[%s2193_s6 + $0x88] sm:$0xff]  ;;  %v1605_v35 = vld [vmem:[%s2193_s6 + $0x78] sm:$0xff] }
 0x16c   : > { %v845_v42 = vmul.f32 %v1810_v14, %v2067_v39  ;;  %865 = vrot.lane.b32.xlu2 %v862_v40, %s1836_s30  ;;  %v858_v44 = vunpack.c.l.b16 %v850_v41 }
 0x16e   : > { %v849_v43 = vpack.c.bf16 %v845_v42, %v845_v42 }
 0x170   : > { %v857_v11 = vunpack.c.l.b16 %v849_v43 }
 0x172   : > { %v861_v45 = vpack.c.b16 %v858_v44, %v857_v11 }
 0x174   : > { %863 = vrot.lane.b32.xlu0 %v861_v45, %s1836_s30 }
 0x1c6   : > { %v866_v47 = vpop.permute.xlu2 %865 }
 0x1c7   : > { %v872_v48 = vsel %vm867_vm4, 0, %v866_v47 }
 0x1c8   : > { %v875_v46 = vsel %vm873_vm5, %v872_v48, 0 }
 0x1c9   : > { %v880_v49 = vunpack.c.l.b16 %v875_v46  ;;  %v881_v50 = vunpack.c.h.b16 %v875_v46 }
 0x1cb   : > { %v884_v51 = vpack.c.b16 %v880_v49, %v880_v49  ;;  %v885_v52 = vpack.c.b16 %v881_v50, %v881_v50 }
 0x1cd   : > { %893 = vst.msk [vmem:[#allocation2 + $0x8] sm:$0xf] %vm890_vm6, %v884_v51 }
 0x1ce   : > { %894 = vst.msk [vmem:[#allocation2 + $0xc] sm:$0xf] %vm890_vm6, %v885_v52 }
 0x1d5   : > { %v1589_v53 = vld [vmem:[#allocation2 + $0x8] sm:$0xff] }
 0x1d6   : > { %930 = vrot.lane.b32.xlu1 %v1589_v53, %s1828_s21  ;;  %1014 = vrot.lane.b32.xlu0 %v1589_v53, %s1829_s22 }
 0x1de   : > { %1064 = vrot.lane.b32.xlu1 %v1589_v53, %s1830_s23 }
 0x1e6   : > { %v864_v54 = vpop.permute.xlu0 %863  ;;  %1114 = vrot.lane.b32.xlu1 %v1589_v53, %s1831_s26 }
 0x1e7   : > { %v870_v55 = vsel %vm867_vm4, 0, %v864_v54 }
 0x1e8   : > { %v874_v56 = vsel %vm873_vm5, %v870_v55, 0 }
 0x1e9   : > { %v878_v57 = vunpack.c.l.b16 %v874_v56  ;;  %v879_v58 = vunpack.c.h.b16 %v874_v56 }
 0x1eb   : > { %v882_v59 = vpack.c.b16 %v878_v57, %v878_v57  ;;  %v883_v60 = vpack.c.b16 %v879_v58, %v879_v58 }
 0x1ed   : > { %891 = vst.msk [vmem:[#allocation2] sm:$0xf] %vm890_vm6, %v882_v59 }
 0x1ee   : > { %892 = vst.msk [vmem:[#allocation2 + $0x4] sm:$0xf] %vm890_vm6, %v883_v60  ;;  %1264 = vrot.lane.b32.xlu1 %v1589_v53, %s1834_s29 }
 0x1f5   : > { %v1588_v61 = vld [vmem:[#allocation2] sm:$0xff] }
 0x1f6   : > { %1262 = vrot.lane.b32.xlu1 %v1588_v61, %s1834_s29  ;;  %1062 = vrot.lane.b32.xlu0 %v1588_v61, %s1830_s23 }
 0x1f7   : > { %928 = vrot.lane.b32.xlu2 %v1588_v61, %s1828_s21 }
 0x1fe   : > { %1312 = vrot.lane.b32.xlu1 %v1588_v61, %s1835_s9  ;;  %1214 = vrot.lane.b32.xlu0 %v1589_v53, %s1833_s28 }
 0x1ff   : > { %1012 = vrot.lane.b32.xlu2 %v1588_v61, %s1829_s22 }
 0x206   : > { %1212 = vrot.lane.b32.xlu0 %v1588_v61, %s1833_s28 }
 0x207   : > { %1112 = vrot.lane.b32.xlu2 %v1588_v61, %s1831_s26 }
 0x20e   : > { %1314 = vrot.lane.b32.xlu0 %v1589_v53, %s1835_s9 }
 0x20f   : > { %1164 = vrot.lane.b32.xlu2 %v1589_v53, %s1832_s27 }
 0x217   : > { %1162 = vrot.lane.b32.xlu2 %v1588_v61, %s1832_s27 }
 0x248   : > { %v931_v62 = vpop.permute.xlu1 %930  ;;  %v1015_v63 = vpop.permute.xlu0 %1014 }
 0x249   : > { %947 = vmatpush.bf16.msra.mxu0 %v931_v62  ;;  %1697 = vmatpush.bf16.msra.mxu1 %v931_v62 }
 0x24a   : > { %1030 = vmatpush.bf16.msra.mxu2 %v1015_v63 }
 0x250   : > { %v1065_v0 = vpop.permute.xlu1 %1064 }
 0x251   : > { %v929_v1 = vpop.permute.xlu2 %928  ;;  %1080 = vmatpush.bf16.msra.mxu3 %v1065_v0 }
 0x252   : > { %948 = vmatpush.bf16.msra.mxu0 %v929_v1  ;;  %1698 = vmatpush.bf16.msra.mxu1 %v929_v1 }
 0x255   : > { %1476 = vmatmul.msk.bf16.vlgmr.msra.gmra.mxu1 %vm934_vm7, %v1593_v2  ;;  %1475 = vmatmul.msk.bf16.vlgmr.msra.gmra.mxu0 %vm934_vm7, %v1592_v3 }
 0x256   : > { %984 = vmatpush.bf16.msrb.mxu1 %v1589_v53 }
 0x258   : > { %v1115_v4 = vpop.permute.xlu1 %1114 }
 0x259   : > { %v1013_v5 = vpop.permute.xlu2 %1012  ;;  %1130 = vmatpush.bf16.msrb.mxu0 %v1115_v4 }
 0x25a   : > { %985 = vmatpush.bf16.msrb.mxu1 %v1588_v61  ;;  %1031 = vmatpush.bf16.msra.mxu2 %v1013_v5 }
 0x25d   : > { %1499 = vmatmul.msk.bf16.vlgmr.msra.gmra.mxu2 %vm934_vm7, %v1594_v6 }
 0x260   : > { %v1265_v10 = vpop.permute.xlu1 %1264 }
 0x261   : > { %v1113_v7 = vpop.permute.xlu2 %1112 }
 0x262   : > { %1131 = vmatpush.bf16.msrb.mxu0 %v1113_v7 }
 0x265   : > { %1485 = vmatmul.msk.bf16.vlgmr.msrb.gmra.mxu1 %vm934_vm7, %v1590_v8  ;;  %1527 = vmatmul.msk.bf16.vlgmr.msrb.gmra.mxu0 %vm934_vm7, %v1598_v9 }
 0x268   : > { %v1063_v12 = vpop.permute.xlu0 %1062  ;;  %v1263_v17 = vpop.permute.xlu1 %1262 }
 0x269   : > { %v1165_v14 = vpop.permute.xlu2 %1164  ;;  %1081 = vmatpush.bf16.msra.mxu3 %v1063_v12 }
 0x26a   : > { %1180 = vmatpush.bf16.msra.mxu1 %v1165_v14 }
 0x26c   : > { %1513 = vmatmul.msk.bf16.vlgmr.msra.gmra.mxu3 %vm934_vm7, %v1596_v13 }
 0x26d   : > { %1280 = vmatpush.bf16.msrb.mxu3 %v1265_v10  ;;  %1500 = vmatmul.msk.bf16.gmra.mxu2 %vm934_vm7, %v1595_v16 }
 0x270   : > { %v1215_v18 = vpop.permute.xlu0 %1214  ;;  %v1313_v28 = vpop.permute.xlu1 %1312 }
 0x271   : > { %1281 = vmatpush.bf16.msrb.mxu3 %v1263_v17  ;;  %v1163_v19 = vpop.permute.xlu2 %1162  ;;  %1230 = vmatpush.bf16.msrb.mxu2 %v1215_v18 }
 0x272   : > { %1181 = vmatpush.bf16.msra.mxu1 %v1163_v19 }
 0x275   : > { %1486 = vmatmul.msk.bf16.gmra.mxu1 %vm934_vm7, %v1591_v20  ;;  %1528 = vmatmul.msk.bf16.gmra.mxu0 %vm934_vm7, %v1599_v21 }
 0x278   : > { %v1213_v22 = vpop.permute.xlu0 %1212 }
 0x279   : > { %1231 = vmatpush.bf16.msrb.mxu2 %v1213_v22 }
 0x27c   : > { %1514 = vmatmul.msk.bf16.gmra.mxu3 %vm934_vm7, %v1597_v23 }
 0x27d   : > { %1555 = vmatmul.msk.bf16.vlgmr.msrb.gmra.mxu2 %vm934_vm7, %v1602_v25 }
 0x280   : > { %v1315_v26 = vpop.permute.xlu0 %1314 }
 0x281   : > { %1330 = vmatpush.bf16.msra.mxu0 %v1315_v26 }
 0x285   : > { %1541 = vmatmul.msk.bf16.vlgmr.msra.gmra.mxu1 %vm934_vm7, %v1600_v27  ;;  %1331 = vmatpush.bf16.msra.mxu0 %v1313_v28 }
 0x288   : > { %1583 = vmatmul.msk.bf16.vlgmr.msra.gmra.mxu0 %vm934_vm7, %v1606_v29 }
 0x28c   : > { %1569 = vmatmul.msk.bf16.vlgmr.msrb.gmra.mxu3 %vm934_vm7, %v1604_v30 }
 0x28d   : > { %1556 = vmatmul.msk.bf16.gmra.mxu2 %vm934_vm7, %v1603_v31 }
 0x295   : > { %1542 = vmatmul.msk.bf16.gmra.mxu1 %vm934_vm7, %v1601_v32 }
 0x298   : > { %1584 = vmatmul.msk.bf16.gmra.mxu0 %vm934_vm7, %v1607_v34 }
 0x29c   : > { %1570 = vmatmul.msk.bf16.gmra.mxu3 %vm934_vm7, %v1605_v35 }
 0x2d2   : > { %v955_v36 = vpop.f32.mrf.mxu1  ;;  %v950_v37 = vpop.f32.mrf.mxu0 }
 0x2da   : > { %v957_v38 = vpop.f32.mrf.mxu1  ;;  %v952_v40 = vpop.f32.mrf.mxu0 }
 0x2e0   : > { %v1033_v41 = vpop.f32.mrf.mxu2 }
 0x2e2   : > { %v987_v42 = vpop.f32.mrf.mxu1  ;;  %v1133_v43 = vpop.f32.mrf.mxu0 }
 0x2e3   : > { %v988_v53 = vadd.f32 %v987_v42, %v950_v37 }
 0x2e5   : > { %v1043_v56 = vadd.f32 %v1033_v41, %v988_v53 }
 0x2e8   : > { %v1035_v44 = vpop.f32.mrf.mxu2 }
 0x2ea   : > { %v989_v11 = vpop.f32.mrf.mxu1  ;;  %v1135_v45 = vpop.f32.mrf.mxu0 }
 0x2eb   : > { %v990_v60 = vadd.f32 %v989_v11, %v952_v40 }
 0x2ed   : > { %v1044_v63 = vadd.f32 %v1035_v44, %v990_v60 }
 0x2ef   : > { %v1083_v47 = vpop.f32.mrf.mxu3 }
 0x2f0   : > { %v1038_v48 = vpop.f32.mrf.mxu2  ;;  %v1093_v58 = vadd.f32 %v1083_v47, %v1043_v56 }
 0x2f2   : > { %v992_v46 = vpop.f32.mrf.mxu1  ;;  %v1138_v49 = vpop.f32.mrf.mxu0  ;;  %v1143_v62 = vadd.f32 %v1133_v43, %v1093_v58 }
 0x2f3   : > { %v993_v4 = vadd.f32 %v992_v46, %v955_v36 }
 0x2f5   : > { %v1045_v10 = vadd.f32 %v1038_v48, %v993_v4 }
 0x2f7   : > { %v1085_v50 = vpop.f32.mrf.mxu3 }
 0x2f8   : > { %v1040_v52 = vpop.f32.mrf.mxu2  ;;  %v1094_v3 = vadd.f32 %v1085_v50, %v1044_v63 }
 0x2fa   : > { %v994_v51 = vpop.f32.mrf.mxu1  ;;  %v1140_v55 = vpop.f32.mrf.mxu0  ;;  %v1144_v8 = vadd.f32 %v1135_v45, %v1094_v3 }
 0x2fb   : > { %v995_v19 = vadd.f32 %v994_v51, %v957_v38 }
 0x2ff   : > { %v1088_v54 = vpop.f32.mrf.mxu3 }
 0x300   : > { %v1233_v59 = vpop.f32.mrf.mxu2  ;;  %v1095_v14 = vadd.f32 %v1088_v54, %v1045_v10 }
 0x302   : > { %v1183_v57 = vpop.f32.mrf.mxu1  ;;  %v1145_v23 = vadd.f32 %v1138_v49, %v1095_v14 }
 0x303   : > { %v1193_v0 = vadd.f32 %v1183_v57, %v1143_v62 }
 0x305   : > { %v1333_v1 = vpop.f32.mrf.mxu0  ;;  %v1243_v5 = vadd.f32 %v1233_v59, %v1193_v0 }
 0x307   : > { %v1090_v61 = vpop.f32.mrf.mxu3 }
 0x308   : > { %v1235_v6 = vpop.f32.mrf.mxu2 }
 0x30a   : > { %v1185_v2 = vpop.f32.mrf.mxu1 }
 0x30b   : > { %v1194_v12 = vadd.f32 %v1185_v2, %v1144_v8 }
 0x30d   : > { %v1335_v17 = vpop.f32.mrf.mxu0  ;;  %v1244_v20 = vadd.f32 %v1235_v6, %v1194_v12 }
 0x30f   : > { %v1283_v7 = vpop.f32.mrf.mxu3 }
 0x310   : > { %v1293_v9 = vadd.f32 %v1283_v7, %v1243_v5  ;;  %v1238_v26 = vpop.f32.mrf.mxu2 }
 0x312   : > { %v1343_v13 = vadd.f32 %v1333_v1, %v1293_v9  ;;  %v1188_v18 = vpop.f32.mrf.mxu1 }
 0x313   : > { %v1195_v27 = vadd.f32 %v1188_v18, %v1145_v23 }
 0x314   : > { %v1347_v16 = vadd.f32 %v1343_v13, %v2067_v39  ;;  %v1046_v39 = vadd.f32 %v1040_v52, %v995_v19 }
 0x315   : > { %v1245_v31 = vadd.f32 %v1238_v26, %v1195_v27  ;;  %v1338_v34 = vpop.f32.mrf.mxu0 }
 0x316   : > { %v1351_v21 = vpack.c.bf16 %v1347_v16, %v1347_v16  ;;  %v1096_v29 = vadd.f32 %v1090_v61, %v1046_v39 }
 0x317   : > { %v1285_v22 = vpop.f32.mrf.mxu3 }
 0x318   : > { %1356 = vst.msk [vmem:[%s2171_s19] sm:$0xf] %vm1355_vm8, %v1351_v21  ;;  %v1294_v25 = vadd.f32 %v1285_v22, %v1244_v20  ;;  %v1146_v37 = vadd.f32 %v1140_v55, %v1096_v29  ;;  %v1240_v42 = vpop.f32.mrf.mxu2 }
 0x31a   : > { %v1344_v28 = vadd.f32 %v1335_v17, %v1294_v25  ;;  %v1190_v35 = vpop.f32.mrf.mxu1 }
 0x31b   : > { %v1196_v40 = vadd.f32 %v1190_v35, %v1146_v37 }
 0x31c   : > { %v1348_v30 = vadd.f32 %v1344_v28, %v2064_v33 }
 0x31d   : > { %v1246_v44 = vadd.f32 %v1240_v42, %v1196_v40  ;;  %v1340_v47 = vpop.f32.mrf.mxu0 }
 0x31e   : > { %v1352_v32 = vpack.c.bf16 %v1348_v30, %v1348_v30 }
 0x31f   : > { %v1288_v36 = vpop.f32.mrf.mxu3 }
 0x320   : > { %1357 = vst.msk [vmem:[%s2171_s19 + $0x4] sm:$0xf] %vm1355_vm8, %v1352_v32  ;;  %v1295_v38 = vadd.f32 %v1288_v36, %v1245_v31 }
 0x322   : > { %v1345_v41 = vadd.f32 %v1338_v34, %v1295_v38 }
 0x324   : > { %v1349_v43 = vadd.f32 %v1345_v41, %v2058_v15 }
 0x326   : > { %v1353_v11 = vpack.c.bf16 %v1349_v43, %v1349_v43 }
 0x327   : > { %v1290_v45 = vpop.f32.mrf.mxu3 }
 0x328   : > { %1358 = vst.msk [vmem:[%s2171_s19 + $0x8] sm:$0xf] %vm1355_vm8, %v1353_v11  ;;  %v1296_v33 = vadd.f32 %v1290_v45, %v1246_v44 }
 0x32a   : > { %v1346_v48 = vadd.f32 %v1340_v47, %v1296_v33 }
 0x32c   : > { %v1350_v46 = vadd.f32 %v1346_v48, %v2061_v24 }
 0x32e   : > { %v1354_v49 = vpack.c.bf16 %v1350_v46, %v1350_v46 }
 0x330   : > { %1359 = vst.msk [vmem:[%s2171_s19 + $0xc] sm:$0xf] %vm1355_vm8, %v1354_v49 }
 0x331 PF: > { %s17_s24 = sadd.s32 1, %s1825_s24  }
 0x332   : > { %p14_p4 = scmp.ge.s32.totalorder %s17_s24, 4  }
 0x334   :  { %16 = sbr.rel (!%p14_p4) target bundleno = 1 (0x1), region = 94 }

// kernel: decoder_forward.6
= control target key start
LH: loop header
LB: loop body
LE: loop exit
PB: predicated region body
PF: predicated region fallthrough
CT: control target
= control target key end

     0   :  { %s2388_s21 = smov 0   ;;  %s2756_s0 = inlined_call_operand.vmem [shape: bf16[2,32,102], index: 0, kind: input, shape index: {}]   ;;  %s2757_s1 = inlined_call_operand.vmem [shape: f32[1,80], index: 1, kind: input, shape index: {}]   ;;  %s2758_s2 = inlined_call_operand.vmem [shape: bf16[9,32,32], index: 2, kind: input, shape index: {}]   ;;  %s2759_s3 = inlined_call_operand.vmem [shape: f32[32,1], index: 3, kind: input, shape index: {}]   ;;  %s2760_s4 = inlined_call_operand.vmem [shape: bf16[9,32,32], index: 4, kind: input, shape index: {}]   ;;  %s2761_s5 = inlined_call_operand.vmem [shape: bf16[9,32,32], index: 5, kind: input, shape index: {}]   ;;  %s2762_s6 = inlined_call_operand.vmem [shape: bf16[2,32,80], index: 6, kind: output, shape index: {}]  }
   0x1 LB: > { %s1835_s22 = sadd.s32 4294967295, %s2341_s21   ;;  %p1839_p0 = scmp.ge.s32.totalorder %s2341_s21, 1  ;;  %s2341_s21 = sphi %s2388_s21, %s16_s21  }
   0x2   : > { %p212_p1 = scmp.lt.s32.totalorder %s2341_s21, 3 }
   0x4   : > { %p213_p2 = pnand %p1839_p0, %p212_p1 }
   0x5   : > { %p242_p3 = scmp.lt.s32.totalorder (!%p213_p2), %s1835_s22, 1  ;;  %s2343_s27 = smov (!%p213_p2), 126  }
   0x6   : > { %216 = sbr.rel (%p213_p2) target bundleno = 1291 (0x50b), region = 44  ;;  %s2344_s28 = smov (!%p213_p2), 127  }
   0x7   : > { %s2345_s29 = smov (!%p213_p2), 118   ;;  %s2346_s30 = smov (!%p213_p2), 117  }
   0x8   : > { %s2347_s7 = smov (!%p213_p2), 108   ;;  %s2348_s8 = smov (!%p213_p2), 116  }
   0x9   : > { %s2349_s9 = smov (!%p213_p2), 107   ;;  %s2350_s10 = smov (!%p213_p2), 106  }
   0xa   : > { %s2352_s18 = smov (!%p213_p2), 11  }
   0xb   : > { %s2764_s22 = smov (!%p242_p3, %s1835_s22), 1  ;;  %v2244_v2 = vld [vmem:[%s2758_s2] sm:$0xff]  ;;  %vm292_vm0 = vcmask 261120   ;;  %v2245_v4 = vld [vmem:[%s2758_s2 + $0x8] sm:$0xff]  ;;  %v2246_v13 = vld [vmem:[%s2758_s2 + $0x10] sm:$0xff]  ;;  %v2351_v24 = vmov 0  }
   0xc   : > { %s2240_s23 = sshll.u32 %s2764_s22, 4  ;;  %v2248_v9 = vld [vmem:[%s2758_s2 + $0x20] sm:$0xff]  ;;  %v2247_v14 = vld [vmem:[%s2758_s2 + $0x18] sm:$0xff]  ;;  %v2249_v18 = vld [vmem:[%s2758_s2 + $0x28] sm:$0xff]  ;;  %2322 = vset.pattern.permute.xlu1 %v2351_v24  ;;  %2324 = vset.pattern.permute.xlu0 %v2351_v24  ;;  %vm783_vm5 = vcmask 89088   ;;  %vm789_vm6 = vcmask 744448  }
   0xd   : > { %s246_s26 = scalar_lea.vmem %s2756_s0, %s2240_s23  ;;  %v2252_v20 = vld [vmem:[%s2758_s2 + $0x40] sm:$0xff]  ;;  %v2250_v22 = vld [vmem:[%s2758_s2 + $0x30] sm:$0xff]  ;;  %2323 = vset.pattern.permute.xlu2 %v2351_v24  ;;  %v2253_v29 = vld [vmem:[%s2758_s2 + $0x48] sm:$0xff]  ;;  %vm806_vm7 = vcmask 830464   ;;  %s2740_s16 = scalar_lea.vmem %s2762_s6, %s2240_s23  ;;  %vm1775_vm8 = vcmask 650240  }
   0xe   : > { %v2243_v0 = vld [vmem:[%s246_s26 + $0x8] sm:$0xff]  ;;  %v2242_v1 = vld [vmem:[%s246_s26] sm:$0xff]  ;;  %v707_v23 = vld [vmem:[%s2759_s3 + $0x10] sm:$0xff] }
   0xf   : > { %372 = vrot.lane.b32.xlu1 %v2243_v0, %s2343_s27  ;;  %288 = vrot.lane.b32.xlu0 %v2243_v0, %s2344_s28  ;;  %v2254_v26 = vld [vmem:[%s2758_s2 + $0x50] sm:$0xff]  ;;  %v2256_v28 = vld [vmem:[%s2758_s2 + $0x60] sm:$0xff] }
  0x10   : > { %370 = vrot.lane.b32.xlu2 %v2242_v1, %s2343_s27  ;;  %342 = vmatpush.bf16.msra.mxu1 %v2243_v0  ;;  %v2251_v31 = vld [vmem:[%s2758_s2 + $0x38] sm:$0xff]  ;;  %v706_v32 = vld [vmem:[%s2759_s3 + $0x8] sm:$0xff]  ;;  %v705_v33 = vld [vmem:[%s2759_s3] sm:$0xff] }
  0x11   : > { %v2255_v34 = vld [vmem:[%s2758_s2 + $0x58] sm:$0xff]  ;;  %v2257_v35 = vld [vmem:[%s2758_s2 + $0x68] sm:$0xff]  ;;  %v2260_v36 = vld [vmem:[%s2758_s2 + $0x80] sm:$0xff] }
  0x12   : > { %v2258_v37 = vld [vmem:[%s2758_s2 + $0x70] sm:$0xff]  ;;  %v708_v38 = vld [vmem:[%s2759_s3 + $0x18] sm:$0xff]  ;;  %v2261_v39 = vld [vmem:[%s2758_s2 + $0x88] sm:$0xff] }
  0x13   : > { %v2259_v40 = vld [vmem:[%s2758_s2 + $0x78] sm:$0xff] }
  0x14   : > { %343 = vmatpush.bf16.msra.mxu1 %v2242_v1 }
  0x17   : > { %286 = vrot.lane.b32.xlu0 %v2242_v1, %s2344_s28  ;;  %422 = vrot.lane.b32.xlu1 %v2243_v0, %s2345_s29 }
  0x18   : > { %420 = vrot.lane.b32.xlu2 %v2242_v1, %s2345_s29  ;;  %1874 = vmatmul.msk.bf16.vlgmr.msra.gmra.mxu1 %vm292_vm0, %v2244_v2 }
  0x1f   : > { %470 = vrot.lane.b32.xlu1 %v2242_v1, %s2346_s30  ;;  %472 = vrot.lane.b32.xlu0 %v2243_v0, %s2346_s30 }
  0x20   : > { %572 = vrot.lane.b32.xlu2 %v2243_v0, %s2347_s7 }
  0x27   : > { %522 = vrot.lane.b32.xlu1 %v2243_v0, %s2348_s8  ;;  %622 = vrot.lane.b32.xlu0 %v2243_v0, %s2349_s9 }
  0x28   : > { %570 = vrot.lane.b32.xlu2 %v2242_v1, %s2347_s7  ;;  %1875 = vmatmul.msk.bf16.gmra.mxu1 %vm292_vm0, %v2245_v4 }
  0x2f   : > { %520 = vrot.lane.b32.xlu1 %v2242_v1, %s2348_s8  ;;  %620 = vrot.lane.b32.xlu0 %v2242_v1, %s2349_s9 }
  0x30   : > { %672 = vrot.lane.b32.xlu2 %v2243_v0, %s2350_s10 }
  0x37   : > { %670 = vrot.lane.b32.xlu0 %v2242_v1, %s2350_s10  ;;  %721 = vperm.xlu1 %2322, %v707_v23  }
  0x38   : > { %726 = vperm.xlu2 %2323, %v708_v38  }
  0x3f   : > { %716 = vperm.xlu1 %2322, %v706_v32   ;;  %711 = vperm.xlu0 %2324, %v705_v33  }
  0x6a   : > { %v371_v3 = vpop.permute.xlu2 %370 }
  0x72   : > { %v421_v5 = vpop.permute.xlu2 %420 }
  0x7a   : > { %v573_v6 = vpop.permute.xlu2 %572 }
  0x81   : > { %v373_v7 = vpop.permute.xlu1 %372  ;;  %v289_v8 = vpop.permute.xlu0 %288 }
  0x82   : > { %305 = vmatpush.bf16.msra.mxu0 %v289_v8  ;;  %2302 = vmatpush.bf16.msra.mxu3 %v289_v8  ;;  %v571_v10 = vpop.permute.xlu2 %570 }
  0x83   : > { %388 = vmatpush.bf16.msra.mxu2 %v373_v7 }
  0x87   : > { %389 = vmatpush.bf16.msra.mxu2 %v371_v3 }
  0x89   : > { %v287_v11 = vpop.permute.xlu0 %286  ;;  %v423_v12 = vpop.permute.xlu1 %422 }
  0x8a   : > { %1888 = vmatmul.msk.bf16.vlgmr.msra.gmra.mxu2 %vm292_vm0, %v2248_v9  ;;  %306 = vmatpush.bf16.msra.mxu0 %v287_v11  ;;  %v673_v17 = vpop.permute.xlu2 %672 }
  0x8b   : > { %588 = vmatpush.bf16.msrb.mxu2 %v573_v6  ;;  %2303 = vmatpush.bf16.msra.mxu3 %v287_v11 }
  0x8d   : > { %1864 = vmatmul.msk.bf16.vlgmr.msra.gmra.mxu0 %vm292_vm0, %v2246_v13 }
  0x8e   : > { %1865 = vmatmul.msk.bf16.vlgmr.msra.gmra.mxu3 %vm292_vm0, %v2247_v14 }
  0x8f   : > { %438 = vmatpush.bf16.msrb.mxu3 %v423_v12  ;;  %589 = vmatpush.bf16.msrb.mxu2 %v571_v10 }
  0x91   : > { %v471_v15 = vpop.permute.xlu1 %470  ;;  %v473_v16 = vpop.permute.xlu0 %472 }
  0x92   : > { %488 = vmatpush.bf16.msrb.mxu0 %v473_v16 }
  0x93   : > { %439 = vmatpush.bf16.msrb.mxu3 %v421_v5 }
  0x95   : > { %v345_v42 = vpop.f32.mrf.mxu1 }
  0x96   : > { %489 = vmatpush.bf16.msrb.mxu0 %v471_v15 }
  0x99   : > { %v523_v19 = vpop.permute.xlu1 %522  ;;  %v623_v21 = vpop.permute.xlu0 %622 }
  0x9a   : > { %688 = vmatpush.bf16.msra.mxu0 %v673_v17  ;;  %1889 = vmatmul.msk.bf16.gmra.mxu2 %vm292_vm0, %v2249_v18 }
  0x9b   : > { %538 = vmatpush.bf16.msrb.mxu1 %v523_v19  ;;  %638 = vmatpush.bf16.msra.mxu3 %v623_v21 }
  0x9d   : > { %1916 = vmatmul.msk.bf16.vlgmr.msrb.gmra.mxu0 %vm292_vm0, %v2252_v20  ;;  %v347_v46 = vpop.f32.mrf.mxu1 }
  0x9e   : > { %1902 = vmatmul.msk.bf16.vlgmr.msrb.gmra.mxu3 %vm292_vm0, %v2250_v22 }
  0xa1   : > { %v521_v25 = vpop.permute.xlu1 %520  ;;  %v621_v27 = vpop.permute.xlu0 %620 }
  0xa2   : > { %539 = vmatpush.bf16.msrb.mxu1 %v521_v25  ;;  %639 = vmatpush.bf16.msra.mxu3 %v621_v27 }
  0xa5   : > { %1930 = vmatmul.msk.bf16.vlgmr.msrb.gmra.mxu1 %vm292_vm0, %v2254_v26  ;;  %v350_v52 = vpop.f32.mrf.mxu1 }
  0xa9   : > { %v671_v30 = vpop.permute.xlu0 %670  ;;  %v722_v15 = vpop.permute.xlu1 %721 }
  0xaa   : > { %1944 = vmatmul.msk.bf16.vlgmr.msrb.gmra.mxu2 %vm292_vm0, %v2256_v28  ;;  %689 = vmatpush.bf16.msra.mxu0 %v671_v30 }
  0xad   : > { %1917 = vmatmul.msk.bf16.gmra.mxu0 %vm292_vm0, %v2253_v29  ;;  %v352_v56 = vpop.f32.mrf.mxu1 }
  0xae   : > { %1903 = vmatmul.msk.bf16.gmra.mxu3 %vm292_vm0, %v2251_v31 }
  0xb1   : > { %v712_v16 = vpop.permute.xlu0 %711 }
  0xb5   : > { %1931 = vmatmul.msk.bf16.gmra.mxu1 %vm292_vm0, %v2255_v34  ;;  %v717_v34 = vpop.permute.xlu1 %716 }
  0xba   : > { %1945 = vmatmul.msk.bf16.gmra.mxu2 %vm292_vm0, %v2257_v35 }
  0xbd   : > { %1972 = vmatmul.msk.bf16.vlgmr.msra.gmra.mxu0 %vm292_vm0, %v2260_v36 }
  0xbe   : > { %1958 = vmatmul.msk.bf16.vlgmr.msra.gmra.mxu3 %vm292_vm0, %v2258_v37 }
  0xcd   : > { %1973 = vmatmul.msk.bf16.gmra.mxu0 %vm292_vm0, %v2261_v39 }
  0xce   : > { %1959 = vmatmul.msk.bf16.gmra.mxu3 %vm292_vm0, %v2259_v40 }
 0x10a   : > { %v308_v41 = vpop.f32.mrf.mxu0 }
 0x10b   : > { %v346_v58 = vadd.f32 %v345_v42, %v308_v41 }
 0x10d   : > { %v391_v43 = vpop.f32.mrf.mxu2 }
 0x10e   : > { %v401_v61 = vadd.f32 %v391_v43, %v346_v58 }
 0x111   : > { %v313_v44 = vpop.f32.mrf.mxu3 }
 0x112   : > { %v310_v45 = vpop.f32.mrf.mxu0  ;;  %v351_v12 = vadd.f32 %v350_v52, %v313_v44 }
 0x113   : > { %v348_v1 = vadd.f32 %v347_v46, %v310_v45 }
 0x115   : > { %v393_v47 = vpop.f32.mrf.mxu2 }
 0x116   : > { %v402_v4 = vadd.f32 %v393_v47, %v348_v1 }
 0x119   : > { %v315_v48 = vpop.f32.mrf.mxu3 }
 0x11a   : > { %v491_v49 = vpop.f32.mrf.mxu0  ;;  %v353_v27 = vadd.f32 %v352_v56, %v315_v48 }
 0x11d   : > { %v396_v53 = vpop.f32.mrf.mxu2 }
 0x11e   : > { %v403_v17 = vadd.f32 %v396_v53, %v351_v12 }
 0x121   : > { %v441_v50 = vpop.f32.mrf.mxu3 }
 0x122   : > { %v493_v51 = vpop.f32.mrf.mxu0  ;;  %v541_v62 = vpop.f32.mrf.mxu1  ;;  %v451_v63 = vadd.f32 %v441_v50, %v401_v61 }
 0x124   : > { %v501_v3 = vadd.f32 %v491_v49, %v451_v63  ;;  %v727_v63 = vpop.permute.xlu2 %726 }
 0x125   : > { %v398_v57 = vpop.f32.mrf.mxu2 }
 0x126   : > { %v551_v6 = vadd.f32 %v541_v62, %v501_v3  ;;  %v404_v32 = vadd.f32 %v398_v57, %v353_v27 }
 0x129   : > { %v443_v54 = vpop.f32.mrf.mxu3 }
 0x12a   : > { %v496_v55 = vpop.f32.mrf.mxu0  ;;  %v452_v7 = vadd.f32 %v443_v54, %v402_v4  ;;  %v543_v8 = vpop.f32.mrf.mxu1 }
 0x12c   : > { %v502_v13 = vadd.f32 %v493_v51, %v452_v7  ;;  %v2325_v51 = vld [vmem:[%s2757_s1] ss:$0 sm:$0xff] }
 0x12d   : > { %v591_v0 = vpop.f32.mrf.mxu2 }
 0x12e   : > { %v601_v9 = vadd.f32 %v591_v0, %v551_v6  ;;  %v552_v19 = vadd.f32 %v543_v8, %v502_v13 }
 0x131   : > { %v446_v59 = vpop.f32.mrf.mxu3 }
 0x132   : > { %v498_v60 = vpop.f32.mrf.mxu0  ;;  %v453_v20 = vadd.f32 %v446_v59, %v403_v17  ;;  %v546_v25 = vpop.f32.mrf.mxu1 }
 0x134   : > { %v503_v28 = vadd.f32 %v496_v55, %v453_v20 }
 0x135   : > { %v593_v10 = vpop.f32.mrf.mxu2 }
 0x136   : > { %v602_v23 = vadd.f32 %v593_v10, %v552_v19  ;;  %v553_v35 = vadd.f32 %v546_v25, %v503_v28 }
 0x139   : > { %v448_v2 = vpop.f32.mrf.mxu3 }
 0x13a   : > { %v691_v5 = vpop.f32.mrf.mxu0  ;;  %v454_v36 = vadd.f32 %v448_v2, %v404_v32  ;;  %v548_v46 = vpop.f32.mrf.mxu1 }
 0x13c   : > { %v504_v43 = vadd.f32 %v498_v60, %v454_v36 }
 0x13d   : > { %v596_v31 = vpop.f32.mrf.mxu2 }
 0x13e   : > { %v603_v39 = vadd.f32 %v596_v31, %v553_v35  ;;  %v554_v50 = vadd.f32 %v548_v46, %v504_v43  ;;  %v2265_v43 = vld [vmem:[%s2760_s4 + $0x8] sm:$0xff]  ;;  %v2268_v46 = vld [vmem:[%s2760_s4 + $0x20] sm:$0xff] }
 0x141   : > { %v641_v11 = vpop.f32.mrf.mxu3 }
 0x142   : > { %v651_v14 = vadd.f32 %v641_v11, %v601_v9  ;;  %v693_v22 = vpop.f32.mrf.mxu0 }
 0x144   : > { %v701_v18 = vadd.f32 %v691_v5, %v651_v14 }
 0x145   : > { %v598_v49 = vpop.f32.mrf.mxu2 }
 0x146   : > { %v729_v21 = vadd.f32 %v712_v16, %v701_v18  ;;  %v604_v54 = vadd.f32 %v598_v49, %v554_v50  ;;  %v2266_v49 = vld [vmem:[%s2760_s4 + $0x10] sm:$0xff] }
 0x148   : > { %v737_v24 = vmin.f32 %v729_v21, 0.0  ;;  %vm733_vm1 = vcmp.gt.f32.partialorder %v729_v21, 0.0 }
 0x149   : > { %v643_v26 = vpop.f32.mrf.mxu3 }
 0x14a   : > { %v741_v29 = vmul.f32 1.442695, %v737_v24  ;;  %v652_v30 = vadd.f32 %v643_v26, %v602_v23  ;;  %v696_v38 = vpop.f32.mrf.mxu0 }
 0x14c   : > { %2327 = vpow2.f32 %v741_v29  ;;  %v702_v33 = vadd.f32 %v693_v22, %v652_v30 }
 0x14e   : > { %v730_v37 = vadd.f32 %v717_v34, %v702_v33 }
 0x150   : > { %v738_v40 = vmin.f32 %v730_v37, 0.0  ;;  %vm734_vm2 = vcmp.gt.f32.partialorder %v730_v37, 0.0 }
 0x151   : > { %v646_v41 = vpop.f32.mrf.mxu3 }
 0x152   : > { %v2328_v42 = vpop.eup %2327  ;;  %v743_v44 = vmul.f32 1.442695, %v738_v40  ;;  %v653_v45 = vadd.f32 %v646_v41, %v603_v39  ;;  %v698_v57 = vpop.f32.mrf.mxu0  ;;  %v2264_v40 = vld [vmem:[%s2760_s4] sm:$0xff] }
 0x153   : > { %v1974_v47 = vadd.f32 -1.0, %v2328_v42 }
 0x154   : > { %2329 = vpow2.f32 %v743_v44  ;;  %v703_v48 = vadd.f32 %v696_v38, %v653_v45 }
 0x155   : > { %v2507_v53 = vsel %vm733_vm1, %v729_v21, %v1974_v47 }
 0x156   : > { %v731_v52 = vadd.f32 %v722_v15, %v703_v48  ;;  %v761_v59 = vmul.f32 %v2325_v51, %v2507_v53 }
 0x158   : > { %v739_v55 = vmin.f32 %v731_v52, 0.0  ;;  %v765_v4 = vpack.c.bf16 %v761_v59, %v761_v59  ;;  %vm735_vm3 = vcmp.gt.f32.partialorder %v731_v52, 0.0 }
 0x159   : > { %v648_v56 = vpop.f32.mrf.mxu3 }
 0x15a   : > { %v2330_v58 = vpop.eup %2329  ;;  %v745_v60 = vmul.f32 1.442695, %v739_v55  ;;  %v654_v61 = vadd.f32 %v648_v56, %v604_v54  ;;  %v773_v9 = vunpack.c.l.b16 %v765_v4  ;;  %v2270_v54 = vld [vmem:[%s2760_s4 + $0x30] sm:$0xff]  ;;  %v2269_v56 = vld [vmem:[%s2760_s4 + $0x28] sm:$0xff] }
 0x15b   : > { %v1975_v62 = vadd.f32 -1.0, %v2330_v58  ;;  %v2267_v58 = vld [vmem:[%s2760_s4 + $0x18] sm:$0xff] }
 0x15c   : > { %2331 = vpow2.f32 %v745_v60  ;;  %v704_v0 = vadd.f32 %v698_v57, %v654_v61  ;;  %v2274_v61 = vld [vmem:[%s2760_s4 + $0x50] sm:$0xff] }
 0x15d   : > { %v2510_v1 = vsel %vm734_vm2, %v730_v37, %v1975_v62 }
 0x15e   : > { %v732_v2 = vadd.f32 %v727_v63, %v704_v0  ;;  %v762_v3 = vmul.f32 %v2325_v51, %v2510_v1  ;;  %v2271_v63 = vld [vmem:[%s2760_s4 + $0x38] sm:$0xff]  ;;  %v2276_v0 = vld [vmem:[%s2760_s4 + $0x60] sm:$0xff] }
 0x160   : > { %v740_v5 = vmin.f32 %v732_v2, 0.0  ;;  %v766_v6 = vpack.c.bf16 %v762_v3, %v762_v3  ;;  %vm736_vm4 = vcmp.gt.f32.partialorder %v732_v2, 0.0  ;;  %v2272_v3 = vld [vmem:[%s2760_s4 + $0x40] sm:$0xff] }
 0x162   : > { %v2332_v7 = vpop.eup %2331  ;;  %v747_v8 = vmul.f32 1.442695, %v740_v5  ;;  %v774_v10 = vunpack.c.l.b16 %v766_v6  ;;  %v2275_v5 = vld [vmem:[%s2760_s4 + $0x58] sm:$0xff]  ;;  %v2278_v6 = vld [vmem:[%s2760_s4 + $0x70] sm:$0xff] }
 0x163   : > { %v1976_v11 = vadd.f32 -1.0, %v2332_v7  ;;  %v2277_v7 = vld [vmem:[%s2760_s4 + $0x68] sm:$0xff] }
 0x164   : > { %2333 = vpow2.f32 %v747_v8  ;;  %v777_v12 = vpack.c.b16 %v774_v10, %v773_v9  ;;  %v2273_v8 = vld [vmem:[%s2760_s4 + $0x48] sm:$0xff]  ;;  %v2279_v9 = vld [vmem:[%s2760_s4 + $0x78] sm:$0xff]  ;;  %v2280_v10 = vld [vmem:[%s2760_s4 + $0x80] sm:$0xff] }
 0x165   : > { %v2514_v13 = vsel %vm735_vm3, %v731_v52, %v1976_v11  ;;  %v2281_v11 = vld [vmem:[%s2760_s4 + $0x88] sm:$0xff] }
 0x166   : > { %779 = vrot.lane.b32.xlu1 %v777_v12, %s2352_s18  ;;  %v763_v15 = vmul.f32 %v2325_v51, %v2514_v13 }
 0x168   : > { %v767_v19 = vpack.c.bf16 %v763_v15, %v763_v15 }
 0x16a   : > { %v2334_v14 = vpop.eup %2333  ;;  %v775_v21 = vunpack.c.l.b16 %v767_v19 }
 0x16b   : > { %v1977_v16 = vadd.f32 -1.0, %v2334_v14 }
 0x16d   : > { %v2517_v17 = vsel %vm736_vm4, %v732_v2, %v1977_v16 }
 0x16e   : > { %v764_v18 = vmul.f32 %v2325_v51, %v2517_v17 }
 0x170   : > { %v768_v20 = vpack.c.bf16 %v764_v18, %v764_v18 }
 0x172   : > { %v776_v22 = vunpack.c.l.b16 %v768_v20 }
 0x174   : > { %v778_v23 = vpack.c.b16 %v776_v22, %v775_v21 }
 0x176   : > { %781 = vrot.lane.b32.xlu2 %v778_v23, %s2352_s18 }
 0x1d0   : > { %v782_v24 = vpop.permute.xlu2 %781 }
 0x1d1   : > { %v788_v25 = vsel %vm783_vm5, 0, %v782_v24 }
 0x1d2   : > { %v791_v26 = vsel %vm789_vm6, %v788_v25, 0 }
 0x1d3   : > { %v796_v27 = vunpack.c.l.b16 %v791_v26  ;;  %v797_v28 = vunpack.c.h.b16 %v791_v26 }
 0x1d5   : > { %v800_v29 = vpack.c.b16 %v796_v27, %v796_v27  ;;  %v801_v30 = vpack.c.b16 %v797_v28, %v797_v28 }
 0x1d7   : > { %809 = vst.msk [vmem:[#allocation2 + $0x8] sm:$0xf] %vm806_vm7, %v800_v29 }
 0x1d8   : > { %810 = vst.msk [vmem:[#allocation2 + $0xc] sm:$0xf] %vm806_vm7, %v801_v30  ;;  %v780_v31 = vpop.permute.xlu1 %779 }
 0x1d9   : > { %v786_v32 = vsel %vm783_vm5, 0, %v780_v31 }
 0x1da   : > { %v790_v33 = vsel %vm789_vm6, %v786_v32, 0 }
 0x1db   : > { %v794_v34 = vunpack.c.l.b16 %v790_v33  ;;  %v795_v35 = vunpack.c.h.b16 %v790_v33 }
 0x1dd   : > { %v798_v36 = vpack.c.b16 %v794_v34, %v794_v34  ;;  %v799_v37 = vpack.c.b16 %v795_v35, %v795_v35 }
 0x1df   : > { %v2263_v38 = vld [vmem:[#allocation2 + $0x8] sm:$0xff]  ;;  %807 = vst.msk [vmem:[#allocation2] sm:$0xf] %vm806_vm7, %v798_v36 }
 0x1e0   : > { %808 = vst.msk [vmem:[#allocation2 + $0x4] sm:$0xf] %vm806_vm7, %v799_v37  ;;  %846 = vrot.lane.b32.xlu2 %v2263_v38, %s2344_s28  ;;  %899 = vmatpush.bf16.msra.mxu2 %v2263_v38 }
 0x1e1   : > { %929 = vrot.lane.b32.xlu1 %v2263_v38, %s2343_s27 }
 0x1e7   : > { %v2262_v39 = vld [vmem:[#allocation2] sm:$0xff] }
 0x1e8   : > { %927 = vrot.lane.b32.xlu2 %v2262_v39, %s2343_s27  ;;  %844 = vrot.lane.b32.xlu0 %v2262_v39, %s2344_s28 }
 0x1e9   : > { %1029 = vrot.lane.b32.xlu1 %v2263_v38, %s2346_s30  ;;  %900 = vmatpush.bf16.msra.mxu2 %v2262_v39 }
 0x1ec   : > { %2008 = vmatmul.msk.bf16.vlgmr.msra.gmra.mxu2 %vm292_vm0, %v2264_v40 }
 0x1f0   : > { %977 = vrot.lane.b32.xlu2 %v2262_v39, %s2345_s29  ;;  %979 = vrot.lane.b32.xlu0 %v2263_v38, %s2345_s29 }
 0x1f1   : > { %1079 = vrot.lane.b32.xlu1 %v2263_v38, %s2348_s8 }
 0x1f8   : > { %1129 = vrot.lane.b32.xlu2 %v2263_v38, %s2347_s7  ;;  %1027 = vrot.lane.b32.xlu0 %v2262_v39, %s2346_s30 }
 0x1f9   : > { %1127 = vrot.lane.b32.xlu1 %v2262_v39, %s2347_s7 }
 0x1fc   : > { %2009 = vmatmul.msk.bf16.gmra.mxu2 %vm292_vm0, %v2265_v43 }
 0x200   : > { %1179 = vrot.lane.b32.xlu2 %v2263_v38, %s2349_s9  ;;  %1077 = vrot.lane.b32.xlu0 %v2262_v39, %s2348_s8 }
 0x201   : > { %1177 = vrot.lane.b32.xlu1 %v2262_v39, %s2349_s9 }
 0x208   : > { %1227 = vrot.lane.b32.xlu2 %v2262_v39, %s2350_s10  ;;  %1229 = vrot.lane.b32.xlu0 %v2263_v38, %s2350_s10 }
 0x23a   : > { %v847_v41 = vpop.permute.xlu2 %846 }
 0x23b   : > { %862 = vmatpush.bf16.msra.mxu1 %v847_v41 }
 0x242   : > { %v928_v42 = vpop.permute.xlu2 %927 }
 0x24a   : > { %v978_v44 = vpop.permute.xlu2 %977 }
 0x252   : > { %v1130_v47 = vpop.permute.xlu2 %1129 }
 0x253   : > { %v930_v45 = vpop.permute.xlu1 %929 }
 0x254   : > { %945 = vmatpush.bf16.msrb.mxu3 %v930_v45 }
 0x258   : > { %946 = vmatpush.bf16.msrb.mxu3 %v928_v42 }
 0x25a   : > { %v845_v48 = vpop.permute.xlu0 %844  ;;  %v1180_v55 = vpop.permute.xlu2 %1179 }
 0x25b   : > { %2022 = vmatmul.msk.bf16.vlgmr.msrb.gmra.mxu3 %vm292_vm0, %v2268_v46  ;;  %v1030_v50 = vpop.permute.xlu1 %1029  ;;  %863 = vmatpush.bf16.msra.mxu1 %v845_v48 }
 0x25c   : > { %1145 = vmatpush.bf16.msra.mxu3 %v1130_v47 }
 0x25e   : > { %1998 = vmatmul.msk.bf16.vlgmr.msra.gmra.mxu1 %vm292_vm0, %v2266_v49 }
 0x25f   : > { %1045 = vmatpush.bf16.msrb.mxu1 %v1030_v50 }
 0x262   : > { %v980_v51 = vpop.permute.xlu0 %979  ;;  %v1228_v4 = vpop.permute.xlu2 %1227 }
 0x263   : > { %v1080_v52 = vpop.permute.xlu1 %1079  ;;  %995 = vmatpush.bf16.msrb.mxu0 %v980_v51 }
 0x264   : > { %1095 = vmatpush.bf16.msrb.mxu2 %v1080_v52 }
 0x267   : > { %996 = vmatpush.bf16.msrb.mxu0 %v978_v44 }
 0x26a   : > { %2036 = vmatmul.msk.bf16.vlgmr.msrb.gmra.mxu0 %vm292_vm0, %v2270_v54  ;;  %v1028_v57 = vpop.permute.xlu0 %1027 }
 0x26b   : > { %1195 = vmatpush.bf16.msra.mxu0 %v1180_v55  ;;  %2023 = vmatmul.msk.bf16.gmra.mxu3 %vm292_vm0, %v2269_v56  ;;  %v1128_v59 = vpop.permute.xlu1 %1127 }
 0x26c   : > { %1046 = vmatpush.bf16.msrb.mxu1 %v1028_v57  ;;  %1146 = vmatpush.bf16.msra.mxu3 %v1128_v59 }
 0x26e   : > { %1999 = vmatmul.msk.bf16.gmra.mxu1 %vm292_vm0, %v2267_v58 }
 0x26f   : > { %v902_v15 = vpop.f32.mrf.mxu2 }
 0x272   : > { %v1078_v60 = vpop.permute.xlu0 %1077 }
 0x273   : > { %v1178_v62 = vpop.permute.xlu1 %1177  ;;  %1096 = vmatpush.bf16.msrb.mxu2 %v1078_v60 }
 0x274   : > { %1196 = vmatpush.bf16.msra.mxu0 %v1178_v62 }
 0x276   : > { %2064 = vmatmul.msk.bf16.vlgmr.msrb.gmra.mxu2 %vm292_vm0, %v2274_v61 }
 0x277   : > { %v904_v20 = vpop.f32.mrf.mxu2 }
 0x27a   : > { %2037 = vmatmul.msk.bf16.gmra.mxu0 %vm292_vm0, %v2271_v63  ;;  %v1230_v2 = vpop.permute.xlu0 %1229  ;;  %v2326_v63 = vld [vmem:[%s2757_s1] ss:$0 sm:$0xff] }
 0x27b   : > { %1245 = vmatpush.bf16.msra.mxu1 %v1230_v2  ;;  %2078 = vmatmul.msk.bf16.vlgmr.msra.gmra.mxu3 %vm292_vm0, %v2276_v0 }
 0x27e   : > { %2050 = vmatmul.msk.bf16.vlgmr.msrb.gmra.mxu1 %vm292_vm0, %v2272_v3 }
 0x27f   : > { %1246 = vmatpush.bf16.msra.mxu1 %v1228_v4  ;;  %v907_v24 = vpop.f32.mrf.mxu2 }
 0x286   : > { %2065 = vmatmul.msk.bf16.gmra.mxu2 %vm292_vm0, %v2275_v5 }
 0x287   : > { %v909_v28 = vpop.f32.mrf.mxu2 }
 0x28a   : > { %2092 = vmatmul.msk.bf16.vlgmr.msra.gmra.mxu0 %vm292_vm0, %v2278_v6 }
 0x28b   : > { %2079 = vmatmul.msk.bf16.gmra.mxu3 %vm292_vm0, %v2277_v7 }
 0x28e   : > { %2051 = vmatmul.msk.bf16.gmra.mxu1 %vm292_vm0, %v2273_v8 }
 0x29a   : > { %2093 = vmatmul.msk.bf16.gmra.mxu0 %vm292_vm0, %v2279_v9 }
 0x29e   : > { %2106 = vmatmul.msk.bf16.vlgmr.msra.gmra.mxu1 %vm292_vm0, %v2280_v10 }
 0x2ae   : > { %2107 = vmatmul.msk.bf16.gmra.mxu1 %vm292_vm0, %v2281_v11 }
 0x2db   : > { %v865_v12 = vpop.f32.mrf.mxu1 }
 0x2dc   : > { %v903_v32 = vadd.f32 %v902_v15, %v865_v12 }
 0x2de   : > { %v948_v16 = vpop.f32.mrf.mxu3 }
 0x2df   : > { %v958_v35 = vadd.f32 %v948_v16, %v903_v32 }
 0x2e3   : > { %v867_v14 = vpop.f32.mrf.mxu1 }
 0x2e4   : > { %v905_v38 = vadd.f32 %v904_v20, %v867_v14 }
 0x2e6   : > { %v950_v21 = vpop.f32.mrf.mxu3 }
 0x2e7   : > { %v998_v18 = vpop.f32.mrf.mxu0  ;;  %v959_v42 = vadd.f32 %v950_v21, %v905_v38 }
 0x2e8   : > { %v1008_v36 = vadd.f32 %v998_v18, %v958_v35 }
 0x2eb   : > { %v870_v19 = vpop.f32.mrf.mxu1 }
 0x2ec   : > { %v908_v46 = vadd.f32 %v907_v24, %v870_v19 }
 0x2ee   : > { %v953_v26 = vpop.f32.mrf.mxu3 }
 0x2ef   : > { %v1000_v22 = vpop.f32.mrf.mxu0  ;;  %v960_v54 = vadd.f32 %v953_v26, %v908_v46 }
 0x2f0   : > { %v1009_v45 = vadd.f32 %v1000_v22, %v959_v42 }
 0x2f3   : > { %v872_v23 = vpop.f32.mrf.mxu1 }
 0x2f4   : > { %v910_v59 = vadd.f32 %v909_v28, %v872_v23 }
 0x2f6   : > { %v955_v30 = vpop.f32.mrf.mxu3 }
 0x2f7   : > { %v1003_v27 = vpop.f32.mrf.mxu0  ;;  %v961_v4 = vadd.f32 %v955_v30, %v910_v59 }
 0x2f8   : > { %v1010_v57 = vadd.f32 %v1003_v27, %v960_v54  ;;  %v2284_v54 = vld [vmem:[%s2761_s5] sm:$0xff] }
 0x2f9   : > { %v1098_v33 = vpop.f32.mrf.mxu2 }
 0x2fb   : > { %v1048_v25 = vpop.f32.mrf.mxu1 }
 0x2fc   : > { %v1058_v39 = vadd.f32 %v1048_v25, %v1008_v36 }
 0x2fe   : > { %v1148_v37 = vpop.f32.mrf.mxu3  ;;  %v1108_v43 = vadd.f32 %v1098_v33, %v1058_v39 }
 0x2ff   : > { %v1005_v31 = vpop.f32.mrf.mxu0 }
 0x300   : > { %v1158_v47 = vadd.f32 %v1148_v37, %v1108_v43  ;;  %v1011_v9 = vadd.f32 %v1005_v31, %v961_v4 }
 0x301   : > { %v1100_v44 = vpop.f32.mrf.mxu2 }
 0x303   : > { %v1050_v29 = vpop.f32.mrf.mxu1 }
 0x304   : > { %v1059_v48 = vadd.f32 %v1050_v29, %v1009_v45 }
 0x306   : > { %v1150_v49 = vpop.f32.mrf.mxu3  ;;  %v1109_v55 = vadd.f32 %v1100_v44, %v1059_v48 }
 0x307   : > { %v1198_v40 = vpop.f32.mrf.mxu0 }
 0x308   : > { %v1208_v50 = vadd.f32 %v1198_v40, %v1158_v47  ;;  %v1159_v60 = vadd.f32 %v1150_v49, %v1109_v55  ;;  %v2285_v55 = vld [vmem:[%s2761_s5 + $0x8] sm:$0xff] }
 0x309   : > { %v1103_v58 = vpop.f32.mrf.mxu2 }
 0x30b   : > { %v1053_v34 = vpop.f32.mrf.mxu1 }
 0x30c   : > { %v1060_v61 = vadd.f32 %v1053_v34, %v1010_v57 }
 0x30e   : > { %v1153_v2 = vpop.f32.mrf.mxu3  ;;  %v1110_v5 = vadd.f32 %v1103_v58, %v1060_v61  ;;  %v2286_v58 = vld [vmem:[%s2761_s5 + $0x10] sm:$0xff]  ;;  %v2288_v61 = vld [vmem:[%s2761_s5 + $0x20] sm:$0xff] }
 0x30f   : > { %v1200_v51 = vpop.f32.mrf.mxu0 }
 0x310   : > { %v1209_v0 = vadd.f32 %v1200_v51, %v1159_v60  ;;  %v1160_v11 = vadd.f32 %v1153_v2, %v1110_v5  ;;  %v2287_v2 = vld [vmem:[%s2761_s5 + $0x18] sm:$0xff] }
 0x311   : > { %v1105_v15 = vpop.f32.mrf.mxu2 }
 0x313   : > { %v1055_v41 = vpop.f32.mrf.mxu1 }
 0x316   : > { %v1155_v24 = vpop.f32.mrf.mxu3 }
 0x317   : > { %v1203_v8 = vpop.f32.mrf.mxu0 }
 0x318   : > { %v1210_v16 = vadd.f32 %v1203_v8, %v1160_v11  ;;  %v2289_v8 = vld [vmem:[%s2761_s5 + $0x28] sm:$0xff] }
 0x31b   : > { %v1248_v52 = vpop.f32.mrf.mxu1 }
 0x31c   : > { %v1258_v56 = vadd.f32 %v1248_v52, %v1208_v50 }
 0x31e   : > { %v2618_v62 = vadd.f32 %v1258_v56, %v2507_v53  ;;  %v1061_v53 = vadd.f32 %v1055_v41, %v1011_v9 }
 0x31f   : > { %v1205_v26 = vpop.f32.mrf.mxu0 }
 0x320   : > { %v1270_v6 = vmul.f32 %v2326_v63, %v2618_v62  ;;  %v1111_v20 = vadd.f32 %v1105_v15, %v1061_v53  ;;  %v2292_v53 = vld [vmem:[%s2761_s5 + $0x40] sm:$0xff] }
 0x322   : > { %v1274_v12 = vpack.c.bf16 %v1270_v6, %v1270_v6  ;;  %v1161_v27 = vadd.f32 %v1155_v24, %v1111_v20  ;;  %v2290_v6 = vld [vmem:[%s2761_s5 + $0x30] sm:$0xff]  ;;  %v2293_v20 = vld [vmem:[%s2761_s5 + $0x48] sm:$0xff] }
 0x323   : > { %v1250_v3 = vpop.f32.mrf.mxu1  ;;  %v2297_v24 = vld [vmem:[%s2761_s5 + $0x68] sm:$0xff] }
 0x324   : > { %v1259_v7 = vadd.f32 %v1250_v3, %v1209_v0  ;;  %v1282_v21 = vunpack.c.l.b16 %v1274_v12  ;;  %v1211_v28 = vadd.f32 %v1205_v26, %v1161_v27  ;;  %v2299_v26 = vld [vmem:[%s2761_s5 + $0x78] sm:$0xff]  ;;  %v2301_v27 = vld [vmem:[%s2761_s5 + $0x88] sm:$0xff] }
 0x326   : > { %v2625_v10 = vadd.f32 %v1259_v7, %v2510_v1 }
 0x328   : > { %v1271_v14 = vmul.f32 %v2326_v63, %v2625_v10 }
 0x32a   : > { %v1275_v18 = vpack.c.bf16 %v1271_v14, %v1271_v14  ;;  %v2294_v14 = vld [vmem:[%s2761_s5 + $0x50] sm:$0xff] }
 0x32b   : > { %v1253_v19 = vpop.f32.mrf.mxu1 }
 0x32c   : > { %v1283_v22 = vunpack.c.l.b16 %v1275_v18  ;;  %v1260_v23 = vadd.f32 %v1253_v19, %v1210_v16  ;;  %v2291_v18 = vld [vmem:[%s2761_s5 + $0x38] sm:$0xff] }
 0x32e   : > { %v1286_v25 = vpack.c.b16 %v1283_v22, %v1282_v21  ;;  %v2629_v1 = vadd.f32 %v1260_v23, %v2514_v13  ;;  %v2296_v21 = vld [vmem:[%s2761_s5 + $0x60] sm:$0xff]  ;;  %v2295_v22 = vld [vmem:[%s2761_s5 + $0x58] sm:$0xff]  ;;  %v2298_v23 = vld [vmem:[%s2761_s5 + $0x70] sm:$0xff] }
 0x330   : > { %1288 = vrot.lane.b32.xlu1 %v1286_v25, %s2352_s18  ;;  %v1272_v30 = vmul.f32 %v2326_v63, %v2629_v1  ;;  %v2300_v25 = vld [vmem:[%s2761_s5 + $0x80] sm:$0xff] }
 0x332   : > { %v1276_v33 = vpack.c.bf16 %v1272_v30, %v1272_v30 }
 0x333   : > { %v1255_v29 = vpop.f32.mrf.mxu1 }
 0x334   : > { %v1261_v31 = vadd.f32 %v1255_v29, %v1211_v28  ;;  %v1284_v36 = vunpack.c.l.b16 %v1276_v33 }
 0x336   : > { %v2634_v32 = vadd.f32 %v1261_v31, %v2517_v17 }
 0x338   : > { %v1273_v34 = vmul.f32 %v2326_v63, %v2634_v32 }
 0x33a   : > { %v1277_v35 = vpack.c.bf16 %v1273_v34, %v1273_v34 }
 0x33c   : > { %v1285_v37 = vunpack.c.l.b16 %v1277_v35 }
 0x33e   : > { %v1287_v38 = vpack.c.b16 %v1285_v37, %v1284_v36 }
 0x340   : > { %1290 = vrot.lane.b32.xlu0 %v1287_v38, %s2352_s18 }
 0x3a2   : > { %v1289_v13 = vpop.permute.xlu1 %1288 }
 0x3a3   : > { %v1293_v39 = vsel %vm783_vm5, 0, %v1289_v13 }
 0x3a4   : > { %v1296_v40 = vsel %vm789_vm6, %v1293_v39, 0 }
 0x3a5   : > { %v1300_v41 = vunpack.c.l.b16 %v1296_v40  ;;  %v1301_v42 = vunpack.c.h.b16 %v1296_v40 }
 0x3a7   : > { %v1304_v43 = vpack.c.b16 %v1300_v41, %v1300_v41  ;;  %v1305_v44 = vpack.c.b16 %v1301_v42, %v1301_v42 }
 0x3a9   : > { %1312 = vst.msk [vmem:[#allocation2] sm:$0xf] %vm806_vm7, %v1304_v43 }
 0x3aa   : > { %1313 = vst.msk [vmem:[#allocation2 + $0x4] sm:$0xf] %vm806_vm7, %v1305_v44 }
 0x3b1   : > { %v2282_v17 = vld [vmem:[#allocation2] sm:$0xff] }
 0x3b2   : > { %v1291_v45 = vpop.permute.xlu0 %1290  ;;  %1349 = vrot.lane.b32.xlu0 %v2282_v17, %s2344_s28 }
 0x3b3   : > { %v1295_v46 = vsel %vm783_vm5, 0, %v1291_v45 }
 0x3b4   : > { %v1297_v47 = vsel %vm789_vm6, %v1295_v46, 0 }
 0x3b5   : > { %v1302_v48 = vunpack.c.l.b16 %v1297_v47  ;;  %v1303_v49 = vunpack.c.h.b16 %v1297_v47 }
 0x3b7   : > { %v1306_v50 = vpack.c.b16 %v1302_v48, %v1302_v48  ;;  %v1307_v51 = vpack.c.b16 %v1303_v49, %v1303_v49 }
 0x3b9   : > { %1314 = vst.msk [vmem:[#allocation2 + $0x8] sm:$0xf] %vm806_vm7, %v1306_v50 }
 0x3ba   : > { %1315 = vst.msk [vmem:[#allocation2 + $0xc] sm:$0xf] %vm806_vm7, %v1307_v51 }
 0x3c1   : > { %v2283_v52 = vld [vmem:[#allocation2 + $0x8] sm:$0xff] }
 0x3c2   : > { %1484 = vrot.lane.b32.xlu0 %v2283_v52, %s2345_s29  ;;  %1534 = vrot.lane.b32.xlu1 %v2283_v52, %s2346_s30 }
 0x3c3   : > { %1351 = vrot.lane.b32.xlu2 %v2283_v52, %s2344_s28  ;;  %1404 = vmatpush.bf16.msrb.mxu3 %v2283_v52 }
 0x3c7   : > { %1405 = vmatpush.bf16.msrb.mxu3 %v2282_v17 }
 0x3ca   : > { %1482 = vrot.lane.b32.xlu0 %v2282_v17, %s2345_s29  ;;  %1532 = vrot.lane.b32.xlu1 %v2282_v17, %s2346_s30 }
 0x3cb   : > { %1434 = vrot.lane.b32.xlu2 %v2283_v52, %s2343_s27  ;;  %2138 = vmatmul.msk.bf16.vlgmr.msrb.gmra.mxu3 %vm292_vm0, %v2284_v54 }
 0x3d2   : > { %1734 = vrot.lane.b32.xlu0 %v2283_v52, %s2350_s10  ;;  %1584 = vrot.lane.b32.xlu1 %v2283_v52, %s2348_s8 }
 0x3d3   : > { %1432 = vrot.lane.b32.xlu2 %v2282_v17, %s2343_s27 }
 0x3da   : > { %1732 = vrot.lane.b32.xlu0 %v2282_v17, %s2350_s10  ;;  %1634 = vrot.lane.b32.xlu1 %v2283_v52, %s2347_s7 }
 0x3db   : > { %1582 = vrot.lane.b32.xlu2 %v2282_v17, %s2348_s8  ;;  %2139 = vmatmul.msk.bf16.gmra.mxu3 %vm292_vm0, %v2285_v55 }
 0x3e2   : > { %1632 = vrot.lane.b32.xlu1 %v2282_v17, %s2347_s7 }
 0x3e3   : > { %1684 = vrot.lane.b32.xlu2 %v2283_v52, %s2349_s9 }
 0x3eb   : > { %1682 = vrot.lane.b32.xlu2 %v2282_v17, %s2349_s9 }
 0x41d   : > { %v1352_v56 = vpop.permute.xlu2 %1351 }
 0x41e   : > { %1367 = vmatpush.bf16.msra.mxu2 %v1352_v56 }
 0x424   : > { %v1350_v57 = vpop.permute.xlu0 %1349 }
 0x425   : > { %v1435_v59 = vpop.permute.xlu2 %1434  ;;  %1368 = vmatpush.bf16.msra.mxu2 %v1350_v57 }
 0x426   : > { %1450 = vmatpush.bf16.msrb.mxu0 %v1435_v59 }
 0x428   : > { %2128 = vmatmul.msk.bf16.vlgmr.msra.gmra.mxu2 %vm292_vm0, %v2286_v58 }
 0x42d   : > { %v1433_v60 = vpop.permute.xlu2 %1432 }
 0x42e   : > { %1451 = vmatpush.bf16.msrb.mxu0 %v1433_v60 }
 0x431   : > { %2152 = vmatmul.msk.bf16.vlgmr.msrb.gmra.mxu0 %vm292_vm0, %v2288_v61 }
 0x434   : > { %v1535_v63 = vpop.permute.xlu1 %1534  ;;  %v1485_v0 = vpop.permute.xlu0 %1484 }
 0x435   : > { %v1583_v3 = vpop.permute.xlu2 %1582  ;;  %1500 = vmatpush.bf16.msrb.mxu1 %v1485_v0  ;;  %1550 = vmatpush.bf16.msrb.mxu2 %v1535_v63 }
 0x438   : > { %2129 = vmatmul.msk.bf16.gmra.mxu2 %vm292_vm0, %v2287_v2 }
 0x43c   : > { %v1533_v4 = vpop.permute.xlu1 %1532  ;;  %v1483_v5 = vpop.permute.xlu0 %1482 }
 0x43d   : > { %v1685_v7 = vpop.permute.xlu2 %1684  ;;  %1501 = vmatpush.bf16.msrb.mxu1 %v1483_v5  ;;  %1551 = vmatpush.bf16.msrb.mxu2 %v1533_v4 }
 0x440   : > { %2166 = vmatmul.msk.bf16.vlgmr.msrb.gmra.mxu1 %vm292_vm0, %v2290_v6 }
 0x441   : > { %1700 = vmatpush.bf16.msra.mxu1 %v1685_v7  ;;  %2153 = vmatmul.msk.bf16.gmra.mxu0 %vm292_vm0, %v2289_v8 }
 0x444   : > { %v1585_v9 = vpop.permute.xlu1 %1584  ;;  %v1735_v11 = vpop.permute.xlu0 %1734 }
 0x445   : > { %v1683_v12 = vpop.permute.xlu2 %1682  ;;  %1600 = vmatpush.bf16.msra.mxu3 %v1585_v9  ;;  %1750 = vmatpush.bf16.msra.mxu2 %v1735_v11 }
 0x446   : > { %1701 = vmatpush.bf16.msra.mxu1 %v1683_v12 }
 0x448   : > { %2180 = vmatmul.msk.bf16.vlgmr.msrb.gmra.mxu2 %vm292_vm0, %v2292_v53 }
 0x449   : > { %1601 = vmatpush.bf16.msra.mxu3 %v1583_v3 }
 0x44c   : > { %v1635_v15 = vpop.permute.xlu1 %1634  ;;  %2194 = vmatmul.msk.bf16.vlgmr.msra.gmra.mxu3 %vm292_vm0, %v2294_v14  ;;  %v1733_v16 = vpop.permute.xlu0 %1732 }
 0x44d   : > { %1650 = vmatpush.bf16.msra.mxu0 %v1635_v15  ;;  %1751 = vmatpush.bf16.msra.mxu2 %v1733_v16 }
 0x44e   : > { %v1407_v30 = vpop.f32.mrf.mxu3 }
 0x450   : > { %2167 = vmatmul.msk.bf16.gmra.mxu1 %vm292_vm0, %v2291_v18 }
 0x454   : > { %v1633_v19 = vpop.permute.xlu1 %1632 }
 0x455   : > { %1651 = vmatpush.bf16.msra.mxu0 %v1633_v19 }
 0x456   : > { %v1409_v35 = vpop.f32.mrf.mxu3 }
 0x458   : > { %2181 = vmatmul.msk.bf16.gmra.mxu2 %vm292_vm0, %v2293_v20  ;;  %2208 = vmatmul.msk.bf16.vlgmr.msra.gmra.mxu0 %vm292_vm0, %v2296_v21 }
 0x45c   : > { %2195 = vmatmul.msk.bf16.gmra.mxu3 %vm292_vm0, %v2295_v22 }
 0x45e   : > { %v1412_v13 = vpop.f32.mrf.mxu3 }
 0x460   : > { %2222 = vmatmul.msk.bf16.vlgmr.msra.gmra.mxu1 %vm292_vm0, %v2298_v23 }
 0x466   : > { %v1414_v43 = vpop.f32.mrf.mxu3 }
 0x468   : > { %2209 = vmatmul.msk.bf16.gmra.mxu0 %vm292_vm0, %v2297_v24  ;;  %2236 = vmatmul.msk.bf16.vlgmr.msra.gmra.mxu2 %vm292_vm0, %v2300_v25 }
 0x470   : > { %2223 = vmatmul.msk.bf16.gmra.mxu1 %vm292_vm0, %v2299_v26 }
 0x478   : > { %2237 = vmatmul.msk.bf16.gmra.mxu2 %vm292_vm0, %v2301_v27 }
 0x4ab   : > { %v1370_v28 = vpop.f32.mrf.mxu2 }
 0x4ac   : > { %v1408_v46 = vadd.f32 %v1407_v30, %v1370_v28 }
 0x4ae   : > { %v1453_v31 = vpop.f32.mrf.mxu0 }
 0x4af   : > { %v1463_v49 = vadd.f32 %v1453_v31, %v1408_v46 }
 0x4b3   : > { %v1372_v29 = vpop.f32.mrf.mxu2 }
 0x4b4   : > { %v1410_v54 = vadd.f32 %v1409_v35, %v1372_v29 }
 0x4b6   : > { %v1455_v36 = vpop.f32.mrf.mxu0 }
 0x4b7   : > { %v1464_v58 = vadd.f32 %v1455_v36, %v1410_v54 }
 0x4bb   : > { %v1375_v33 = vpop.f32.mrf.mxu2 }
 0x4bc   : > { %v1413_v3 = vadd.f32 %v1412_v13, %v1375_v33 }
 0x4bd   : > { %v1503_v34 = vpop.f32.mrf.mxu1 }
 0x4be   : > { %v1458_v40 = vpop.f32.mrf.mxu0  ;;  %v1513_v51 = vadd.f32 %v1503_v34, %v1463_v49 }
 0x4bf   : > { %v1465_v8 = vadd.f32 %v1458_v40, %v1413_v3 }
 0x4c3   : > { %v1377_v37 = vpop.f32.mrf.mxu2 }
 0x4c5   : > { %v1505_v38 = vpop.f32.mrf.mxu1 }
 0x4c6   : > { %v1460_v44 = vpop.f32.mrf.mxu0  ;;  %v1514_v61 = vadd.f32 %v1505_v38, %v1464_v58 }
 0x4cb   : > { %v1553_v39 = vpop.f32.mrf.mxu2 }
 0x4cc   : > { %v1563_v55 = vadd.f32 %v1553_v39, %v1513_v51 }
 0x4cd   : > { %v1508_v41 = vpop.f32.mrf.mxu1 }
 0x4ce   : > { %v1515_v12 = vadd.f32 %v1508_v41, %v1465_v8 }
 0x4cf   : > { %v1603_v47 = vpop.f32.mrf.mxu3 }
 0x4d0   : > { %v1613_v56 = vadd.f32 %v1603_v47, %v1563_v55 }
 0x4d3   : > { %v1555_v42 = vpop.f32.mrf.mxu2 }
 0x4d4   : > { %v1564_v4 = vadd.f32 %v1555_v42, %v1514_v61 }
 0x4d5   : > { %v1510_v17 = vpop.f32.mrf.mxu1  ;;  %v1653_v48 = vpop.f32.mrf.mxu0 }
 0x4d6   : > { %v1663_v59 = vadd.f32 %v1653_v48, %v1613_v56 }
 0x4d7   : > { %v1605_v57 = vpop.f32.mrf.mxu3 }
 0x4d8   : > { %v1614_v6 = vadd.f32 %v1605_v57, %v1564_v4 }
 0x4db   : > { %v1558_v45 = vpop.f32.mrf.mxu2 }
 0x4dc   : > { %v1565_v18 = vadd.f32 %v1558_v45, %v1515_v12 }
 0x4dd   : > { %v1703_v50 = vpop.f32.mrf.mxu1  ;;  %v1655_v60 = vpop.f32.mrf.mxu0 }
 0x4de   : > { %v1713_v63 = vadd.f32 %v1703_v50, %v1663_v59  ;;  %v1664_v9 = vadd.f32 %v1655_v60, %v1614_v6 }
 0x4df   : > { %v1608_v53 = vpop.f32.mrf.mxu3 }
 0x4e0   : > { %v1615_v21 = vadd.f32 %v1608_v53, %v1565_v18 }
 0x4e3   : > { %v1560_v52 = vpop.f32.mrf.mxu2 }
 0x4e5   : > { %v1705_v0 = vpop.f32.mrf.mxu1  ;;  %v1658_v15 = vpop.f32.mrf.mxu0 }
 0x4e6   : > { %v1714_v14 = vadd.f32 %v1705_v0, %v1664_v9  ;;  %v1665_v24 = vadd.f32 %v1658_v15, %v1615_v21 }
 0x4e7   : > { %v1610_v28 = vpop.f32.mrf.mxu3 }
 0x4eb   : > { %v1753_v2 = vpop.f32.mrf.mxu2 }
 0x4ec   : > { %v1763_v5 = vadd.f32 %v1753_v2, %v1713_v63 }
 0x4ed   : > { %v1708_v20 = vpop.f32.mrf.mxu1  ;;  %v1660_v33 = vpop.f32.mrf.mxu0 }
 0x4ee   : > { %v1767_v7 = vadd.f32 %v1763_v5, %v2618_v62  ;;  %v1415_v62 = vadd.f32 %v1414_v43, %v1377_v37  ;;  %v1715_v27 = vadd.f32 %v1708_v20, %v1665_v24 }
 0x4f0   : > { %v1771_v11 = vpack.c.bf16 %v1767_v7, %v1767_v7  ;;  %v1466_v23 = vadd.f32 %v1460_v44, %v1415_v62 }
 0x4f2   : > { %1776 = vst.msk [vmem:[%s2740_s16] sm:$0xf] %vm1775_vm8, %v1771_v11  ;;  %v1516_v26 = vadd.f32 %v1510_v17, %v1466_v23 }
 0x4f3   : > { %v1755_v16 = vpop.f32.mrf.mxu2 }
 0x4f4   : > { %v1764_v19 = vadd.f32 %v1755_v16, %v1714_v14  ;;  %v1566_v30 = vadd.f32 %v1560_v52, %v1516_v26 }
 0x4f5   : > { %v1710_v36 = vpop.f32.mrf.mxu1 }
 0x4f6   : > { %v1768_v22 = vadd.f32 %v1764_v19, %v2625_v10  ;;  %v1616_v34 = vadd.f32 %v1610_v28, %v1566_v30 }
 0x4f8   : > { %v1772_v25 = vpack.c.bf16 %v1768_v22, %v1768_v22  ;;  %v1666_v37 = vadd.f32 %v1660_v33, %v1616_v34 }
 0x4fa   : > { %1777 = vst.msk [vmem:[%s2740_s16 + $0x4] sm:$0xf] %vm1775_vm8, %v1772_v25  ;;  %v1716_v38 = vadd.f32 %v1710_v36, %v1666_v37 }
 0x4fb   : > { %v1758_v29 = vpop.f32.mrf.mxu2 }
 0x4fc   : > { %v1765_v31 = vadd.f32 %v1758_v29, %v1715_v27 }
 0x4fe   : > { %v1769_v35 = vadd.f32 %v1765_v31, %v2629_v1 }
 0x500   : > { %v1773_v10 = vpack.c.bf16 %v1769_v35, %v1769_v35 }
 0x502   : > { %1778 = vst.msk [vmem:[%s2740_s16 + $0x8] sm:$0xf] %vm1775_vm8, %v1773_v10 }
 0x503   : > { %v1760_v13 = vpop.f32.mrf.mxu2 }
 0x504   : > { %v1766_v39 = vadd.f32 %v1760_v13, %v1716_v38 }
 0x506   : > { %v1770_v40 = vadd.f32 %v1766_v39, %v2634_v32 }
 0x508   : > { %v1774_v41 = vpack.c.bf16 %v1770_v40, %v1770_v40 }
 0x50a   : > { %1779 = vst.msk [vmem:[%s2740_s16 + $0xc] sm:$0xf] %vm1775_vm8, %v1774_v41 }
 0x50b PF: > { %s16_s21 = sadd.s32 1, %s2341_s21  }
 0x50c   : > { %p13_p4 = scmp.ge.s32.totalorder %s16_s21, 4  }
 0x50e   :  { %15 = sbr.rel (!%p13_p4) target bundleno = 1 (0x1), region = 98 }

// kernel: decoder_forward.7
= control target key start
LH: loop header
LB: loop body
LE: loop exit
PB: predicated region body
PF: predicated region fallthrough
CT: control target
= control target key end

     0   :  { %s1137_s17 = smov 0   ;;  %s1322_s0 = inlined_call_operand.vmem [shape: bf16[2,32,326], index: 0, kind: input, shape index: {}]   ;;  %s1323_s1 = inlined_call_operand.vmem [shape: f32[1,288], index: 1, kind: input, shape index: {}]   ;;  %s1324_s2 = inlined_call_operand.vmem [shape: bf16[9,1,32], index: 2, kind: input, shape index: {}]   ;;  %s1325_s3 = inlined_call_operand.<no memory space> [shape: f32[1,1], index: 3, kind: input, shape index: {}]   ;;  %s1326_s4 = inlined_call_operand.vmem [shape: f32[2,1,288], index: 4, kind: output, shape index: {}]  }
   0x1   :  { %v9_v0 = vstv %s1325_s3 }
   0x2   :  { %10 = vst [vmem:[#allocation2] sm:$0x1] %v9_v0 }
   0x3 LB: > { %s987_s1 = sadd.s32 4294967295, %s1098_s17   ;;  %p991_p0 = scmp.ge.s32.totalorder %s1098_s17, 1  ;;  %s1098_s17 = sphi %s1137_s17, %s16_s17  }
   0x4   : > { %p164_p1 = scmp.lt.s32.totalorder %s1098_s17, 3 }
   0x6   : > { %p165_p2 = pnand %p991_p0, %p164_p1 }
   0x7   : > { %p189_p3 = scmp.lt.s32.totalorder (!%p165_p2), %s987_s1, 1  ;;  %s1100_s21 = smov (!%p165_p2), 127  }
   0x8   : > { %168 = sbr.rel (%p165_p2) target bundleno = 434 (0x1b2), region = 36  ;;  %s1101_s22 = smov (!%p165_p2), 126  }
   0x9   : > { %s1102_s23 = smov (!%p165_p2), 110   ;;  %s1103_s24 = smov (!%p165_p2), 109  }
   0xa   : > { %s1104_s25 = smov (!%p165_p2), 108   ;;  %s1105_s26 = smov (!%p165_p2), 92  }
   0xb   : > { %s1106_s27 = smov (!%p165_p2), 91   ;;  %s1107_s30 = smov (!%p165_p2), 90  }
   0xd   : > { %s1328_s1 = smov (!%p189_p3, %s987_s1), 1  ;;  %vm259_vm0 = vcmask 261120   ;;  %v207_v21 = vld [vmem:[%s1324_s2] sm:$0x1]  ;;  %vm248_vm1 = vcmask 1039360   ;;  %vm364_vm2 = vcmask 1031168  }
   0xe   : > { %s1060_s3 = smul.u32 48, %s1328_s1  ;;  %v993_v30 = vld [vmem:[%s1324_s2 + $0x1] sm:$0x1]  ;;  %v1024_v42 = vld [vmem:[%s1324_s2 + $0x2] sm:$0x1]  ;;  %vm434_vm3 = vcmask 900096  }
   0xf   : > { %v1028_v53 = vld [vmem:[%s1324_s2 + $0x3] sm:$0x1]  ;;  %vm504_vm4 = vcmask 891904   ;;  %v1032_v0 = vld [vmem:[%s1324_s2 + $0x4] sm:$0x1]  ;;  %vm574_vm5 = vcmask 883712  }
  0x10   : > { %s193_s20 = scalar_lea.vmem %s1322_s0, %s1060_s3  ;;  %vm644_vm6 = vcmask 752640   ;;  %vm714_vm7 = vcmask 744448   ;;  %vm784_vm8 = vcmask 736256  }
  0x11   : > { %v1016_v1 = vld [vmem:[%s193_s20 + $0x20] sm:$0xf]  ;;  %v1059_v2 = vld [vmem:[%s193_s20 + $0x28] sm:$0xf0]  ;;  %v1057_v3 = vld [vmem:[%s193_s20 + $0x1c] sm:$0xf] }
  0x12   : > { %v1151_v4 = vor.u32 %v1059_v2, %v1016_v1  ;;  %v1010_v5 = vld [vmem:[%s193_s20 + $0x24] sm:$0xf0]  ;;  %v1008_v6 = vld [vmem:[%s193_s20 + $0x18] sm:$0xf]  ;;  %v1058_v7 = vld [vmem:[%s193_s20 + $0x20] sm:$0xf0] }
  0x13   : > { %v1153_v8 = vor.u32 %v1057_v3, %v1010_v5  ;;  %v1155_v9 = vor.u32 %v1058_v7, %v1008_v6  ;;  %v1054_v10 = vld [vmem:[%s193_s20 + $0x4] sm:$0xf]  ;;  %v998_v11 = vld [vmem:[%s193_s20 + $0xc] sm:$0xf0]  ;;  %v996_v12 = vld [vmem:[%s193_s20] sm:$0xf] }
  0x14   : > { %246 = vrot.lane.b32.xlu0 %v1151_v4, %s1100_s21  ;;  %v1055_v13 = vld [vmem:[%s193_s20 + $0x8] sm:$0xf0]  ;;  %v1004_v14 = vld [vmem:[%s193_s20 + $0x8] sm:$0xf]  ;;  %v1056_v15 = vld [vmem:[%s193_s20 + $0x10] sm:$0xf0]  ;;  %v1159_v16 = vor.u32 %v1054_v10, %v998_v11 }
  0x15   : > { %244 = vrot.lane.b32.xlu1 %v1153_v8, %s1100_s21  ;;  %317 = vmatpush.bf16.msra.mxu3 %v1155_v9  ;;  %v1163_v17 = vor.u32 %v1055_v13, %v996_v12  ;;  %v1165_v18 = vor.u32 %v1056_v15, %v1004_v14  ;;  %v1036_v11 = vld [vmem:[%s1324_s2 + $0x5] sm:$0x1] }
  0x16   : > { %238 = vrot.lane.b32.xlu2 %v1159_v16, %s1100_s21 }
  0x19   : > { %318 = vmatpush.bf16.msra.mxu3 %v1163_v17 }
  0x1c   : > { %240 = vrot.lane.b32.xlu0 %v1165_v18, %s1100_s21  ;;  %1021 = vmatmul.msk.bf16.vlgmr.msra.gmra.mxu3 %vm259_vm0, %v207_v21 }
  0x1d   : > { %242 = vrot.lane.b32.xlu1 %v1155_v9, %s1100_s21 }
  0x1e   : > { %236 = vrot.lane.b32.xlu2 %v1163_v17, %s1100_s21  ;;  %s1061_s21 = smul.u32 3, %s1328_s1 }
  0x24   : > { %358 = vrot.lane.b32.xlu0 %v1155_v9, %s1101_s22 }
  0x25   : > { %360 = vrot.lane.b32.xlu1 %v1153_v8, %s1101_s22 }
  0x26   : > { %352 = vrot.lane.b32.xlu2 %v1163_v17, %s1101_s22 }
  0x2c   : > { %354 = vrot.lane.b32.xlu0 %v1159_v16, %s1101_s22 }
  0x2d   : > { %362 = vrot.lane.b32.xlu1 %v1151_v4, %s1101_s22 }
  0x2e   : > { %430 = vrot.lane.b32.xlu2 %v1153_v8, %s1102_s23 }
  0x34   : > { %432 = vrot.lane.b32.xlu0 %v1151_v4, %s1102_s23 }
  0x35   : > { %356 = vrot.lane.b32.xlu1 %v1165_v18, %s1101_s22 }
  0x36   : > { %424 = vrot.lane.b32.xlu2 %v1159_v16, %s1102_s23 }
  0x3c   : > { %426 = vrot.lane.b32.xlu0 %v1165_v18, %s1102_s23 }
  0x3d   : > { %428 = vrot.lane.b32.xlu1 %v1155_v9, %s1102_s23 }
  0x3e   : > { %422 = vrot.lane.b32.xlu2 %v1163_v17, %s1102_s23 }
  0x44   : > { %502 = vrot.lane.b32.xlu0 %v1151_v4, %s1103_s24 }
  0x45   : > { %496 = vrot.lane.b32.xlu1 %v1165_v18, %s1103_s24 }
  0x46   : > { %500 = vrot.lane.b32.xlu2 %v1153_v8, %s1103_s24 }
  0x4c   : > { %498 = vrot.lane.b32.xlu0 %v1155_v9, %s1103_s24 }
  0x4d   : > { %494 = vrot.lane.b32.xlu1 %v1159_v16, %s1103_s24 }
  0x4e   : > { %492 = vrot.lane.b32.xlu2 %v1163_v17, %s1103_s24  ;;  %s197_s24 = scalar_lea.vmem %s1326_s4, %s1061_s21 }
  0x54   : > { %568 = vrot.lane.b32.xlu0 %v1155_v9, %s1104_s25 }
  0x55   : > { %570 = vrot.lane.b32.xlu1 %v1153_v8, %s1104_s25 }
  0x56   : > { %638 = vrot.lane.b32.xlu2 %v1155_v9, %s1105_s26 }
  0x5c   : > { %640 = vrot.lane.b32.xlu0 %v1153_v8, %s1105_s26 }
  0x5d   : > { %562 = vrot.lane.b32.xlu1 %v1163_v17, %s1104_s25 }
  0x5e   : > { %564 = vrot.lane.b32.xlu2 %v1159_v16, %s1104_s25 }
  0x64   : > { %632 = vrot.lane.b32.xlu0 %v1163_v17, %s1105_s26 }
  0x65   : > { %634 = vrot.lane.b32.xlu1 %v1159_v16, %s1105_s26 }
  0x66   : > { %572 = vrot.lane.b32.xlu2 %v1151_v4, %s1104_s25 }
  0x6c   : > { %566 = vrot.lane.b32.xlu0 %v1165_v18, %s1104_s25 }
  0x6d   : > { %642 = vrot.lane.b32.xlu1 %v1151_v4, %s1105_s26 }
  0x6e   : > { %710 = vrot.lane.b32.xlu2 %v1153_v8, %s1106_s27 }
  0x70   : > { %v239_v19 = vpop.permute.xlu2 %238 }
  0x74   : > { %712 = vrot.lane.b32.xlu0 %v1151_v4, %s1106_s27 }
  0x75   : > { %636 = vrot.lane.b32.xlu1 %v1165_v18, %s1105_s26 }
  0x76   : > { %704 = vrot.lane.b32.xlu2 %v1159_v16, %s1106_s27 }
  0x78   : > { %v237_v20 = vpop.permute.xlu2 %236 }
  0x79   : > { %v249_v33 = vsel %vm248_vm1, %v237_v20, %v239_v19 }
  0x7c   : > { %706 = vrot.lane.b32.xlu0 %v1165_v18, %s1106_s27 }
  0x7d   : > { %708 = vrot.lane.b32.xlu1 %v1155_v9, %s1106_s27 }
  0x7e   : > { %702 = vrot.lane.b32.xlu2 %v1163_v17, %s1106_s27 }
  0x80   : > { %v353_v22 = vpop.permute.xlu2 %352 }
  0x84   : > { %782 = vrot.lane.b32.xlu0 %v1151_v4, %s1107_s30 }
  0x85   : > { %776 = vrot.lane.b32.xlu1 %v1165_v18, %s1107_s30 }
  0x86   : > { %v247_v23 = vpop.permute.xlu0 %246  ;;  %780 = vrot.lane.b32.xlu2 %v1153_v8, %s1107_s30 }
  0x87   : > { %v245_v24 = vpop.permute.xlu1 %244  ;;  %295 = vmatpush.bf16.msra.mxu2 %v247_v23 }
  0x88   : > { %v252_v25 = vsel %vm248_vm1, %v245_v24, %v247_v23  ;;  %v431_v26 = vpop.permute.xlu2 %430 }
  0x89   : > { %282 = vmatpush.bf16.msra.mxu1 %v252_v25 }
  0x8c   : > { %778 = vrot.lane.b32.xlu0 %v1155_v9, %s1107_s30 }
  0x8d   : > { %774 = vrot.lane.b32.xlu1 %v1159_v16, %s1107_s30 }
  0x8e   : > { %v241_v27 = vpop.permute.xlu0 %240  ;;  %772 = vrot.lane.b32.xlu2 %v1163_v17, %s1107_s30 }
  0x8f   : > { %v243_v28 = vpop.permute.xlu1 %242  ;;  %v250_v29 = vsel %vm248_vm1, %v239_v19, %v241_v27  ;;  %296 = vmatpush.bf16.msra.mxu2 %v241_v27  ;;  %v1108_v27 = vmov 0  }
  0x90   : > { %v251_v31 = vsel %vm248_vm1, %v243_v28, %v245_v24  ;;  %283 = vmatpush.bf16.msra.mxu1 %v250_v29  ;;  %v425_v32 = vpop.permute.xlu2 %424  ;;  %1079 = vset.pattern.permute.xlu0 %v1108_v27 }
  0x91   : > { %269 = vmatpush.bf16.msra.mxu0 %v251_v31 }
  0x92   : > { %1020 = vmatmul.msk.bf16.vlgmr.msra.gmra.mxu2 %vm259_vm0, %v993_v30 }
  0x93   : > { %1019 = vmatmul.msk.bf16.vlgmr.msra.gmra.mxu1 %vm259_vm0, %v993_v30 }
  0x94   : > { %343 = vmatpush.bf16.msrb.mxu1 %v1151_v4 }
  0x95   : > { %270 = vmatpush.bf16.msra.mxu0 %v249_v33  ;;  %v1044_v33 = vld [vmem:[%s1324_s2 + $0x7] sm:$0x1] }
  0x96   : > { %v359_v34 = vpop.permute.xlu0 %358 }
  0x97   : > { %v361_v35 = vpop.permute.xlu1 %360 }
  0x98   : > { %344 = vmatpush.bf16.msrb.mxu1 %v1165_v18  ;;  %1018 = vmatmul.msk.bf16.vlgmr.msra.gmra.mxu0 %vm259_vm0, %v993_v30  ;;  %v367_v36 = vsel %vm364_vm2, %v359_v34, %v361_v35  ;;  %v423_v37 = vpop.permute.xlu2 %422 }
  0x99   : > { %330 = vmatpush.bf16.msrb.mxu0 %v1153_v8  ;;  %384 = vmatpush.bf16.msrb.mxu2 %v367_v36  ;;  %v435_v55 = vsel %vm434_vm3, %v423_v37, %v425_v32 }
  0x9d   : > { %331 = vmatpush.bf16.msrb.mxu0 %v1159_v16  ;;  %v1040_v16 = vld [vmem:[%s1324_s2 + $0x6] sm:$0x1] }
  0x9e   : > { %v355_v38 = vpop.permute.xlu0 %354 }
  0x9f   : > { %v363_v39 = vpop.permute.xlu1 %362  ;;  %v365_v40 = vsel %vm364_vm2, %v353_v22, %v355_v38 }
  0xa0   : > { %385 = vmatpush.bf16.msrb.mxu2 %v365_v40  ;;  %v368_v41 = vsel %vm364_vm2, %v361_v35, %v363_v39  ;;  %v501_v43 = vpop.permute.xlu2 %500 }
  0xa1   : > { %410 = vmatpush.bf16.msra.mxu0 %v363_v39  ;;  %397 = vmatpush.bf16.msrb.mxu3 %v368_v41  ;;  %v320_v39 = vpop.f32.mrf.mxu3 }
  0xa3   : > { %1025 = vmatmul.msk.bf16.vlgmr.msrb.gmra.mxu2 %vm259_vm0, %v1024_v42  ;;  %1023 = vmatmul.msk.bf16.vlgmr.msrb.gmra.mxu1 %vm259_vm0, %v207_v21 }
  0xa6   : > { %v433_v44 = vpop.permute.xlu0 %432 }
  0xa7   : > { %v357_v45 = vpop.permute.xlu1 %356  ;;  %v438_v46 = vsel %vm434_vm3, %v431_v26, %v433_v44 }
  0xa8   : > { %1022 = vmatmul.msk.bf16.vlgmr.msrb.gmra.mxu0 %vm259_vm0, %v207_v21  ;;  %v366_v47 = vsel %vm364_vm2, %v355_v38, %v357_v45  ;;  %467 = vmatpush.bf16.msra.mxu2 %v438_v46  ;;  %v493_v48 = vpop.permute.xlu2 %492 }
  0xa9   : > { %411 = vmatpush.bf16.msra.mxu0 %v357_v45  ;;  %398 = vmatpush.bf16.msrb.mxu3 %v366_v47  ;;  %v1048_v45 = vld [vmem:[%s1324_s2 + $0x8] sm:$0x1]  ;;  %v322_v47 = vpop.f32.mrf.mxu3 }
  0xac   : > { %1026 = vmatmul.msk.bf16.vlgmr.msrb.gmra.mxu3 %vm259_vm0, %v1024_v42 }
  0xad   : > { %480 = vmatpush.bf16.msra.mxu3 %v433_v44 }
  0xae   : > { %v427_v49 = vpop.permute.xlu0 %426 }
  0xaf   : > { %v429_v50 = vpop.permute.xlu1 %428  ;;  %v436_v51 = vsel %vm434_vm3, %v425_v32, %v427_v49 }
  0xb0   : > { %v437_v52 = vsel %vm434_vm3, %v429_v50, %v431_v26  ;;  %468 = vmatpush.bf16.msra.mxu2 %v436_v51  ;;  %v639_v54 = vpop.permute.xlu2 %638  ;;  %v840_v26 = vld [vmem:[#allocation2] sm:$0x1] }
  0xb1   : > { %481 = vmatpush.bf16.msra.mxu3 %v427_v49  ;;  %454 = vmatpush.bf16.msra.mxu1 %v437_v52 }
  0xb2   : > { %843 = vperm.xlu0 %1079, %v840_v26  }
  0xb3   : > { %1030 = vmatmul.msk.bf16.vlgmr.msra.gmra.mxu2 %vm259_vm0, %v1028_v53 }
  0xb5   : > { %455 = vmatpush.bf16.msra.mxu1 %v435_v55 }
  0xb6   : > { %v503_v56 = vpop.permute.xlu0 %502 }
  0xb7   : > { %v497_v57 = vpop.permute.xlu1 %496  ;;  %v508_v58 = vsel %vm504_vm4, %v501_v43, %v503_v56  ;;  %550 = vmatpush.bf16.msrb.mxu2 %v503_v56 }
  0xb8   : > { %1027 = vmatmul.msk.bf16.vlgmr.msra.gmra.mxu0 %vm259_vm0, %v1024_v42  ;;  %1029 = vmatmul.msk.bf16.vlgmr.msra.gmra.mxu1 %vm259_vm0, %v1028_v53  ;;  %v565_v59 = vpop.permute.xlu2 %564 }
  0xb9   : > { %537 = vmatpush.bf16.msrb.mxu1 %v508_v58 }
  0xbb   : > { %551 = vmatpush.bf16.msrb.mxu2 %v497_v57 }
  0xbc   : > { %1031 = vmatmul.msk.bf16.vlgmr.msra.gmra.mxu3 %vm259_vm0, %v1028_v53 }
  0xbe   : > { %v499_v60 = vpop.permute.xlu0 %498 }
  0xbf   : > { %v495_v61 = vpop.permute.xlu1 %494  ;;  %v507_v62 = vsel %vm504_vm4, %v499_v60, %v501_v43 }
  0xc0   : > { %524 = vmatpush.bf16.msrb.mxu0 %v507_v62  ;;  %v506_v63 = vsel %vm504_vm4, %v495_v61, %v497_v57  ;;  %v573_v1 = vpop.permute.xlu2 %572  ;;  %v505_v2 = vsel %vm504_vm4, %v493_v48, %v495_v61 }
  0xc1   : > { %538 = vmatpush.bf16.msrb.mxu1 %v506_v63 }
  0xc3   : > { %1035 = vmatmul.msk.bf16.vlgmr.msrb.gmra.mxu2 %vm259_vm0, %v1032_v0 }
  0xc4   : > { %525 = vmatpush.bf16.msrb.mxu0 %v505_v2 }
  0xc5   : > { %620 = vmatpush.bf16.msra.mxu1 %v573_v1 }
  0xc6   : > { %v569_v3 = vpop.permute.xlu0 %568 }
  0xc7   : > { %v571_v4 = vpop.permute.xlu1 %570 }
  0xc8   : > { %v577_v5 = vsel %vm574_vm5, %v569_v3, %v571_v4  ;;  %v578_v6 = vsel %vm574_vm5, %v571_v4, %v573_v1  ;;  %1033 = vmatmul.msk.bf16.vlgmr.msrb.gmra.mxu0 %vm259_vm0, %v1032_v0  ;;  %1034 = vmatmul.msk.bf16.vlgmr.msrb.gmra.mxu1 %vm259_vm0, %v1032_v0  ;;  %v711_v15 = vpop.permute.xlu2 %710 }
  0xc9   : > { %594 = vmatpush.bf16.msrb.mxu3 %v577_v5  ;;  %607 = vmatpush.bf16.msra.mxu0 %v578_v6 }
  0xce   : > { %v641_v7 = vpop.permute.xlu0 %640 }
  0xcf   : > { %v563_v8 = vpop.permute.xlu1 %562  ;;  %v647_v9 = vsel %vm644_vm6, %v639_v54, %v641_v7 }
  0xd0   : > { %v575_v10 = vsel %vm574_vm5, %v563_v8, %v565_v59  ;;  %664 = vmatpush.bf16.msra.mxu2 %v647_v9  ;;  %v705_v21 = vpop.permute.xlu2 %704 }
  0xd1   : > { %595 = vmatpush.bf16.msrb.mxu3 %v575_v10 }
  0xd4   : > { %1037 = vmatmul.msk.bf16.vlgmr.msrb.gmra.mxu3 %vm259_vm0, %v1036_v11 }
  0xd6   : > { %v633_v12 = vpop.permute.xlu0 %632 }
  0xd7   : > { %v635_v13 = vpop.permute.xlu1 %634 }
  0xd8   : > { %v645_v14 = vsel %vm644_vm6, %v633_v12, %v635_v13  ;;  %v703_v28 = vpop.permute.xlu2 %702 }
  0xd9   : > { %665 = vmatpush.bf16.msra.mxu2 %v645_v14  ;;  %v715_v34 = vsel %vm714_vm7, %v703_v28, %v705_v21 }
  0xdc   : > { %1041 = vmatmul.msk.bf16.vlgmr.msra.gmra.mxu2 %vm259_vm0, %v1040_v16 }
  0xde   : > { %v567_v17 = vpop.permute.xlu0 %566 }
  0xdf   : > { %v643_v18 = vpop.permute.xlu1 %642  ;;  %621 = vmatpush.bf16.msra.mxu1 %v567_v17  ;;  %v576_v19 = vsel %vm574_vm5, %v565_v59, %v567_v17 }
  0xe0   : > { %v648_v20 = vsel %vm644_vm6, %v641_v7, %v643_v18  ;;  %608 = vmatpush.bf16.msra.mxu0 %v576_v19  ;;  %v781_v35 = vpop.permute.xlu2 %780 }
  0xe1   : > { %677 = vmatpush.bf16.msra.mxu3 %v648_v20 }
  0xe2   : > { %1039 = vmatmul.msk.bf16.vlgmr.msra.gmra.mxu1 %vm259_vm0, %v1036_v11 }
  0xe3   : > { %1038 = vmatmul.msk.bf16.vlgmr.msra.gmra.mxu0 %vm259_vm0, %v1036_v11 }
  0xe4   : > { %690 = vmatpush.bf16.msrb.mxu0 %v643_v18 }
  0xe6   : > { %v713_v22 = vpop.permute.xlu0 %712 }
  0xe7   : > { %v637_v23 = vpop.permute.xlu1 %636  ;;  %v718_v24 = vsel %vm714_vm7, %v711_v15, %v713_v22 }
  0xe8   : > { %691 = vmatpush.bf16.msrb.mxu0 %v637_v23  ;;  %v646_v25 = vsel %vm644_vm6, %v635_v13, %v637_v23  ;;  %747 = vmatpush.bf16.msrb.mxu2 %v718_v24  ;;  %v773_v41 = vpop.permute.xlu2 %772  ;;  %vm924_vm6 = vcmask 1040384  }
  0xe9   : > { %678 = vmatpush.bf16.msra.mxu3 %v646_v25 }
  0xec   : > { %1042 = vmatmul.msk.bf16.vlgmr.msra.gmra.mxu3 %vm259_vm0, %v1040_v16 }
  0xed   : > { %760 = vmatpush.bf16.msrb.mxu3 %v713_v22 }
  0xee   : > { %v707_v29 = vpop.permute.xlu0 %706 }
  0xef   : > { %v709_v30 = vpop.permute.xlu1 %708  ;;  %v716_v31 = vsel %vm714_vm7, %v705_v21, %v707_v29 }
  0xf0   : > { %v717_v32 = vsel %vm714_vm7, %v709_v30, %v711_v15  ;;  %748 = vmatpush.bf16.msrb.mxu2 %v716_v31 }
  0xf1   : > { %761 = vmatpush.bf16.msrb.mxu3 %v707_v29  ;;  %734 = vmatpush.bf16.msrb.mxu1 %v717_v32 }
  0xf3   : > { %1043 = vmatmul.msk.bf16.vlgmr.msrb.gmra.mxu0 %vm259_vm0, %v1040_v16  ;;  %1046 = vmatmul.msk.bf16.vlgmr.msrb.gmra.mxu2 %vm259_vm0, %v1044_v33 }
  0xf5   : > { %735 = vmatpush.bf16.msrb.mxu1 %v715_v34 }
  0xf6   : > { %v783_v36 = vpop.permute.xlu0 %782 }
  0xf7   : > { %v777_v37 = vpop.permute.xlu1 %776  ;;  %v788_v38 = vsel %vm784_vm8, %v781_v35, %v783_v36  ;;  %830 = vmatpush.bf16.msra.mxu2 %v783_v36 }
  0xf8   : > { %1045 = vmatmul.msk.bf16.vlgmr.msrb.gmra.mxu1 %vm259_vm0, %v1044_v33 }
  0xf9   : > { %817 = vmatpush.bf16.msra.mxu1 %v788_v38 }
  0xfb   : > { %831 = vmatpush.bf16.msra.mxu2 %v777_v37 }
  0xfc   : > { %1047 = vmatmul.msk.bf16.vlgmr.msrb.gmra.mxu3 %vm259_vm0, %v1044_v33 }
  0xfe   : > { %v779_v40 = vpop.permute.xlu0 %778 }
  0xff   : > { %v775_v42 = vpop.permute.xlu1 %774  ;;  %v787_v43 = vsel %vm784_vm8, %v779_v40, %v781_v35 }
 0x100   : > { %804 = vmatpush.bf16.msra.mxu0 %v787_v43  ;;  %v786_v44 = vsel %vm784_vm8, %v775_v42, %v777_v37  ;;  %v785_v46 = vsel %vm784_vm8, %v773_v41, %v775_v42 }
 0x101   : > { %818 = vmatpush.bf16.msra.mxu1 %v786_v44 }
 0x103   : > { %1051 = vmatmul.msk.bf16.vlgmr.msra.gmra.mxu2 %vm259_vm0, %v1048_v45 }
 0x104   : > { %805 = vmatpush.bf16.msra.mxu0 %v785_v46 }
 0x107   : > { %1049 = vmatmul.msk.bf16.vlgmr.msra.gmra.mxu0 %vm259_vm0, %v1048_v45 }
 0x108   : > { %1050 = vmatmul.msk.bf16.vlgmr.msra.gmra.mxu1 %vm259_vm0, %v1048_v45 }
 0x110   : > { %v285_v48 = vpop.f32.mrf.mxu1 }
 0x115   : > { %v272_v49 = vpop.f32.mrf.mxu0  ;;  %v298_v50 = vpop.f32.mrf.mxu2 }
 0x116   : > { %v321_v51 = vadd.f32 %v320_v39, %v272_v49 }
 0x118   : > { %v287_v52 = vpop.f32.mrf.mxu1 }
 0x11d   : > { %v274_v53 = vpop.f32.mrf.mxu0  ;;  %v300_v54 = vpop.f32.mrf.mxu2 }
 0x120   : > { %v346_v55 = vpop.f32.mrf.mxu1 }
 0x121   : > { %v347_v56 = vadd.f32 %v346_v55, %v298_v50 }
 0x124   : > { %v844_v43 = vpop.permute.xlu0 %843 }
 0x125   : > { %v333_v57 = vpop.f32.mrf.mxu0  ;;  %v846_v49 = vperm.slane %v844_v43, 0 }
 0x126   : > { %v334_v58 = vadd.f32 %v333_v57, %v285_v48  ;;  %v387_v59 = vpop.f32.mrf.mxu2 }
 0x127   : > { %v417_v60 = vadd.f32 %v387_v59, %v321_v51 }
 0x128   : > { %v348_v61 = vpop.f32.mrf.mxu1 }
 0x12d   : > { %v335_v62 = vpop.f32.mrf.mxu0 }
 0x12e   : > { %v389_v63 = vpop.f32.mrf.mxu2 }
 0x12f   : > { %v400_v0 = vpop.f32.mrf.mxu3 }
 0x130   : > { %v418_v1 = vadd.f32 %v400_v0, %v334_v58 }
 0x135   : > { %v413_v2 = vpop.f32.mrf.mxu0  ;;  %v457_v3 = vpop.f32.mrf.mxu1 }
 0x136   : > { %v419_v4 = vadd.f32 %v413_v2, %v347_v56  ;;  %v487_v5 = vadd.f32 %v457_v3, %v417_v60  ;;  %v470_v6 = vpop.f32.mrf.mxu2 }
 0x137   : > { %v402_v7 = vpop.f32.mrf.mxu3  ;;  %v488_v8 = vadd.f32 %v470_v6, %v418_v1 }
 0x13d   : > { %v415_v9 = vpop.f32.mrf.mxu0  ;;  %v459_v10 = vpop.f32.mrf.mxu1 }
 0x13e   : > { %v472_v11 = vpop.f32.mrf.mxu2 }
 0x13f   : > { %v483_v12 = vpop.f32.mrf.mxu3 }
 0x140   : > { %v489_v34 = vadd.f32 %v483_v12, %v419_v4 }
 0x145   : > { %v527_v13 = vpop.f32.mrf.mxu0  ;;  %v540_v14 = vpop.f32.mrf.mxu1 }
 0x146   : > { %v553_v15 = vpop.f32.mrf.mxu2  ;;  %v557_v35 = vadd.f32 %v527_v13, %v487_v5  ;;  %v558_v37 = vadd.f32 %v540_v14, %v488_v8 }
 0x147   : > { %v485_v16 = vpop.f32.mrf.mxu3  ;;  %v559_v39 = vadd.f32 %v553_v15, %v489_v34 }
 0x14d   : > { %v542_v17 = vpop.f32.mrf.mxu1  ;;  %v529_v18 = vpop.f32.mrf.mxu0 }
 0x14e   : > { %v555_v19 = vpop.f32.mrf.mxu2 }
 0x157   : > { %v597_v20 = vpop.f32.mrf.mxu3 }
 0x158   : > { %v627_v40 = vadd.f32 %v597_v20, %v557_v35 }
 0x15f   : > { %v667_v21 = vpop.f32.mrf.mxu2  ;;  %v623_v22 = vpop.f32.mrf.mxu1 }
 0x160   : > { %v610_v23 = vpop.f32.mrf.mxu0  ;;  %v599_v24 = vpop.f32.mrf.mxu3  ;;  %v697_v44 = vadd.f32 %v667_v21, %v627_v40  ;;  %v629_v45 = vadd.f32 %v623_v22, %v559_v39 }
 0x161   : > { %v628_v42 = vadd.f32 %v610_v23, %v558_v37 }
 0x167   : > { %v625_v25 = vpop.f32.mrf.mxu1  ;;  %v669_v26 = vpop.f32.mrf.mxu2 }
 0x168   : > { %v612_v27 = vpop.f32.mrf.mxu0 }
 0x16f   : > { %v680_v28 = vpop.f32.mrf.mxu3 }
 0x170   : > { %v693_v29 = vpop.f32.mrf.mxu0  ;;  %v698_v46 = vadd.f32 %v680_v28, %v628_v42 }
 0x171   : > { %v699_v47 = vadd.f32 %v693_v29, %v629_v45 }
 0x175   : > { %v737_v30 = vpop.f32.mrf.mxu1 }
 0x176   : > { %v750_v31 = vpop.f32.mrf.mxu2  ;;  %v767_v48 = vadd.f32 %v737_v30, %v697_v44 }
 0x177   : > { %v682_v32 = vpop.f32.mrf.mxu3  ;;  %v768_v50 = vadd.f32 %v750_v31, %v698_v46 }
 0x178   : > { %v695_v33 = vpop.f32.mrf.mxu0 }
 0x17d   : > { %v739_v36 = vpop.f32.mrf.mxu1 }
 0x17e   : > { %v752_v38 = vpop.f32.mrf.mxu2 }
 0x17f   : > { %v763_v41 = vpop.f32.mrf.mxu3 }
 0x180   : > { %v769_v52 = vadd.f32 %v763_v41, %v699_v47 }
 0x184   : > { %v807_v51 = vpop.f32.mrf.mxu0 }
 0x185   : > { %v837_v53 = vadd.f32 %v807_v51, %v767_v48  ;;  %v820_v54 = vpop.f32.mrf.mxu1 }
 0x186   : > { %v838_v55 = vadd.f32 %v820_v54, %v768_v50  ;;  %v833_v56 = vpop.f32.mrf.mxu2 }
 0x187   : > { %v1303_v57 = vadd.f32 %v846_v49, %v837_v53  ;;  %v839_v58 = vadd.f32 %v833_v56, %v769_v52  ;;  %v765_v59 = vpop.f32.mrf.mxu3 }
 0x188   : > { %v1305_v60 = vadd.f32 %v846_v49, %v838_v55 }
 0x189   : > { %v850_v61 = vand.u32 2147483647, %v1303_v57  ;;  %v1308_v62 = vadd.f32 %v846_v49, %v839_v58  ;;  %v929_v49 = vlaneseq  ;;  %vm862_vm7 = vcmp.ge.f32.partialorder %v1303_v57, 0.0 }
 0x18a   : > { %v851_v63 = vand.u32 2147483647, %v1305_v60  ;;  %vm863_vm4 = vcmp.ge.f32.partialorder %v1305_v60, 0.0 }
 0x18b   : > { %v853_v0 = vsub.f32 0.0, %v850_v61  ;;  %v852_v1 = vand.u32 2147483647, %v1308_v62  ;;  %vm864_vm8 = vcmp.ge.f32.partialorder %v1308_v62, 0.0 }
 0x18c   : > { %v854_v2 = vsub.f32 0.0, %v851_v63  ;;  %v809_v3 = vpop.f32.mrf.mxu0 }
 0x18d   : > { %v856_v4 = vmul.f32 1.442695, %v853_v0  ;;  %v855_v5 = vsub.f32 0.0, %v852_v1  ;;  %v822_v6 = vpop.f32.mrf.mxu1 }
 0x18e   : > { %v858_v7 = vmul.f32 1.442695, %v854_v2  ;;  %v835_v8 = vpop.f32.mrf.mxu2 }
 0x18f   : > { %1080 = vpow2.f32 %v856_v4  ;;  %v860_v9 = vmul.f32 1.442695, %v855_v5 }
 0x190   : > { %1082 = vpow2.f32 %v858_v7 }
 0x191   : > { %1084 = vpow2.f32 %v860_v9 }
 0x195   : > { %v1081_v10 = vpop.eup %1080 }
 0x196   : > { %v1083_v11 = vpop.eup %1082  ;;  %v865_v12 = vadd.f32 1.0, %v1081_v10 }
 0x197   : > { %v1085_v13 = vpop.eup %1084  ;;  %v866_v14 = vadd.f32 1.0, %v1083_v11 }
 0x198   : > { %1086 = vrcp.f32 %v865_v12  ;;  %v867_v15 = vadd.f32 1.0, %v1085_v13  ;;  %v877_v21 = vand.u32 2147483647, %v865_v12  ;;  %v879_v23 = vand.u32 2147483648, %v865_v12 }
 0x199   : > { %1088 = vrcp.f32 %v866_v14  ;;  %v894_v25 = vand.u32 2147483648, %v866_v14  ;;  %vm873_vm10 = vweird.f32 %v865_v12  ;;  %v892_v29 = vand.u32 2147483647, %v866_v14 }
 0x19a   : > { %1090 = vrcp.f32 %v867_v15  ;;  %vm878_vm12 = vcmp.eq.f32.partialorder %v877_v21, 8.507059e+37  ;;  %vm888_vm13 = vweird.f32 %v866_v14  ;;  %v880_v32 = vor.u32 1.1754944e-38, %v879_v23 }
 0x19b   : > { %v895_v34 = vor.u32 1.1754944e-38, %v894_v25  ;;  %v909_v35 = vand.u32 2147483648, %v867_v15  ;;  %v907_v38 = vand.u32 2147483647, %v867_v15  ;;  %vm893_vm1 = vcmp.eq.f32.partialorder %v892_v29, 8.507059e+37 }
 0x19c   : > { %vm903_vm2 = vweird.f32 %v867_v15 }
 0x19d   : > { %v910_v45 = vor.u32 1.1754944e-38, %v909_v35  ;;  %vm908_vm5 = vcmp.eq.f32.partialorder %v907_v38, 8.507059e+37 }
 0x19e   : > { %v1087_v16 = vpop.eup %1086 }
 0x19f   : > { %v1089_v17 = vpop.eup %1088  ;;  %v869_v18 = vmul.f32 %v1087_v16, %v865_v12  ;;  %vm874_vm9 = vweird.f32 %v1087_v16 }
 0x1a0   : > { %v884_v19 = vmul.f32 %v1089_v17, %v866_v14  ;;  %v1091_v22 = vpop.eup %1090  ;;  %vm889_vm11 = vweird.f32 %v1089_v17  ;;  %vm875_vm14 = vmor %vm873_vm10, %vm874_vm9  ;;  %vm926_vm9 = vcmask 1041408   ;;  %vm931_vm10 = vcmp.lt.s32.totalorder %v929_v49, 288 }
 0x1a1   : > { %v870_v20 = vsub.f32 1.0, %v869_v18  ;;  %v899_v27 = vmul.f32 %v1091_v22, %v867_v15  ;;  %vm890_vm15 = vmor %vm888_vm13, %vm889_vm11  ;;  %vm904_vm0 = vweird.f32 %v1091_v22 }
 0x1a2   : > { %v885_v24 = vsub.f32 1.0, %v884_v19  ;;  %vm905_vm3 = vmor %vm903_vm2, %vm904_vm0 }
 0x1a3   : > { %v871_v26 = vmul.f32 %v1087_v16, %v870_v20  ;;  %v900_v31 = vsub.f32 1.0, %v899_v27 }
 0x1a4   : > { %v886_v28 = vmul.f32 %v1089_v17, %v885_v24 }
 0x1a5   : > { %v872_v30 = vadd.f32 %v1087_v16, %v871_v26  ;;  %v901_v37 = vmul.f32 %v1091_v22, %v900_v31 }
 0x1a6   : > { %v887_v33 = vadd.f32 %v1089_v17, %v886_v28 }
 0x1a7   : > { %v876_v36 = vsel %vm875_vm14, %v1087_v16, %v872_v30  ;;  %v902_v42 = vadd.f32 %v1091_v22, %v901_v37 }
 0x1a8   : > { %v881_v39 = vsel %vm878_vm12, %v880_v32, %v876_v36  ;;  %v891_v40 = vsel %vm890_vm15, %v1089_v17, %v887_v33 }
 0x1a9   : > { %v896_v41 = vsel %vm893_vm1, %v895_v34, %v891_v40  ;;  %v913_v43 = vmul.f32 %v1081_v10, %v881_v39  ;;  %v906_v46 = vsel %vm905_vm3, %v1091_v22, %v902_v42 }
 0x1aa   : > { %v914_v44 = vmul.f32 %v1083_v11, %v896_v41  ;;  %v911_v48 = vsel %vm908_vm5, %v910_v45, %v906_v46 }
 0x1ab   : > { %v915_v51 = vmul.f32 %v1085_v13, %v911_v48  ;;  %v916_v52 = vsel %vm862_vm7, %v881_v39, %v913_v43 }
 0x1ac   : > { %v917_v47 = vsel %vm863_vm4, %v896_v41, %v914_v44 }
 0x1ad   : > { %v922_v50 = vrot.slane %v917_v47, 7  ;;  %v918_v54 = vsel %vm864_vm8, %v911_v48, %v915_v51 }
 0x1ae   : > { %v923_v55 = vrot.slane %v918_v54, 6 }
 0x1af   : > { %v925_v53 = vsel %vm924_vm6, %v916_v52, %v922_v50 }
 0x1b0   : > { %v927_v56 = vsel %vm926_vm9, %v925_v53, %v923_v55 }
 0x1b1   : > { %933 = vst.msk [vmem:[%s197_s24] sm:$0x7] %vm931_vm10, %v927_v56 }
 0x1b2 PF: > { %s16_s17 = sadd.s32 1, %s1098_s17  }
 0x1b3   : > { %p13_p4 = scmp.ge.s32.totalorder %s16_s17, 4  }
 0x1b5   :  { %15 = sbr.rel (!%p13_p4) target bundleno = 3 (0x3), region = 74 }

</bundles_post_ra>
